<compile_context>
chip_gen: v7x
topology: tpu7x:2x2x1
jax: 0.10.0
libtpu: 0.0.40
codegen_flags: <defaults>
</compile_context>

<pallas_src>
import functools

import jax
import jax.numpy as jnp
from jax.experimental import pallas as pl
from jax.experimental.pallas import tpu as pltpu  # noqa: F401  (TPU backend; no TPU-specific compiler params needed at these sizes)

LANE = 128
SUBLANE = 8


def _round_up(n, m):
    return ((n + m - 1) // m) * m


def _full_block_spec(arr):
    """Whole-array VMEM block (last two block dims == full array dims)."""
    ndim = arr.ndim
    return pl.BlockSpec(tuple(arr.shape), lambda *_args, _n=ndim: (0,) * _n)


def _lstm_net_kernel(x_ref, *refs, num_layers):
    """Fused multi-layer LSTM + Linear, fully unrolled over time.

    refs = (w_in_0, w_hh_0, b_0, ..., w_in_{L-1}, w_hh_{L-1}, b_{L-1},
            fc_w, fc_b, out_ref)

      x_ref  : (T*B8, I)   time-major, batch padded to 8 rows, flattened
      w_in_l : (in_l, 4H)  input->gates, gates packed (i|f|g|o), 4H == 128
      w_hh_l : (H, 4H)     hidden->gates
      b_l    : (1, 4H)     b_ih + b_hh
      fc_w   : (H, OP)     final Linear weight, OP = 128 (lane-dense)
      fc_b   : (1, OP)
      out    : (B8, OP)    full (8, 128) output tile
    """
    out_ref = refs[-1]
    fc_w_ref = refs[3 * num_layers]
    fc_b_ref = refs[3 * num_layers + 1]

    B8 = out_ref.shape[0]              # padded batch rows (8)
    H = refs[1].shape[0]               # true hidden size (32)
    G4 = refs[1].shape[1]              # packed gate width 4H (128)
    T = x_ref.shape[0] // B8           # sequence length

    # Lane mask selecting the cell-candidate ('g') gate columns [2H, 3H).
    lane = jax.lax.broadcasted_iota(jnp.int32, (B8, G4), 1)
    g_mask = (lane >= 2 * H) & (lane < 3 * H)

    def act_fn(pre):
        # ONE tanh pass over the packed gate vreg per call:
        #   sigmoid(x) = 0.5 * (tanh(x/2) + 1)   for the i/f/o lanes,
        #   tanh(x)                              for the g lanes.
        t = jnp.tanh(jnp.where(g_mask, pre, 0.5 * pre))
        return jnp.where(g_mask, t, 0.5 * (t + 1.0))

    # Load all weights once (tiny, stay vreg/VMEM resident).
    w_ins = [refs[3 * l][...] for l in range(num_layers)]
    w_hhs = [refs[3 * l + 1][...] for l in range(num_layers)]
    bs = [refs[3 * l + 2][...] for l in range(num_layers)]

    # Layer-0 input->gate contribution for ALL timesteps: one batched MXU
    # matmul off the serial recurrence path.  Each per-step slice below is a
    # whole (8, 128) sublane-aligned tile.
    gx0 = jnp.dot(x_ref[...], w_ins[0], preferred_element_type=jnp.float32) + bs[0]

    hs = [jnp.zeros((B8, H), jnp.float32) for _ in range(num_layers)]
    cs = [jnp.zeros((B8, H), jnp.float32) for _ in range(num_layers)]

    def cell_update(pre, c):
        a = act_fn(pre)                         # (B8, 4H) packed activations
        i_g = a[:, 0 * H:1 * H]
        f_g = a[:, 1 * H:2 * H]
        g_g = a[:, 2 * H:3 * H]
        o_g = a[:, 3 * H:4 * H]
        c_new = f_g * c + i_g * g_g
        h_new = o_g * jnp.tanh(c_new)
        return h_new, c_new

    for t in range(T):                          # fully unrolled, static indices
        # Layer 0: precomputed input-gate tile + recurrent matmul.
        pre = gx0[t * B8:(t + 1) * B8, :] + jnp.dot(
            hs[0], w_hhs[0], preferred_element_type=jnp.float32)
        hs[0], cs[0] = cell_update(pre, cs[0])
        x_t = hs[0]
        # Deeper layers fused into the same timestep: no intermediate hidden
        # sequence is ever materialized.
        for l in range(1, num_layers):
            pre = (jnp.dot(x_t, w_ins[l], preferred_element_type=jnp.float32)
                   + jnp.dot(hs[l], w_hhs[l], preferred_element_type=jnp.float32)
                   + bs[l])
            hs[l], cs[l] = cell_update(pre, cs[l])
            x_t = hs[l]

    # Final Linear on the last timestep's top-layer hidden state.
    # Full-tile, lane-dense (8, 128) store; wrapper slices to (B, output_size).
    out_ref[...] = (jnp.dot(hs[-1], fc_w_ref[...], preferred_element_type=jnp.float32)
                    + fc_b_ref[...])


def init_params(key, input_size, hidden_size, num_layers, output_size=45):
    """Raw (unpadded) parameters, PyTorch-style uniform(-1/sqrt(H), 1/sqrt(H)).
    Weights stored pre-transposed: w_ih (in, 4H), w_hh (H, 4H); gate order
    i, f, g, o.  b = b_ih + b_hh (they are only ever summed)."""
    H = hidden_size
    bound = 1.0 / float(H) ** 0.5
    layers = []
    for layer in range(num_layers):
        in_dim = input_size if layer == 0 else H
        key, k1, k2, k3, k4 = jax.random.split(key, 5)
        w_ih = jax.random.uniform(k1, (in_dim, 4 * H), jnp.float32, -bound, bound)
        w_hh = jax.random.uniform(k2, (H, 4 * H), jnp.float32, -bound, bound)
        b_ih = jax.random.uniform(k3, (1, 4 * H), jnp.float32, -bound, bound)
        b_hh = jax.random.uniform(k4, (1, 4 * H), jnp.float32, -bound, bound)
        layers.append({"w_ih": w_ih, "w_hh": w_hh, "b": b_ih + b_hh})
    key, k5, k6 = jax.random.split(key, 3)
    fc_w = jax.random.uniform(k5, (H, output_size), jnp.float32, -bound, bound)
    fc_b = jax.random.uniform(k6, (1, output_size), jnp.float32, -bound, bound)
    return {"layers": layers, "fc_w": fc_w, "fc_b": fc_b}


def prepare_params(raw):
    """Kernel layout.  With H=32 the four gates pack exactly into one 128-lane
    block, so the LSTM weights need NO padding at all.  Only the FC head is
    column-padded to a lane-dense multiple of 128."""
    H = raw["layers"][0]["w_hh"].shape[0]
    O = raw["fc_w"].shape[1]
    OP = _round_up(O, LANE)
    layers = [{"w_in": lp["w_ih"], "w_hh": lp["w_hh"], "b": lp["b"]}
              for lp in raw["layers"]]
    fc_w = jnp.zeros((H, OP), jnp.float32).at[:, :O].set(raw["fc_w"])
    fc_b = jnp.zeros((1, OP), jnp.float32).at[:, :O].set(raw["fc_b"])
    return {"layers": layers, "fc_w": fc_w, "fc_b": fc_b}


@functools.partial(jax.jit, static_argnames=("output_size",))
def lstm_net_forward(params, x_bti, output_size):
    """x_bti: (B, T, input_size) batch_first, same as the PyTorch module.
    Returns (B, output_size) = fc(last-timestep hidden of the top LSTM layer)."""
    B, T, I = x_bti.shape
    num_layers = len(params["layers"])
    OP = params["fc_w"].shape[1]                # padded output width (>= output_size)
    B8 = _round_up(B, SUBLANE)                  # pad batch rows to a full sublane tile

    # (B, T, I) -> time-major, batch rows zero-padded to 8, flattened to
    # (T*B8, I).  Free XLA layout work outside the kernel; each per-step slice
    # inside the kernel is then a whole sublane-aligned tile.  Padded rows are
    # independent of real rows (batch rows never mix) and are sliced off below.
    x_tbi = jnp.transpose(x_bti.astype(jnp.float32), (1, 0, 2))
    x_pad = jnp.zeros((T, B8, I), jnp.float32).at[:, :B, :].set(x_tbi)
    x_flat = x_pad.reshape(T * B8, I)

    inputs = [x_flat]
    for lp in params["layers"]:
        inputs += [lp["w_in"], lp["w_hh"], lp["b"]]
    inputs += [params["fc_w"], params["fc_b"]]

    out_pad = pl.pallas_call(
        functools.partial(_lstm_net_kernel, num_layers=num_layers),
        out_shape=jax.ShapeDtypeStruct((B8, OP), jnp.float32),
        in_specs=[_full_block_spec(a) for a in inputs],
        out_specs=pl.BlockSpec((B8, OP), lambda: (0, 0)),
    )(*inputs)
    return out_pad[:B, :output_size]


def lstm_net_reference(raw, x_bti):
    """Pure-jnp reference matching torch.nn.LSTM(batch_first=True) + Linear."""
    B, T, _ = x_bti.shape
    H = raw["layers"][0]["w_hh"].shape[0]
    seq = x_bti
    for lp in raw["layers"]:
        h = jnp.zeros((B, H), jnp.float32)
        c = jnp.zeros((B, H), jnp.float32)
        outs = []
        for t in range(T):
            gates = seq[:, t, :] @ lp["w_ih"] + h @ lp["w_hh"] + lp["b"]
            i_g = jax.nn.sigmoid(gates[:, 0 * H:1 * H])
            f_g = jax.nn.sigmoid(gates[:, 1 * H:2 * H])
            g_g = jnp.tanh(gates[:, 2 * H:3 * H])
            o_g = jax.nn.sigmoid(gates[:, 3 * H:4 * H])
            c = f_g * c + i_g * g_g
            h = o_g * jnp.tanh(c)
            outs.append(h)
        seq = jnp.stack(outs, axis=1)
    return seq[:, -1, :] @ raw["fc_w"] + raw["fc_b"]


if __name__ == "__main__":
    # Make kernel and reference matmuls both full-f32 for a tight comparison.
    jax.config.update("jax_default_matmul_precision", "highest")

    B, T = 2, 8
    INPUT_SIZE, HIDDEN_SIZE, NUM_LAYERS, OUTPUT_SIZE = 4, 32, 2, 45

    key = jax.random.PRNGKey(0)
    key, pkey, xkey = jax.random.split(key, 3)
    raw = init_params(pkey, INPUT_SIZE, HIDDEN_SIZE, NUM_LAYERS, OUTPUT_SIZE)
    params = prepare_params(raw)
    x = jax.random.normal(xkey, (B, T, INPUT_SIZE), jnp.float32)

    out = lstm_net_forward(params, x, output_size=OUTPUT_SIZE)
    jax.block_until_ready(out)
    assert out.shape == (B, OUTPUT_SIZE), out.shape
    assert out.dtype == jnp.float32

    ref = lstm_net_reference(raw, x)
    max_err = float(jnp.max(jnp.abs(out - ref)))
    assert max_err < 5e-3, f"mismatch vs reference: {max_err}"

    print("KERNEL_OK")
</pallas_src>

<mosaic_0001>
module attributes {stable_mosaic.version = 11 : i64} {
  func.func @_lstm_net_kernel(%arg0: memref<64x4xf32, #tpu.memory_space<vmem>>, %arg1: memref<4x128xf32, #tpu.memory_space<vmem>>, %arg2: memref<32x128xf32, #tpu.memory_space<vmem>>, %arg3: memref<1x128xf32, #tpu.memory_space<vmem>>, %arg4: memref<32x128xf32, #tpu.memory_space<vmem>>, %arg5: memref<32x128xf32, #tpu.memory_space<vmem>>, %arg6: memref<1x128xf32, #tpu.memory_space<vmem>>, %arg7: memref<32x128xf32, #tpu.memory_space<vmem>>, %arg8: memref<1x128xf32, #tpu.memory_space<vmem>>, %arg9: memref<8x128xf32, #tpu.memory_space<vmem>>) attributes {dimension_semantics = [], scalar_prefetch = 0 : i64, scratch_operands = 0 : i64, tpu.core_type = #tpu.core_type<tc>} {
    %0 = tpu.iota {dimensions = array<i32: 1>} : vector<8x128xi32>
    %c64_i32 = arith.constant 64 : i32
    %1 = vector.broadcast %c64_i32 : i32 to vector<8x128xi32>
    %2 = arith.cmpi sge, %0, %1 : vector<8x128xi32>
    %c96_i32 = arith.constant 96 : i32
    %3 = vector.broadcast %c96_i32 : i32 to vector<8x128xi32>
    %4 = arith.cmpi slt, %0, %3 : vector<8x128xi32>
    %5 = arith.andi %2, %4 : vector<8x128xi1>
    %c0 = arith.constant 0 : index
    %c0_0 = arith.constant 0 : index
    %6 = vector.load %arg1[%c0, %c0_0] : memref<4x128xf32, #tpu.memory_space<vmem>>, vector<4x128xf32>
    %c0_1 = arith.constant 0 : index
    %c0_2 = arith.constant 0 : index
    %7 = vector.load %arg4[%c0_1, %c0_2] : memref<32x128xf32, #tpu.memory_space<vmem>>, vector<32x128xf32>
    %c0_3 = arith.constant 0 : index
    %c0_4 = arith.constant 0 : index
    %8 = vector.load %arg2[%c0_3, %c0_4] : memref<32x128xf32, #tpu.memory_space<vmem>>, vector<32x128xf32>
    %c0_5 = arith.constant 0 : index
    %c0_6 = arith.constant 0 : index
    %9 = vector.load %arg5[%c0_5, %c0_6] : memref<32x128xf32, #tpu.memory_space<vmem>>, vector<32x128xf32>
    %c0_7 = arith.constant 0 : index
    %c0_8 = arith.constant 0 : index
    %10 = vector.load %arg3[%c0_7, %c0_8] : memref<1x128xf32, #tpu.memory_space<vmem>>, vector<1x128xf32>
    %c0_9 = arith.constant 0 : index
    %c0_10 = arith.constant 0 : index
    %11 = vector.load %arg6[%c0_9, %c0_10] : memref<1x128xf32, #tpu.memory_space<vmem>>, vector<1x128xf32>
    %c0_11 = arith.constant 0 : index
    %c0_12 = arith.constant 0 : index
    %12 = vector.load %arg0[%c0_11, %c0_12] : memref<64x4xf32, #tpu.memory_space<vmem>>, vector<64x4xf32>
    %cst = arith.constant dense<0.000000e+00> : vector<64x128xf32>
    %13 = tpu.matmul %12, %6, %cst {dimension_numbers = #tpu.dot_dimension_numbers<[1], [0], [0], [1], [0, 0, 1, 1], [], []>, precision = #tpu.contract_precision<fp32>} : vector<64x4xf32>, vector<4x128xf32>, vector<64x128xf32> -> vector<64x128xf32>
    %14 = vector.broadcast %10 : vector<1x128xf32> to vector<64x128xf32>
    %15 = arith.addf %13, %14 : vector<64x128xf32>
    %cst_13 = arith.constant 0.000000e+00 : f32
    %16 = vector.broadcast %cst_13 : f32 to vector<8x32xf32>
    %cst_14 = arith.constant 0.000000e+00 : f32
    %17 = vector.broadcast %cst_14 : f32 to vector<8x32xf32>
    %cst_15 = arith.constant 0.000000e+00 : f32
    %18 = vector.broadcast %cst_15 : f32 to vector<8x32xf32>
    %cst_16 = arith.constant 0.000000e+00 : f32
    %19 = vector.broadcast %cst_16 : f32 to vector<8x32xf32>
    %20 = vector.extract_strided_slice %15 {offsets = [0, 0], sizes = [8, 128], strides = [1, 1]} : vector<64x128xf32> to vector<8x128xf32>
    %cst_17 = arith.constant dense<0.000000e+00> : vector<8x128xf32>
    %21 = tpu.matmul %16, %8, %cst_17 {dimension_numbers = #tpu.dot_dimension_numbers<[1], [0], [0], [1], [0, 0, 1, 1], [], []>, precision = #tpu.contract_precision<fp32>} : vector<8x32xf32>, vector<32x128xf32>, vector<8x128xf32> -> vector<8x128xf32>
    %22 = arith.addf %20, %21 : vector<8x128xf32>
    %cst_18 = arith.constant 5.000000e-01 : f32
    %23 = vector.broadcast %cst_18 : f32 to vector<8x128xf32>
    %24 = arith.mulf %23, %22 : vector<8x128xf32>
    %25 = arith.select %5, %22, %24 : vector<8x128xi1>, vector<8x128xf32>
    %26 = math.tanh %25 : vector<8x128xf32>
    %cst_19 = arith.constant 1.000000e+00 : f32
    %27 = vector.broadcast %cst_19 : f32 to vector<8x128xf32>
    %28 = arith.addf %26, %27 : vector<8x128xf32>
    %cst_20 = arith.constant 5.000000e-01 : f32
    %29 = vector.broadcast %cst_20 : f32 to vector<8x128xf32>
    %30 = arith.mulf %29, %28 : vector<8x128xf32>
    %31 = arith.select %5, %26, %30 : vector<8x128xi1>, vector<8x128xf32>
    %32 = vector.extract_strided_slice %31 {offsets = [0, 0], sizes = [8, 32], strides = [1, 1]} : vector<8x128xf32> to vector<8x32xf32>
    %33 = vector.extract_strided_slice %31 {offsets = [0, 32], sizes = [8, 32], strides = [1, 1]} : vector<8x128xf32> to vector<8x32xf32>
    %34 = vector.extract_strided_slice %31 {offsets = [0, 64], sizes = [8, 32], strides = [1, 1]} : vector<8x128xf32> to vector<8x32xf32>
    %35 = vector.extract_strided_slice %31 {offsets = [0, 96], sizes = [8, 32], strides = [1, 1]} : vector<8x128xf32> to vector<8x32xf32>
    %36 = arith.mulf %33, %18 : vector<8x32xf32>
    %37 = arith.mulf %32, %34 : vector<8x32xf32>
    %38 = arith.addf %36, %37 : vector<8x32xf32>
    %39 = math.tanh %38 : vector<8x32xf32>
    %40 = arith.mulf %35, %39 : vector<8x32xf32>
    %cst_21 = arith.constant dense<0.000000e+00> : vector<8x128xf32>
    %41 = tpu.matmul %40, %7, %cst_21 {dimension_numbers = #tpu.dot_dimension_numbers<[1], [0], [0], [1], [0, 0, 1, 1], [], []>, precision = #tpu.contract_precision<fp32>} : vector<8x32xf32>, vector<32x128xf32>, vector<8x128xf32> -> vector<8x128xf32>
    %cst_22 = arith.constant dense<0.000000e+00> : vector<8x128xf32>
    %42 = tpu.matmul %17, %9, %cst_22 {dimension_numbers = #tpu.dot_dimension_numbers<[1], [0], [0], [1], [0, 0, 1, 1], [], []>, precision = #tpu.contract_precision<fp32>} : vector<8x32xf32>, vector<32x128xf32>, vector<8x128xf32> -> vector<8x128xf32>
    %43 = arith.addf %41, %42 : vector<8x128xf32>
    %44 = vector.broadcast %11 : vector<1x128xf32> to vector<8x128xf32>
    %45 = arith.addf %43, %44 : vector<8x128xf32>
    %cst_23 = arith.constant 5.000000e-01 : f32
    %46 = vector.broadcast %cst_23 : f32 to vector<8x128xf32>
    %47 = arith.mulf %46, %45 : vector<8x128xf32>
    %48 = arith.select %5, %45, %47 : vector<8x128xi1>, vector<8x128xf32>
    %49 = math.tanh %48 : vector<8x128xf32>
    %cst_24 = arith.constant 1.000000e+00 : f32
    %50 = vector.broadcast %cst_24 : f32 to vector<8x128xf32>
    %51 = arith.addf %49, %50 : vector<8x128xf32>
    %cst_25 = arith.constant 5.000000e-01 : f32
    %52 = vector.broadcast %cst_25 : f32 to vector<8x128xf32>
    %53 = arith.mulf %52, %51 : vector<8x128xf32>
    %54 = arith.select %5, %49, %53 : vector<8x128xi1>, vector<8x128xf32>
    %55 = vector.extract_strided_slice %54 {offsets = [0, 0], sizes = [8, 32], strides = [1, 1]} : vector<8x128xf32> to vector<8x32xf32>
    %56 = vector.extract_strided_slice %54 {offsets = [0, 32], sizes = [8, 32], strides = [1, 1]} : vector<8x128xf32> to vector<8x32xf32>
    %57 = vector.extract_strided_slice %54 {offsets = [0, 64], sizes = [8, 32], strides = [1, 1]} : vector<8x128xf32> to vector<8x32xf32>
    %58 = vector.extract_strided_slice %54 {offsets = [0, 96], sizes = [8, 32], strides = [1, 1]} : vector<8x128xf32> to vector<8x32xf32>
    %59 = arith.mulf %56, %19 : vector<8x32xf32>
    %60 = arith.mulf %55, %57 : vector<8x32xf32>
    %61 = arith.addf %59, %60 : vector<8x32xf32>
    %62 = math.tanh %61 : vector<8x32xf32>
    %63 = arith.mulf %58, %62 : vector<8x32xf32>
    %64 = vector.extract_strided_slice %15 {offsets = [8, 0], sizes = [8, 128], strides = [1, 1]} : vector<64x128xf32> to vector<8x128xf32>
    %cst_26 = arith.constant dense<0.000000e+00> : vector<8x128xf32>
    %65 = tpu.matmul %40, %8, %cst_26 {dimension_numbers = #tpu.dot_dimension_numbers<[1], [0], [0], [1], [0, 0, 1, 1], [], []>, precision = #tpu.contract_precision<fp32>} : vector<8x32xf32>, vector<32x128xf32>, vector<8x128xf32> -> vector<8x128xf32>
    %66 = arith.addf %64, %65 : vector<8x128xf32>
    %cst_27 = arith.constant 5.000000e-01 : f32
    %67 = vector.broadcast %cst_27 : f32 to vector<8x128xf32>
    %68 = arith.mulf %67, %66 : vector<8x128xf32>
    %69 = arith.select %5, %66, %68 : vector<8x128xi1>, vector<8x128xf32>
    %70 = math.tanh %69 : vector<8x128xf32>
    %cst_28 = arith.constant 1.000000e+00 : f32
    %71 = vector.broadcast %cst_28 : f32 to vector<8x128xf32>
    %72 = arith.addf %70, %71 : vector<8x128xf32>
    %cst_29 = arith.constant 5.000000e-01 : f32
    %73 = vector.broadcast %cst_29 : f32 to vector<8x128xf32>
    %74 = arith.mulf %73, %72 : vector<8x128xf32>
    %75 = arith.select %5, %70, %74 : vector<8x128xi1>, vector<8x128xf32>
    %76 = vector.extract_strided_slice %75 {offsets = [0, 0], sizes = [8, 32], strides = [1, 1]} : vector<8x128xf32> to vector<8x32xf32>
    %77 = vector.extract_strided_slice %75 {offsets = [0, 32], sizes = [8, 32], strides = [1, 1]} : vector<8x128xf32> to vector<8x32xf32>
    %78 = vector.extract_strided_slice %75 {offsets = [0, 64], sizes = [8, 32], strides = [1, 1]} : vector<8x128xf32> to vector<8x32xf32>
    %79 = vector.extract_strided_slice %75 {offsets = [0, 96], sizes = [8, 32], strides = [1, 1]} : vector<8x128xf32> to vector<8x32xf32>
    %80 = arith.mulf %77, %38 : vector<8x32xf32>
    %81 = arith.mulf %76, %78 : vector<8x32xf32>
    %82 = arith.addf %80, %81 : vector<8x32xf32>
    %83 = math.tanh %82 : vector<8x32xf32>
    %84 = arith.mulf %79, %83 : vector<8x32xf32>
    %cst_30 = arith.constant dense<0.000000e+00> : vector<8x128xf32>
    %85 = tpu.matmul %84, %7, %cst_30 {dimension_numbers = #tpu.dot_dimension_numbers<[1], [0], [0], [1], [0, 0, 1, 1], [], []>, precision = #tpu.contract_precision<fp32>} : vector<8x32xf32>, vector<32x128xf32>, vector<8x128xf32> -> vector<8x128xf32>
    %cst_31 = arith.constant dense<0.000000e+00> : vector<8x128xf32>
    %86 = tpu.matmul %63, %9, %cst_31 {dimension_numbers = #tpu.dot_dimension_numbers<[1], [0], [0], [1], [0, 0, 1, 1], [], []>, precision = #tpu.contract_precision<fp32>} : vector<8x32xf32>, vector<32x128xf32>, vector<8x128xf32> -> vector<8x128xf32>
    %87 = arith.addf %85, %86 : vector<8x128xf32>
    %88 = vector.broadcast %11 : vector<1x128xf32> to vector<8x128xf32>
    %89 = arith.addf %87, %88 : vector<8x128xf32>
    %cst_32 = arith.constant 5.000000e-01 : f32
    %90 = vector.broadcast %cst_32 : f32 to vector<8x128xf32>
    %91 = arith.mulf %90, %89 : vector<8x128xf32>
    %92 = arith.select %5, %89, %91 : vector<8x128xi1>, vector<8x128xf32>
    %93 = math.tanh %92 : vector<8x128xf32>
    %cst_33 = arith.constant 1.000000e+00 : f32
    %94 = vector.broadcast %cst_33 : f32 to vector<8x128xf32>
    %95 = arith.addf %93, %94 : vector<8x128xf32>
    %cst_34 = arith.constant 5.000000e-01 : f32
    %96 = vector.broadcast %cst_34 : f32 to vector<8x128xf32>
    %97 = arith.mulf %96, %95 : vector<8x128xf32>
    %98 = arith.select %5, %93, %97 : vector<8x128xi1>, vector<8x128xf32>
    %99 = vector.extract_strided_slice %98 {offsets = [0, 0], sizes = [8, 32], strides = [1, 1]} : vector<8x128xf32> to vector<8x32xf32>
    %100 = vector.extract_strided_slice %98 {offsets = [0, 32], sizes = [8, 32], strides = [1, 1]} : vector<8x128xf32> to vector<8x32xf32>
    %101 = vector.extract_strided_slice %98 {offsets = [0, 64], sizes = [8, 32], strides = [1, 1]} : vector<8x128xf32> to vector<8x32xf32>
    %102 = vector.extract_strided_slice %98 {offsets = [0, 96], sizes = [8, 32], strides = [1, 1]} : vector<8x128xf32> to vector<8x32xf32>
    %103 = arith.mulf %100, %61 : vector<8x32xf32>
    %104 = arith.mulf %99, %101 : vector<8x32xf32>
    %105 = arith.addf %103, %104 : vector<8x32xf32>
    %106 = math.tanh %105 : vector<8x32xf32>
    %107 = arith.mulf %102, %106 : vector<8x32xf32>
    %108 = vector.extract_strided_slice %15 {offsets = [16, 0], sizes = [8, 128], strides = [1, 1]} : vector<64x128xf32> to vector<8x128xf32>
    %cst_35 = arith.constant dense<0.000000e+00> : vector<8x128xf32>
    %109 = tpu.matmul %84, %8, %cst_35 {dimension_numbers = #tpu.dot_dimension_numbers<[1], [0], [0], [1], [0, 0, 1, 1], [], []>, precision = #tpu.contract_precision<fp32>} : vector<8x32xf32>, vector<32x128xf32>, vector<8x128xf32> -> vector<8x128xf32>
    %110 = arith.addf %108, %109 : vector<8x128xf32>
    %cst_36 = arith.constant 5.000000e-01 : f32
    %111 = vector.broadcast %cst_36 : f32 to vector<8x128xf32>
    %112 = arith.mulf %111, %110 : vector<8x128xf32>
    %113 = arith.select %5, %110, %112 : vector<8x128xi1>, vector<8x128xf32>
    %114 = math.tanh %113 : vector<8x128xf32>
    %cst_37 = arith.constant 1.000000e+00 : f32
    %115 = vector.broadcast %cst_37 : f32 to vector<8x128xf32>
    %116 = arith.addf %114, %115 : vector<8x128xf32>
    %cst_38 = arith.constant 5.000000e-01 : f32
    %117 = vector.broadcast %cst_38 : f32 to vector<8x128xf32>
    %118 = arith.mulf %117, %116 : vector<8x128xf32>
    %119 = arith.select %5, %114, %118 : vector<8x128xi1>, vector<8x128xf32>
    %120 = vector.extract_strided_slice %119 {offsets = [0, 0], sizes = [8, 32], strides = [1, 1]} : vector<8x128xf32> to vector<8x32xf32>
    %121 = vector.extract_strided_slice %119 {offsets = [0, 32], sizes = [8, 32], strides = [1, 1]} : vector<8x128xf32> to vector<8x32xf32>
    %122 = vector.extract_strided_slice %119 {offsets = [0, 64], sizes = [8, 32], strides = [1, 1]} : vector<8x128xf32> to vector<8x32xf32>
    %123 = vector.extract_strided_slice %119 {offsets = [0, 96], sizes = [8, 32], strides = [1, 1]} : vector<8x128xf32> to vector<8x32xf32>
    %124 = arith.mulf %121, %82 : vector<8x32xf32>
    %125 = arith.mulf %120, %122 : vector<8x32xf32>
    %126 = arith.addf %124, %125 : vector<8x32xf32>
    %127 = math.tanh %126 : vector<8x32xf32>
    %128 = arith.mulf %123, %127 : vector<8x32xf32>
    %cst_39 = arith.constant dense<0.000000e+00> : vector<8x128xf32>
    %129 = tpu.matmul %128, %7, %cst_39 {dimension_numbers = #tpu.dot_dimension_numbers<[1], [0], [0], [1], [0, 0, 1, 1], [], []>, precision = #tpu.contract_precision<fp32>} : vector<8x32xf32>, vector<32x128xf32>, vector<8x128xf32> -> vector<8x128xf32>
    %cst_40 = arith.constant dense<0.000000e+00> : vector<8x128xf32>
    %130 = tpu.matmul %107, %9, %cst_40 {dimension_numbers = #tpu.dot_dimension_numbers<[1], [0], [0], [1], [0, 0, 1, 1], [], []>, precision = #tpu.contract_precision<fp32>} : vector<8x32xf32>, vector<32x128xf32>, vector<8x128xf32> -> vector<8x128xf32>
    %131 = arith.addf %129, %130 : vector<8x128xf32>
    %132 = vector.broadcast %11 : vector<1x128xf32> to vector<8x128xf32>
    %133 = arith.addf %131, %132 : vector<8x128xf32>
    %cst_41 = arith.constant 5.000000e-01 : f32
    %134 = vector.broadcast %cst_41 : f32 to vector<8x128xf32>
    %135 = arith.mulf %134, %133 : vector<8x128xf32>
    %136 = arith.select %5, %133, %135 : vector<8x128xi1>, vector<8x128xf32>
    %137 = math.tanh %136 : vector<8x128xf32>
    %cst_42 = arith.constant 1.000000e+00 : f32
    %138 = vector.broadcast %cst_42 : f32 to vector<8x128xf32>
    %139 = arith.addf %137, %138 : vector<8x128xf32>
    %cst_43 = arith.constant 5.000000e-01 : f32
    %140 = vector.broadcast %cst_43 : f32 to vector<8x128xf32>
    %141 = arith.mulf %140, %139 : vector<8x128xf32>
    %142 = arith.select %5, %137, %141 : vector<8x128xi1>, vector<8x128xf32>
    %143 = vector.extract_strided_slice %142 {offsets = [0, 0], sizes = [8, 32], strides = [1, 1]} : vector<8x128xf32> to vector<8x32xf32>
    %144 = vector.extract_strided_slice %142 {offsets = [0, 32], sizes = [8, 32], strides = [1, 1]} : vector<8x128xf32> to vector<8x32xf32>
    %145 = vector.extract_strided_slice %142 {offsets = [0, 64], sizes = [8, 32], strides = [1, 1]} : vector<8x128xf32> to vector<8x32xf32>
    %146 = vector.extract_strided_slice %142 {offsets = [0, 96], sizes = [8, 32], strides = [1, 1]} : vector<8x128xf32> to vector<8x32xf32>
    %147 = arith.mulf %144, %105 : vector<8x32xf32>
    %148 = arith.mulf %143, %145 : vector<8x32xf32>
    %149 = arith.addf %147, %148 : vector<8x32xf32>
    %150 = math.tanh %149 : vector<8x32xf32>
    %151 = arith.mulf %146, %150 : vector<8x32xf32>
    %152 = vector.extract_strided_slice %15 {offsets = [24, 0], sizes = [8, 128], strides = [1, 1]} : vector<64x128xf32> to vector<8x128xf32>
    %cst_44 = arith.constant dense<0.000000e+00> : vector<8x128xf32>
    %153 = tpu.matmul %128, %8, %cst_44 {dimension_numbers = #tpu.dot_dimension_numbers<[1], [0], [0], [1], [0, 0, 1, 1], [], []>, precision = #tpu.contract_precision<fp32>} : vector<8x32xf32>, vector<32x128xf32>, vector<8x128xf32> -> vector<8x128xf32>
    %154 = arith.addf %152, %153 : vector<8x128xf32>
    %cst_45 = arith.constant 5.000000e-01 : f32
    %155 = vector.broadcast %cst_45 : f32 to vector<8x128xf32>
    %156 = arith.mulf %155, %154 : vector<8x128xf32>
    %157 = arith.select %5, %154, %156 : vector<8x128xi1>, vector<8x128xf32>
    %158 = math.tanh %157 : vector<8x128xf32>
    %cst_46 = arith.constant 1.000000e+00 : f32
    %159 = vector.broadcast %cst_46 : f32 to vector<8x128xf32>
    %160 = arith.addf %158, %159 : vector<8x128xf32>
    %cst_47 = arith.constant 5.000000e-01 : f32
    %161 = vector.broadcast %cst_47 : f32 to vector<8x128xf32>
    %162 = arith.mulf %161, %160 : vector<8x128xf32>
    %163 = arith.select %5, %158, %162 : vector<8x128xi1>, vector<8x128xf32>
    %164 = vector.extract_strided_slice %163 {offsets = [0, 0], sizes = [8, 32], strides = [1, 1]} : vector<8x128xf32> to vector<8x32xf32>
    %165 = vector.extract_strided_slice %163 {offsets = [0, 32], sizes = [8, 32], strides = [1, 1]} : vector<8x128xf32> to vector<8x32xf32>
    %166 = vector.extract_strided_slice %163 {offsets = [0, 64], sizes = [8, 32], strides = [1, 1]} : vector<8x128xf32> to vector<8x32xf32>
    %167 = vector.extract_strided_slice %163 {offsets = [0, 96], sizes = [8, 32], strides = [1, 1]} : vector<8x128xf32> to vector<8x32xf32>
    %168 = arith.mulf %165, %126 : vector<8x32xf32>
    %169 = arith.mulf %164, %166 : vector<8x32xf32>
    %170 = arith.addf %168, %169 : vector<8x32xf32>
    %171 = math.tanh %170 : vector<8x32xf32>
    %172 = arith.mulf %167, %171 : vector<8x32xf32>
    %cst_48 = arith.constant dense<0.000000e+00> : vector<8x128xf32>
    %173 = tpu.matmul %172, %7, %cst_48 {dimension_numbers = #tpu.dot_dimension_numbers<[1], [0], [0], [1], [0, 0, 1, 1], [], []>, precision = #tpu.contract_precision<fp32>} : vector<8x32xf32>, vector<32x128xf32>, vector<8x128xf32> -> vector<8x128xf32>
    %cst_49 = arith.constant dense<0.000000e+00> : vector<8x128xf32>
    %174 = tpu.matmul %151, %9, %cst_49 {dimension_numbers = #tpu.dot_dimension_numbers<[1], [0], [0], [1], [0, 0, 1, 1], [], []>, precision = #tpu.contract_precision<fp32>} : vector<8x32xf32>, vector<32x128xf32>, vector<8x128xf32> -> vector<8x128xf32>
    %175 = arith.addf %173, %174 : vector<8x128xf32>
    %176 = vector.broadcast %11 : vector<1x128xf32> to vector<8x128xf32>
    %177 = arith.addf %175, %176 : vector<8x128xf32>
    %cst_50 = arith.constant 5.000000e-01 : f32
    %178 = vector.broadcast %cst_50 : f32 to vector<8x128xf32>
    %179 = arith.mulf %178, %177 : vector<8x128xf32>
    %180 = arith.select %5, %177, %179 : vector<8x128xi1>, vector<8x128xf32>
    %181 = math.tanh %180 : vector<8x128xf32>
    %cst_51 = arith.constant 1.000000e+00 : f32
    %182 = vector.broadcast %cst_51 : f32 to vector<8x128xf32>
    %183 = arith.addf %181, %182 : vector<8x128xf32>
    %cst_52 = arith.constant 5.000000e-01 : f32
    %184 = vector.broadcast %cst_52 : f32 to vector<8x128xf32>
    %185 = arith.mulf %184, %183 : vector<8x128xf32>
    %186 = arith.select %5, %181, %185 : vector<8x128xi1>, vector<8x128xf32>
    %187 = vector.extract_strided_slice %186 {offsets = [0, 0], sizes = [8, 32], strides = [1, 1]} : vector<8x128xf32> to vector<8x32xf32>
    %188 = vector.extract_strided_slice %186 {offsets = [0, 32], sizes = [8, 32], strides = [1, 1]} : vector<8x128xf32> to vector<8x32xf32>
    %189 = vector.extract_strided_slice %186 {offsets = [0, 64], sizes = [8, 32], strides = [1, 1]} : vector<8x128xf32> to vector<8x32xf32>
    %190 = vector.extract_strided_slice %186 {offsets = [0, 96], sizes = [8, 32], strides = [1, 1]} : vector<8x128xf32> to vector<8x32xf32>
    %191 = arith.mulf %188, %149 : vector<8x32xf32>
    %192 = arith.mulf %187, %189 : vector<8x32xf32>
    %193 = arith.addf %191, %192 : vector<8x32xf32>
    %194 = math.tanh %193 : vector<8x32xf32>
    %195 = arith.mulf %190, %194 : vector<8x32xf32>
    %196 = vector.extract_strided_slice %15 {offsets = [32, 0], sizes = [8, 128], strides = [1, 1]} : vector<64x128xf32> to vector<8x128xf32>
    %cst_53 = arith.constant dense<0.000000e+00> : vector<8x128xf32>
    %197 = tpu.matmul %172, %8, %cst_53 {dimension_numbers = #tpu.dot_dimension_numbers<[1], [0], [0], [1], [0, 0, 1, 1], [], []>, precision = #tpu.contract_precision<fp32>} : vector<8x32xf32>, vector<32x128xf32>, vector<8x128xf32> -> vector<8x128xf32>
    %198 = arith.addf %196, %197 : vector<8x128xf32>
    %cst_54 = arith.constant 5.000000e-01 : f32
    %199 = vector.broadcast %cst_54 : f32 to vector<8x128xf32>
    %200 = arith.mulf %199, %198 : vector<8x128xf32>
    %201 = arith.select %5, %198, %200 : vector<8x128xi1>, vector<8x128xf32>
    %202 = math.tanh %201 : vector<8x128xf32>
    %cst_55 = arith.constant 1.000000e+00 : f32
    %203 = vector.broadcast %cst_55 : f32 to vector<8x128xf32>
    %204 = arith.addf %202, %203 : vector<8x128xf32>
    %cst_56 = arith.constant 5.000000e-01 : f32
    %205 = vector.broadcast %cst_56 : f32 to vector<8x128xf32>
    %206 = arith.mulf %205, %204 : vector<8x128xf32>
    %207 = arith.select %5, %202, %206 : vector<8x128xi1>, vector<8x128xf32>
    %208 = vector.extract_strided_slice %207 {offsets = [0, 0], sizes = [8, 32], strides = [1, 1]} : vector<8x128xf32> to vector<8x32xf32>
    %209 = vector.extract_strided_slice %207 {offsets = [0, 32], sizes = [8, 32], strides = [1, 1]} : vector<8x128xf32> to vector<8x32xf32>
    %210 = vector.extract_strided_slice %207 {offsets = [0, 64], sizes = [8, 32], strides = [1, 1]} : vector<8x128xf32> to vector<8x32xf32>
    %211 = vector.extract_strided_slice %207 {offsets = [0, 96], sizes = [8, 32], strides = [1, 1]} : vector<8x128xf32> to vector<8x32xf32>
    %212 = arith.mulf %209, %170 : vector<8x32xf32>
    %213 = arith.mulf %208, %210 : vector<8x32xf32>
    %214 = arith.addf %212, %213 : vector<8x32xf32>
    %215 = math.tanh %214 : vector<8x32xf32>
    %216 = arith.mulf %211, %215 : vector<8x32xf32>
    %cst_57 = arith.constant dense<0.000000e+00> : vector<8x128xf32>
    %217 = tpu.matmul %216, %7, %cst_57 {dimension_numbers = #tpu.dot_dimension_numbers<[1], [0], [0], [1], [0, 0, 1, 1], [], []>, precision = #tpu.contract_precision<fp32>} : vector<8x32xf32>, vector<32x128xf32>, vector<8x128xf32> -> vector<8x128xf32>
    %cst_58 = arith.constant dense<0.000000e+00> : vector<8x128xf32>
    %218 = tpu.matmul %195, %9, %cst_58 {dimension_numbers = #tpu.dot_dimension_numbers<[1], [0], [0], [1], [0, 0, 1, 1], [], []>, precision = #tpu.contract_precision<fp32>} : vector<8x32xf32>, vector<32x128xf32>, vector<8x128xf32> -> vector<8x128xf32>
    %219 = arith.addf %217, %218 : vector<8x128xf32>
    %220 = vector.broadcast %11 : vector<1x128xf32> to vector<8x128xf32>
    %221 = arith.addf %219, %220 : vector<8x128xf32>
    %cst_59 = arith.constant 5.000000e-01 : f32
    %222 = vector.broadcast %cst_59 : f32 to vector<8x128xf32>
    %223 = arith.mulf %222, %221 : vector<8x128xf32>
    %224 = arith.select %5, %221, %223 : vector<8x128xi1>, vector<8x128xf32>
    %225 = math.tanh %224 : vector<8x128xf32>
    %cst_60 = arith.constant 1.000000e+00 : f32
    %226 = vector.broadcast %cst_60 : f32 to vector<8x128xf32>
    %227 = arith.addf %225, %226 : vector<8x128xf32>
    %cst_61 = arith.constant 5.000000e-01 : f32
    %228 = vector.broadcast %cst_61 : f32 to vector<8x128xf32>
    %229 = arith.mulf %228, %227 : vector<8x128xf32>
    %230 = arith.select %5, %225, %229 : vector<8x128xi1>, vector<8x128xf32>
    %231 = vector.extract_strided_slice %230 {offsets = [0, 0], sizes = [8, 32], strides = [1, 1]} : vector<8x128xf32> to vector<8x32xf32>
    %232 = vector.extract_strided_slice %230 {offsets = [0, 32], sizes = [8, 32], strides = [1, 1]} : vector<8x128xf32> to vector<8x32xf32>
    %233 = vector.extract_strided_slice %230 {offsets = [0, 64], sizes = [8, 32], strides = [1, 1]} : vector<8x128xf32> to vector<8x32xf32>
    %234 = vector.extract_strided_slice %230 {offsets = [0, 96], sizes = [8, 32], strides = [1, 1]} : vector<8x128xf32> to vector<8x32xf32>
    %235 = arith.mulf %232, %193 : vector<8x32xf32>
    %236 = arith.mulf %231, %233 : vector<8x32xf32>
    %237 = arith.addf %235, %236 : vector<8x32xf32>
    %238 = math.tanh %237 : vector<8x32xf32>
    %239 = arith.mulf %234, %238 : vector<8x32xf32>
    %240 = vector.extract_strided_slice %15 {offsets = [40, 0], sizes = [8, 128], strides = [1, 1]} : vector<64x128xf32> to vector<8x128xf32>
    %cst_62 = arith.constant dense<0.000000e+00> : vector<8x128xf32>
    %241 = tpu.matmul %216, %8, %cst_62 {dimension_numbers = #tpu.dot_dimension_numbers<[1], [0], [0], [1], [0, 0, 1, 1], [], []>, precision = #tpu.contract_precision<fp32>} : vector<8x32xf32>, vector<32x128xf32>, vector<8x128xf32> -> vector<8x128xf32>
    %242 = arith.addf %240, %241 : vector<8x128xf32>
    %cst_63 = arith.constant 5.000000e-01 : f32
    %243 = vector.broadcast %cst_63 : f32 to vector<8x128xf32>
    %244 = arith.mulf %243, %242 : vector<8x128xf32>
    %245 = arith.select %5, %242, %244 : vector<8x128xi1>, vector<8x128xf32>
    %246 = math.tanh %245 : vector<8x128xf32>
    %cst_64 = arith.constant 1.000000e+00 : f32
    %247 = vector.broadcast %cst_64 : f32 to vector<8x128xf32>
    %248 = arith.addf %246, %247 : vector<8x128xf32>
    %cst_65 = arith.constant 5.000000e-01 : f32
    %249 = vector.broadcast %cst_65 : f32 to vector<8x128xf32>
    %250 = arith.mulf %249, %248 : vector<8x128xf32>
    %251 = arith.select %5, %246, %250 : vector<8x128xi1>, vector<8x128xf32>
    %252 = vector.extract_strided_slice %251 {offsets = [0, 0], sizes = [8, 32], strides = [1, 1]} : vector<8x128xf32> to vector<8x32xf32>
    %253 = vector.extract_strided_slice %251 {offsets = [0, 32], sizes = [8, 32], strides = [1, 1]} : vector<8x128xf32> to vector<8x32xf32>
    %254 = vector.extract_strided_slice %251 {offsets = [0, 64], sizes = [8, 32], strides = [1, 1]} : vector<8x128xf32> to vector<8x32xf32>
    %255 = vector.extract_strided_slice %251 {offsets = [0, 96], sizes = [8, 32], strides = [1, 1]} : vector<8x128xf32> to vector<8x32xf32>
    %256 = arith.mulf %253, %214 : vector<8x32xf32>
    %257 = arith.mulf %252, %254 : vector<8x32xf32>
    %258 = arith.addf %256, %257 : vector<8x32xf32>
    %259 = math.tanh %258 : vector<8x32xf32>
    %260 = arith.mulf %255, %259 : vector<8x32xf32>
    %cst_66 = arith.constant dense<0.000000e+00> : vector<8x128xf32>
    %261 = tpu.matmul %260, %7, %cst_66 {dimension_numbers = #tpu.dot_dimension_numbers<[1], [0], [0], [1], [0, 0, 1, 1], [], []>, precision = #tpu.contract_precision<fp32>} : vector<8x32xf32>, vector<32x128xf32>, vector<8x128xf32> -> vector<8x128xf32>
    %cst_67 = arith.constant dense<0.000000e+00> : vector<8x128xf32>
    %262 = tpu.matmul %239, %9, %cst_67 {dimension_numbers = #tpu.dot_dimension_numbers<[1], [0], [0], [1], [0, 0, 1, 1], [], []>, precision = #tpu.contract_precision<fp32>} : vector<8x32xf32>, vector<32x128xf32>, vector<8x128xf32> -> vector<8x128xf32>
    %263 = arith.addf %261, %262 : vector<8x128xf32>
    %264 = vector.broadcast %11 : vector<1x128xf32> to vector<8x128xf32>
    %265 = arith.addf %263, %264 : vector<8x128xf32>
    %cst_68 = arith.constant 5.000000e-01 : f32
    %266 = vector.broadcast %cst_68 : f32 to vector<8x128xf32>
    %267 = arith.mulf %266, %265 : vector<8x128xf32>
    %268 = arith.select %5, %265, %267 : vector<8x128xi1>, vector<8x128xf32>
    %269 = math.tanh %268 : vector<8x128xf32>
    %cst_69 = arith.constant 1.000000e+00 : f32
    %270 = vector.broadcast %cst_69 : f32 to vector<8x128xf32>
    %271 = arith.addf %269, %270 : vector<8x128xf32>
    %cst_70 = arith.constant 5.000000e-01 : f32
    %272 = vector.broadcast %cst_70 : f32 to vector<8x128xf32>
    %273 = arith.mulf %272, %271 : vector<8x128xf32>
    %274 = arith.select %5, %269, %273 : vector<8x128xi1>, vector<8x128xf32>
    %275 = vector.extract_strided_slice %274 {offsets = [0, 0], sizes = [8, 32], strides = [1, 1]} : vector<8x128xf32> to vector<8x32xf32>
    %276 = vector.extract_strided_slice %274 {offsets = [0, 32], sizes = [8, 32], strides = [1, 1]} : vector<8x128xf32> to vector<8x32xf32>
    %277 = vector.extract_strided_slice %274 {offsets = [0, 64], sizes = [8, 32], strides = [1, 1]} : vector<8x128xf32> to vector<8x32xf32>
    %278 = vector.extract_strided_slice %274 {offsets = [0, 96], sizes = [8, 32], strides = [1, 1]} : vector<8x128xf32> to vector<8x32xf32>
    %279 = arith.mulf %276, %237 : vector<8x32xf32>
    %280 = arith.mulf %275, %277 : vector<8x32xf32>
    %281 = arith.addf %279, %280 : vector<8x32xf32>
    %282 = math.tanh %281 : vector<8x32xf32>
    %283 = arith.mulf %278, %282 : vector<8x32xf32>
    %284 = vector.extract_strided_slice %15 {offsets = [48, 0], sizes = [8, 128], strides = [1, 1]} : vector<64x128xf32> to vector<8x128xf32>
    %cst_71 = arith.constant dense<0.000000e+00> : vector<8x128xf32>
    %285 = tpu.matmul %260, %8, %cst_71 {dimension_numbers = #tpu.dot_dimension_numbers<[1], [0], [0], [1], [0, 0, 1, 1], [], []>, precision = #tpu.contract_precision<fp32>} : vector<8x32xf32>, vector<32x128xf32>, vector<8x128xf32> -> vector<8x128xf32>
    %286 = arith.addf %284, %285 : vector<8x128xf32>
    %cst_72 = arith.constant 5.000000e-01 : f32
    %287 = vector.broadcast %cst_72 : f32 to vector<8x128xf32>
    %288 = arith.mulf %287, %286 : vector<8x128xf32>
    %289 = arith.select %5, %286, %288 : vector<8x128xi1>, vector<8x128xf32>
    %290 = math.tanh %289 : vector<8x128xf32>
    %cst_73 = arith.constant 1.000000e+00 : f32
    %291 = vector.broadcast %cst_73 : f32 to vector<8x128xf32>
    %292 = arith.addf %290, %291 : vector<8x128xf32>
    %cst_74 = arith.constant 5.000000e-01 : f32
    %293 = vector.broadcast %cst_74 : f32 to vector<8x128xf32>
    %294 = arith.mulf %293, %292 : vector<8x128xf32>
    %295 = arith.select %5, %290, %294 : vector<8x128xi1>, vector<8x128xf32>
    %296 = vector.extract_strided_slice %295 {offsets = [0, 0], sizes = [8, 32], strides = [1, 1]} : vector<8x128xf32> to vector<8x32xf32>
    %297 = vector.extract_strided_slice %295 {offsets = [0, 32], sizes = [8, 32], strides = [1, 1]} : vector<8x128xf32> to vector<8x32xf32>
    %298 = vector.extract_strided_slice %295 {offsets = [0, 64], sizes = [8, 32], strides = [1, 1]} : vector<8x128xf32> to vector<8x32xf32>
    %299 = vector.extract_strided_slice %295 {offsets = [0, 96], sizes = [8, 32], strides = [1, 1]} : vector<8x128xf32> to vector<8x32xf32>
    %300 = arith.mulf %297, %258 : vector<8x32xf32>
    %301 = arith.mulf %296, %298 : vector<8x32xf32>
    %302 = arith.addf %300, %301 : vector<8x32xf32>
    %303 = math.tanh %302 : vector<8x32xf32>
    %304 = arith.mulf %299, %303 : vector<8x32xf32>
    %cst_75 = arith.constant dense<0.000000e+00> : vector<8x128xf32>
    %305 = tpu.matmul %304, %7, %cst_75 {dimension_numbers = #tpu.dot_dimension_numbers<[1], [0], [0], [1], [0, 0, 1, 1], [], []>, precision = #tpu.contract_precision<fp32>} : vector<8x32xf32>, vector<32x128xf32>, vector<8x128xf32> -> vector<8x128xf32>
    %cst_76 = arith.constant dense<0.000000e+00> : vector<8x128xf32>
    %306 = tpu.matmul %283, %9, %cst_76 {dimension_numbers = #tpu.dot_dimension_numbers<[1], [0], [0], [1], [0, 0, 1, 1], [], []>, precision = #tpu.contract_precision<fp32>} : vector<8x32xf32>, vector<32x128xf32>, vector<8x128xf32> -> vector<8x128xf32>
    %307 = arith.addf %305, %306 : vector<8x128xf32>
    %308 = vector.broadcast %11 : vector<1x128xf32> to vector<8x128xf32>
    %309 = arith.addf %307, %308 : vector<8x128xf32>
    %cst_77 = arith.constant 5.000000e-01 : f32
    %310 = vector.broadcast %cst_77 : f32 to vector<8x128xf32>
    %311 = arith.mulf %310, %309 : vector<8x128xf32>
    %312 = arith.select %5, %309, %311 : vector<8x128xi1>, vector<8x128xf32>
    %313 = math.tanh %312 : vector<8x128xf32>
    %cst_78 = arith.constant 1.000000e+00 : f32
    %314 = vector.broadcast %cst_78 : f32 to vector<8x128xf32>
    %315 = arith.addf %313, %314 : vector<8x128xf32>
    %cst_79 = arith.constant 5.000000e-01 : f32
    %316 = vector.broadcast %cst_79 : f32 to vector<8x128xf32>
    %317 = arith.mulf %316, %315 : vector<8x128xf32>
    %318 = arith.select %5, %313, %317 : vector<8x128xi1>, vector<8x128xf32>
    %319 = vector.extract_strided_slice %318 {offsets = [0, 0], sizes = [8, 32], strides = [1, 1]} : vector<8x128xf32> to vector<8x32xf32>
    %320 = vector.extract_strided_slice %318 {offsets = [0, 32], sizes = [8, 32], strides = [1, 1]} : vector<8x128xf32> to vector<8x32xf32>
    %321 = vector.extract_strided_slice %318 {offsets = [0, 64], sizes = [8, 32], strides = [1, 1]} : vector<8x128xf32> to vector<8x32xf32>
    %322 = vector.extract_strided_slice %318 {offsets = [0, 96], sizes = [8, 32], strides = [1, 1]} : vector<8x128xf32> to vector<8x32xf32>
    %323 = arith.mulf %320, %281 : vector<8x32xf32>
    %324 = arith.mulf %319, %321 : vector<8x32xf32>
    %325 = arith.addf %323, %324 : vector<8x32xf32>
    %326 = math.tanh %325 : vector<8x32xf32>
    %327 = arith.mulf %322, %326 : vector<8x32xf32>
    %328 = vector.extract_strided_slice %15 {offsets = [56, 0], sizes = [8, 128], strides = [1, 1]} : vector<64x128xf32> to vector<8x128xf32>
    %cst_80 = arith.constant dense<0.000000e+00> : vector<8x128xf32>
    %329 = tpu.matmul %304, %8, %cst_80 {dimension_numbers = #tpu.dot_dimension_numbers<[1], [0], [0], [1], [0, 0, 1, 1], [], []>, precision = #tpu.contract_precision<fp32>} : vector<8x32xf32>, vector<32x128xf32>, vector<8x128xf32> -> vector<8x128xf32>
    %330 = arith.addf %328, %329 : vector<8x128xf32>
    %cst_81 = arith.constant 5.000000e-01 : f32
    %331 = vector.broadcast %cst_81 : f32 to vector<8x128xf32>
    %332 = arith.mulf %331, %330 : vector<8x128xf32>
    %333 = arith.select %5, %330, %332 : vector<8x128xi1>, vector<8x128xf32>
    %334 = math.tanh %333 : vector<8x128xf32>
    %cst_82 = arith.constant 1.000000e+00 : f32
    %335 = vector.broadcast %cst_82 : f32 to vector<8x128xf32>
    %336 = arith.addf %334, %335 : vector<8x128xf32>
    %cst_83 = arith.constant 5.000000e-01 : f32
    %337 = vector.broadcast %cst_83 : f32 to vector<8x128xf32>
    %338 = arith.mulf %337, %336 : vector<8x128xf32>
    %339 = arith.select %5, %334, %338 : vector<8x128xi1>, vector<8x128xf32>
    %340 = vector.extract_strided_slice %339 {offsets = [0, 0], sizes = [8, 32], strides = [1, 1]} : vector<8x128xf32> to vector<8x32xf32>
    %341 = vector.extract_strided_slice %339 {offsets = [0, 32], sizes = [8, 32], strides = [1, 1]} : vector<8x128xf32> to vector<8x32xf32>
    %342 = vector.extract_strided_slice %339 {offsets = [0, 64], sizes = [8, 32], strides = [1, 1]} : vector<8x128xf32> to vector<8x32xf32>
    %343 = vector.extract_strided_slice %339 {offsets = [0, 96], sizes = [8, 32], strides = [1, 1]} : vector<8x128xf32> to vector<8x32xf32>
    %344 = arith.mulf %341, %302 : vector<8x32xf32>
    %345 = arith.mulf %340, %342 : vector<8x32xf32>
    %346 = arith.addf %344, %345 : vector<8x32xf32>
    %347 = math.tanh %346 : vector<8x32xf32>
    %348 = arith.mulf %343, %347 : vector<8x32xf32>
    %cst_84 = arith.constant dense<0.000000e+00> : vector<8x128xf32>
    %349 = tpu.matmul %348, %7, %cst_84 {dimension_numbers = #tpu.dot_dimension_numbers<[1], [0], [0], [1], [0, 0, 1, 1], [], []>, precision = #tpu.contract_precision<fp32>} : vector<8x32xf32>, vector<32x128xf32>, vector<8x128xf32> -> vector<8x128xf32>
    %cst_85 = arith.constant dense<0.000000e+00> : vector<8x128xf32>
    %350 = tpu.matmul %327, %9, %cst_85 {dimension_numbers = #tpu.dot_dimension_numbers<[1], [0], [0], [1], [0, 0, 1, 1], [], []>, precision = #tpu.contract_precision<fp32>} : vector<8x32xf32>, vector<32x128xf32>, vector<8x128xf32> -> vector<8x128xf32>
    %351 = arith.addf %349, %350 : vector<8x128xf32>
    %352 = vector.broadcast %11 : vector<1x128xf32> to vector<8x128xf32>
    %353 = arith.addf %351, %352 : vector<8x128xf32>
    %cst_86 = arith.constant 5.000000e-01 : f32
    %354 = vector.broadcast %cst_86 : f32 to vector<8x128xf32>
    %355 = arith.mulf %354, %353 : vector<8x128xf32>
    %356 = arith.select %5, %353, %355 : vector<8x128xi1>, vector<8x128xf32>
    %357 = math.tanh %356 : vector<8x128xf32>
    %cst_87 = arith.constant 1.000000e+00 : f32
    %358 = vector.broadcast %cst_87 : f32 to vector<8x128xf32>
    %359 = arith.addf %357, %358 : vector<8x128xf32>
    %cst_88 = arith.constant 5.000000e-01 : f32
    %360 = vector.broadcast %cst_88 : f32 to vector<8x128xf32>
    %361 = arith.mulf %360, %359 : vector<8x128xf32>
    %362 = arith.select %5, %357, %361 : vector<8x128xi1>, vector<8x128xf32>
    %363 = vector.extract_strided_slice %362 {offsets = [0, 0], sizes = [8, 32], strides = [1, 1]} : vector<8x128xf32> to vector<8x32xf32>
    %364 = vector.extract_strided_slice %362 {offsets = [0, 32], sizes = [8, 32], strides = [1, 1]} : vector<8x128xf32> to vector<8x32xf32>
    %365 = vector.extract_strided_slice %362 {offsets = [0, 64], sizes = [8, 32], strides = [1, 1]} : vector<8x128xf32> to vector<8x32xf32>
    %366 = vector.extract_strided_slice %362 {offsets = [0, 96], sizes = [8, 32], strides = [1, 1]} : vector<8x128xf32> to vector<8x32xf32>
    %367 = arith.mulf %364, %325 : vector<8x32xf32>
    %368 = arith.mulf %363, %365 : vector<8x32xf32>
    %369 = arith.addf %367, %368 : vector<8x32xf32>
    %370 = math.tanh %369 : vector<8x32xf32>
    %371 = arith.mulf %366, %370 : vector<8x32xf32>
    %c0_89 = arith.constant 0 : index
    %c0_90 = arith.constant 0 : index
    %372 = vector.load %arg7[%c0_89, %c0_90] : memref<32x128xf32, #tpu.memory_space<vmem>>, vector<32x128xf32>
    %cst_91 = arith.constant dense<0.000000e+00> : vector<8x128xf32>
    %373 = tpu.matmul %371, %372, %cst_91 {dimension_numbers = #tpu.dot_dimension_numbers<[1], [0], [0], [1], [0, 0, 1, 1], [], []>, precision = #tpu.contract_precision<fp32>} : vector<8x32xf32>, vector<32x128xf32>, vector<8x128xf32> -> vector<8x128xf32>
    %c0_92 = arith.constant 0 : index
    %c0_93 = arith.constant 0 : index
    %374 = vector.load %arg8[%c0_92, %c0_93] : memref<1x128xf32, #tpu.memory_space<vmem>>, vector<1x128xf32>
    %375 = vector.broadcast %374 : vector<1x128xf32> to vector<8x128xf32>
    %376 = arith.addf %373, %375 : vector<8x128xf32>
    %c0_94 = arith.constant 0 : index
    %c0_95 = arith.constant 0 : index
    %377 = vector.load %arg9[%c0_94, %c0_95] : memref<8x128xf32, #tpu.memory_space<vmem>>, vector<8x128xf32>
    tpu.vector_store %arg9[%c0_94, %c0_95], %376 {strides = array<i32>} : memref<8x128xf32, #tpu.memory_space<vmem>>, vector<8x128xf32>,
    return
  }
}

</mosaic_0001>

<bundles_post_ra>
// kernel: lstm_net_forward.1
= control target key start
LH: loop header
LB: loop body
LE: loop exit
PB: predicated region body
PF: predicated region fallthrough
CT: control target
= control target key end

     0   :  { %14 = vsyncpa [#allocation3], 0  ;;  %s17152_s30 = smov [#allocation2]   ;;  %s18843_s0 = inlined_call_operand.vmem [shape: f32[64,4], index: 0, kind: input, shape index: {}]   ;;  %s18844_s1 = inlined_call_operand.vmem [shape: f32[4,128], index: 1, kind: input, shape index: {}]   ;;  %s18845_s2 = inlined_call_operand.vmem [shape: f32[32,128], index: 2, kind: input, shape index: {}]   ;;  %s18846_s3 = inlined_call_operand.vmem [shape: f32[1,128], index: 3, kind: input, shape index: {}]   ;;  %s18847_s4 = inlined_call_operand.vmem [shape: f32[32,128], index: 4, kind: input, shape index: {}]   ;;  %s18848_s5 = inlined_call_operand.vmem [shape: f32[32,128], index: 5, kind: input, shape index: {}]   ;;  %s18849_s6 = inlined_call_operand.vmem [shape: f32[1,128], index: 6, kind: input, shape index: {}]   ;;  %s18850_s7 = inlined_call_operand.hbm [shape: f32[32,128], index: 7, kind: input, shape index: {}]   ;;  %s18851_s8 = inlined_call_operand.vmem [shape: f32[1,128], index: 8, kind: input, shape index: {}]   ;;  %s18852_s9 = inlined_call_operand.vmem [shape: f32[8,128], index: 9, kind: output, shape index: {}]  }
   0x1   :  { %s34_s10 = sshll.u32 %s17152_s30, 4  ;;  %s17128_s13 = scalar_lea.hbm %s18850_s7, 512  ;;  %s35_s10 = int_to_ptr.vmem [resolvable:$true] %s34_s10 }
   0x2   :  { %p17129_p0 = scmp.ne.s32.totalorder %s18850_s7, %s17128_s13  ;;  %p17132_p1 = scmp.lt.u32.totalorder %s17128_s13, %s18850_s7 }
   0x4   :  { %p17134_p2 = pnand %p17132_p1, %p17129_p0 }
   0x6   :  { %17137 = shalt.err (!%p17134_p2)
}
   0x7   :  { %s17138_s18 = scalar_lea.vmem %s35_s10, 512  ;;  %p17143_p4 = scmp.lt.s32.totalorder %s35_s10, %s35_s10 }
   0x8   :  { %p17139_p3 = scmp.ne.s32.totalorder %s35_s10, %s17138_s18  ;;  %p17144_p5 = scmp.lt.s32.totalorder %s17138_s18, %s17138_s18 }
   0xa   :  { %p17145_p6 = por %p17144_p5, %p17143_p4 }
   0xc   :  { %p17146_p7 = pnand %p17145_p6, %p17139_p3 }
   0xe   :  { %17149 = shalt.err (!%p17146_p7)
}
   0xf   :  { %s17153_s19 = smov 128   ;;  %s17154_s20 = smov 8  }
  0x10   :  { %40 = dma.hbm_to_vmem [thread:$0]  %s18850_s7, 512, %s35_s10, [#allocation3], %s17153_s19, %s17153_s19, %s17154_s20  }
  0x11   :  { %17150 = dma.done.wait [#allocation3], 512  }
  0x12   :  { %17151 = vsyncadd [#allocation3], 4294966784  ;;  %vm105_vm0 = vcmask 1043456   ;;  %vm80_vm1 = vcmask 31744   ;;  %v51_v0 = vld [vmem:[%s18844_s1] sm:$0xf] }
  0x13   :  { %v66_v1 = vld [vmem:[%s18843_s0] sm:$0xff]  ;;  %v67_v2 = vld [vmem:[%s18843_s0 + $0x8] sm:$0xff]  ;;  %v107_v3 = vsel %vm105_vm0, %v51_v0, 0  ;;  %v68_v6 = vld [vmem:[%s18843_s0 + $0x10] sm:$0xff]  ;;  %vm17156_vm2 = vmmov 0   ;;  %s17159_s26 = smov 32  }
  0x14   :  { %v82_v4 = vsel %vm80_vm1, %v66_v1, 0  ;;  %v85_v5 = vsel %vm80_vm1, %v67_v2, 0  ;;  %v69_v7 = vld [vmem:[%s18843_s0 + $0x18] sm:$0xff]  ;;  %v70_v8 = vld [vmem:[%s18843_s0 + $0x20] sm:$0xff]  ;;  %v17242_v9 = vand.u32 4294901760, %v107_v3  ;;  %v88_v12 = vsel %vm80_vm1, %v68_v6, 0 }
  0x15   :  { %v17244_v10 = vand.u32 4294901760, %v82_v4  ;;  %v17246_v11 = vand.u32 4294901760, %v85_v5  ;;  %v71_v13 = vld [vmem:[%s18843_s0 + $0x28] sm:$0xff]  ;;  %v72_v14 = vld [vmem:[%s18843_s0 + $0x30] sm:$0xff]  ;;  %v17255_v15 = vand.u32 4294901760, %v88_v12  ;;  %v91_v16 = vsel %vm80_vm1, %v69_v7, 0 }
  0x16   :  { %v94_v17 = vsel %vm80_vm1, %v70_v8, 0  ;;  %v97_v18 = vsel %vm80_vm1, %v71_v13, 0  ;;  %14279 = vmatprep.subr.mxu1 %v17242_v9  ;;  %v257_v20 = vsub.f32 %v107_v3, %v17242_v9  ;;  %v17269_v22 = vand.u32 4294901760, %v91_v16  ;;  %v73_v43 = vld [vmem:[%s18843_s0 + $0x38] sm:$0xff]  ;;  %v56_v51 = vld [vmem:[%s18845_s2] sm:$0xff]  ;;  %v57_v52 = vld [vmem:[%s18845_s2 + $0x8] sm:$0xff] }
  0x17   :  { %v17262_v19 = vsub.f32 %v82_v4, %v17244_v10  ;;  %v17266_v21 = vsub.f32 %v85_v5, %v17246_v11  ;;  %14295 = vmatprep.mubr.f32.mxu0 %v17244_v10  ;;  %14280 = vmatpush3.msra.mxu1 %v17242_v9  ;;  %v17273_v23 = vsub.f32 %v88_v12, %v17255_v15  ;;  %v17275_v24 = vand.u32 4294901760, %v94_v17  ;;  %v58_v61 = vld [vmem:[%s18845_s2 + $0x10] sm:$0xff]  ;;  %v59_v63 = vld [vmem:[%s18845_s2 + $0x18] sm:$0xff] }
  0x18   :  { %v17277_v25 = vand.u32 4294901760, %v97_v18  ;;  %v100_v26 = vsel %vm80_vm1, %v72_v14, 0  ;;  %v17281_v28 = vand.u32 4294901760, %v257_v20  ;;  %v17285_v30 = vsub.f32 %v91_v16, %v17269_v22 }
  0x19   :  { %v177_v27 = vand.u32 4294901760, %v17262_v19  ;;  %v187_v29 = vand.u32 4294901760, %v17266_v21  ;;  %v197_v31 = vand.u32 4294901760, %v17273_v23  ;;  %v17289_v32 = vsub.f32 %v94_v17, %v17275_v24 }
  0x1a   :  { %v17292_v33 = vsub.f32 %v97_v18, %v17277_v25  ;;  %v17294_v34 = vand.u32 4294901760, %v100_v26  ;;  %v259_v36 = vsub.f32 %v257_v20, %v17281_v28  ;;  %v207_v38 = vand.u32 4294901760, %v17285_v30 }
  0x1b   :  { %v178_v35 = vsub.f32 %v17262_v19, %v177_v27  ;;  %v188_v37 = vsub.f32 %v17266_v21, %v187_v29  ;;  %v198_v39 = vsub.f32 %v17273_v23, %v197_v31  ;;  %v217_v40 = vand.u32 4294901760, %v17289_v32 }
  0x1c   :  { %v227_v41 = vand.u32 4294901760, %v17292_v33  ;;  %v17310_v42 = vsub.f32 %v100_v26, %v17294_v34  ;;  %v260_v45 = vand.u32 4294901760, %v259_v36  ;;  %v208_v47 = vsub.f32 %v17285_v30, %v207_v38 }
  0x1d   :  { %v179_v44 = vand.u32 4294901760, %v178_v35  ;;  %v189_v46 = vand.u32 4294901760, %v188_v37  ;;  %v199_v48 = vand.u32 4294901760, %v198_v39  ;;  %v218_v49 = vsub.f32 %v17289_v32, %v217_v40 }
  0x1e   :  { %v237_v50 = vand.u32 4294901760, %v17310_v42  ;;  %14293 = vmatprep.subr.mxu0 %v260_v45  ;;  %v103_v53 = vsel %vm80_vm1, %v73_v43, 0  ;;  %16913 = vmatprep.subr.mxu1 %v260_v45  ;;  %v209_v54 = vand.u32 4294901760, %v208_v47  ;;  %v228_v55 = vsub.f32 %v17292_v33, %v227_v41 }
  0x1f   :  { %14281 = vmatprep.mubr.f32.mxu1 %v179_v44  ;;  %v17332_v56 = vand.u32 4294901760, %v103_v53  ;;  %14294 = vmatpush3.msra.mxu0 %v260_v45  ;;  %v219_v57 = vand.u32 4294901760, %v218_v49  ;;  %v861_v59 = vand.u32 4294901760, %v56_v51  ;;  %v864_v60 = vand.u32 4294901760, %v57_v52 }
  0x20   :  { %14282 = vmatmul.mubr.f32.vlgmr.msra.gmra.mrb[0].mxu1 %v189_v46  ;;  %v238_v58 = vsub.f32 %v17310_v42, %v237_v50  ;;  %14296 = vmatmul.mubr.f32.vlgmr.msra.gmra.mrb[0].mxu0 %v17246_v11  ;;  %v229_v0 = vand.u32 4294901760, %v228_v55  ;;  %v867_v2 = vand.u32 4294901760, %v58_v61  ;;  %v870_v4 = vand.u32 4294901760, %v59_v63 }
  0x21   :  { %16914 = vmatpush3.msra.mxu1 %v260_v45  ;;  %14284 = vmatprep.mubr.f32.mxu1 %v199_v48  ;;  %v17342_v62 = vsub.f32 %v103_v53, %v17332_v56  ;;  %v17350_v5 = vsub.f32 %v56_v51, %v861_v59  ;;  %v17352_v6 = vsub.f32 %v57_v52, %v864_v60  ;;  %v17155_v8 = vmov 0.0|0.0  }
  0x22   :  { %14298 = vmatprep.mubr.f32.mxu0 %v17255_v15  ;;  %14307 = vmatprep.subr.mxu0 %v257_v20  ;;  %v239_v3 = vand.u32 4294901760, %v238_v58  ;;  %v17362_v16 = vsub.f32 %v58_v61, %v867_v2  ;;  %v17364_v17 = vsub.f32 %v59_v63, %v870_v4  ;;  %v17369_v18 = vpack.c.bf16 %v864_v60, %v861_v59 }
  0x23   :  { %14308 = vmatpush3.msra.mxu0 %v257_v20  ;;  %v247_v1 = vand.u32 4294901760, %v17342_v62  ;;  %16013 = vmatprep.subr.bf16.mxu1 %v17155_v8  ;;  %v942_v13 = vand.u32 4294901760, %v17350_v5  ;;  %v949_v14 = vand.u32 4294901760, %v17352_v6  ;;  %v17384_v37 = vpack.c.bf16 %v870_v4, %v867_v2 }
  0x24   :  { %14285 = vmatmul.mubr.f32.gmra.mrb[2].mxu1 %v209_v54  ;;  %14321 = vmatprep.subr.mxu0 %v17242_v9  ;;  %v956_v35 = vand.u32 4294901760, %v17362_v16  ;;  %v963_v36 = vand.u32 4294901760, %v17364_v17  ;;  %v17157_v46 = vmov 0.0   ;;  %vm856_vm6 = vcmask 261120  }
  0x25   :  { %14287 = vmatprep.mubr.f32.mxu1 %v219_v57  ;;  %14299 = vmatmul.mubr.f32.gmra.mrb[2].mxu0 %v17269_v22  ;;  %v248_v7 = vsub.f32 %v17342_v62, %v247_v1  ;;  %v943_v20 = vsub.f32 %v17350_v5, %v942_v13  ;;  %v950_v26 = vsub.f32 %v17352_v6, %v949_v14 }
  0x26   :  { %14309 = vmatprep.mubr.f32.mxu0 %v17262_v19  ;;  %v957_v44 = vsub.f32 %v17362_v16, %v956_v35  ;;  %v964_v45 = vsub.f32 %v17364_v17, %v963_v36  ;;  %v17423_v19 = vpack.c.bf16 %v17352_v6, %v17350_v5 }
  0x27   :  { %v249_v12 = vand.u32 4294901760, %v248_v7  ;;  %v944_v39 = vand.u32 4294901760, %v943_v20  ;;  %v951_v43 = vand.u32 4294901760, %v950_v26 }
  0x28   :  { %14288 = vmatmul.mubr.f32.gmra.mrb[4].mxu1 %v229_v0  ;;  %v958_v48 = vand.u32 4294901760, %v957_v44  ;;  %v965_v49 = vand.u32 4294901760, %v964_v45  ;;  %v60_v44 = vld [vmem:[%s18848_s5] sm:$0xff]  ;;  %v61_v45 = vld [vmem:[%s18848_s5 + $0x8] sm:$0xff] }
  0x29   :  { %14290 = vmatprep.mubr.f32.mxu1 %v239_v3  ;;  %14310 = vmatmul.mubr.f32.vlgmr.msra.gmra.mrb[0].mxu0 %v17266_v21  ;;  %v17401_v47 = vpack.c.bf16 %v951_v43, %v944_v39  ;;  %v17434_v21 = vpack.c.bf16 %v17364_v17, %v17362_v16 }
  0x2a   :  { %14312 = vmatprep.mubr.f32.mxu0 %v17273_v23  ;;  %14322 = vmatpush3.msra.mxu0 %v17242_v9  ;;  %v17409_v51 = vpack.c.bf16 %v965_v49, %v958_v48  ;;  %v17462_v23 = vpack.c.bf16 %v949_v14, %v942_v13  ;;  %v62_v48 = vld [vmem:[%s18848_s5 + $0x10] sm:$0xff]  ;;  %v1370_v49 = vand.u32 4294901760, %v60_v44 }
  0x2b   :  { %14335 = vmatprep.subr.mxu0 %v17281_v28 }
  0x2c   :  { %14291 = vmatmul.mubr.f32.gmra.mrb[6].mxu1 %v249_v12 }
  0x2d   :  { %14301 = vmatprep.mubr.f32.mxu1 %v17275_v24  ;;  %14313 = vmatmul.mubr.f32.gmra.mrb[2].mxu0 %v17285_v30 }
  0x2e   :  { %14315 = vmatprep.mubr.f32.mxu0 %v17289_v32 }
  0x30   :  { %14302 = vmatmul.mubr.f32.vlgmr.msra.gmra.mrb[4].mxu1 %v17277_v25 }
  0x31   :  { %16015 = vmatpush3.bf16.msra.mxu1 %v17369_v18  ;;  %14304 = vmatprep.mubr.f32.mxu1 %v17294_v34 }
  0x32   :  { %14316 = vmatmul.mubr.f32.gmra.mrb[4].mxu0 %v17292_v33  ;;  %16016 = vmatprep.subr.bf16.mxu1 %v17155_v8 }
  0x33   :  { %14318 = vmatprep.mubr.f32.mxu0 %v17310_v42 }
  0x34   :  { %14305 = vmatmul.mubr.f32.gmra.mrb[6].mxu1 %v17332_v56 }
  0x35   :  { %16018 = vmatpush3.bf16.msra.mxu1 %v17384_v37  ;;  %14371 = vmatprep.mubr.msk.f32.mxu1 %vm17156_vm2, %v17157_v46 }
  0x36   :  { %14319 = vmatmul.mubr.f32.gmra.mrb[6].mxu0 %v17342_v62  ;;  %16019 = vmatprep.subr.bf16.mxu1 %v17155_v8 }
  0x37   :  { %14323 = vmatprep.mubr.f32.mxu0 %v177_v27 }
  0x38   :  { %14372 = vmatmul.mubr.f32.vlgmr.msra.gmra.mrb[8].mxu1 %v17157_v46 }
  0x39   :  { %16021 = vmatpush3.bf16.msra.mxu1 %v17401_v47  ;;  %14382 = vmatprep.mubr.msk.f32.mxu1 %vm17156_vm2, %v17157_v46 }
  0x3a   :  { %14324 = vmatmul.mubr.f32.vlgmr.msra.gmra.mrb[0].mxu0 %v187_v29  ;;  %16022 = vmatprep.subr.bf16.mxu1 %v17155_v8 }
  0x3b   :  { %14326 = vmatprep.mubr.f32.mxu0 %v197_v31  ;;  %14336 = vmatpush3.msra.mxu0 %v17281_v28 }
  0x3c   :  { %14349 = vmatprep.subr.mxu0 %v17242_v9 }
  0x3d   :  { %16024 = vmatpush3.bf16.msra.mxu1 %v17409_v51 }
  0x3e   :  { %14327 = vmatmul.mubr.f32.gmra.mrb[2].mxu0 %v207_v38  ;;  %16025 = vmatprep.subr.bf16.mxu1 %v17155_v8 }
  0x3f   :  { %14329 = vmatprep.mubr.f32.mxu0 %v217_v40 }
  0x40   :  { %14383 = vmatmul.mubr.f32.vlgmr.msra.gmra.mrb[8].mxu1 %v17157_v46 }
  0x41   :  { %16027 = vmatpush3.bf16.msra.mxu1 %v17423_v19  ;;  %14393 = vmatprep.mubr.msk.f32.mxu1 %vm17156_vm2, %v17157_v46 }
  0x42   :  { %14330 = vmatmul.mubr.f32.gmra.mrb[4].mxu0 %v227_v41  ;;  %16028 = vmatprep.subr.bf16.mxu1 %v17155_v8  ;;  %v46_v41 = vlaneseq }
  0x43   :  { %14332 = vmatprep.mubr.f32.mxu0 %v237_v50 }
  0x44   :  { %v47_v54 = vand.u32 127, %v46_v41 }
  0x45   :  { %16030 = vmatpush3.bf16.msra.mxu1 %v17434_v21 }
  0x46   :  { %14333 = vmatmul.mubr.f32.gmra.mrb[6].mxu0 %v247_v1  ;;  %16031 = vmatprep.subr.bf16.mxu1 %v17155_v8  ;;  %vm48_vm3 = vcmp.ge.s32.totalorder %v47_v54, 64  ;;  %vm49_vm4 = vcmp.lt.s32.totalorder %v47_v54, 96 }
  0x47   :  { %14337 = vmatprep.mubr.f32.mxu0 %v17244_v10  ;;  %vm17512_vm5 = vmand %vm48_vm3, %vm49_vm4 }
  0x48   :  { %14394 = vmatmul.mubr.f32.vlgmr.msra.gmra.mrb[8].mxu1 %v17157_v46 }
  0x49   :  { %16033 = vmatpush3.bf16.msra.mxu1 %v17369_v18  ;;  %14404 = vmatprep.mubr.msk.f32.mxu1 %vm17156_vm2, %v17157_v46 }
  0x4a   :  { %14338 = vmatmul.mubr.f32.vlgmr.msra.gmra.mrb[0].mxu0 %v17246_v11  ;;  %16034 = vmatprep.subr.bf16.mxu1 %v17155_v8 }
  0x4b   :  { %14340 = vmatprep.mubr.f32.mxu0 %v17255_v15  ;;  %14350 = vmatpush3.msra.mxu0 %v17242_v9  ;;  %v17473_v9 = vpack.c.bf16 %v963_v36, %v956_v35 }
  0x4c   :  { %16085 = vmatprep.subr.bf16.mxu0 %v17155_v8 }
  0x4d   :  { %16036 = vmatpush3.bf16.msra.mxu1 %v17384_v37 }
  0x4e   :  { %14341 = vmatmul.mubr.f32.gmra.mrb[2].mxu0 %v17269_v22  ;;  %16037 = vmatprep.subr.bf16.mxu1 %v17155_v8 }
  0x4f   :  { %14343 = vmatprep.mubr.f32.mxu0 %v17275_v24 }
  0x50   :  { %14405 = vmatmul.mubr.f32.vlgmr.msra.gmra.mrb[8].mxu1 %v17157_v46 }
  0x51   :  { %16039 = vmatpush3.bf16.msra.mxu1 %v17462_v23  ;;  %14415 = vmatprep.mubr.msk.f32.mxu1 %vm17156_vm2, %v17157_v46 }
  0x52   :  { %14344 = vmatmul.mubr.f32.gmra.mrb[4].mxu0 %v17277_v25  ;;  %16040 = vmatprep.subr.bf16.mxu1 %v17155_v8 }
  0x53   :  { %14346 = vmatprep.mubr.f32.mxu0 %v17294_v34 }
  0x55   :  { %16042 = vmatpush3.bf16.msra.mxu1 %v17473_v9 }
  0x56   :  { %14347 = vmatmul.mubr.f32.gmra.mrb[6].mxu0 %v17332_v56  ;;  %16043 = vmatprep.subr.bf16.mxu1 %v17155_v8 }
  0x57   :  { %14351 = vmatprep.mubr.f32.mxu0 %v17244_v10  ;;  %v13472_v10 = vld [vmem:[%s18846_s3] ss:$0 sm:$0xff]  ;;  %s17158_s3 = smov 64  }
  0x58   :  { %14416 = vmatmul.mubr.f32.vlgmr.msra.gmra.mrb[8].mxu1 %v17157_v46 }
  0x59   :  { %16045 = vmatpush3.bf16.msra.mxu1 %v17369_v18  ;;  %14426 = vmatprep.mubr.msk.f32.mxu1 %vm17156_vm2, %v17157_v46 }
  0x5a   :  { %14352 = vmatmul.mubr.f32.vlgmr.msra.gmra.mrb[0].mxu0 %v17246_v11  ;;  %16046 = vmatprep.subr.bf16.mxu1 %v17155_v8 }
  0x5b   :  { %14354 = vmatprep.mubr.f32.mxu0 %v17255_v15 }
  0x5d   :  { %16048 = vmatpush3.bf16.msra.mxu1 %v17384_v37 }
  0x5e   :  { %14355 = vmatmul.mubr.f32.gmra.mrb[2].mxu0 %v17269_v22  ;;  %16049 = vmatprep.subr.bf16.mxu1 %v17155_v8 }
  0x5f   :  { %14357 = vmatprep.mubr.f32.mxu0 %v17275_v24 }
  0x60   :  { %14427 = vmatmul.mubr.f32.vlgmr.msra.gmra.mrb[8].mxu1 %v17157_v46 }
  0x61   :  { %14437 = vmatprep.mubr.msk.f32.mxu1 %vm17156_vm2, %v17157_v46 }
  0x62   :  { %14358 = vmatmul.mubr.f32.gmra.mrb[4].mxu0 %v17277_v25 }
  0x63   :  { %14360 = vmatprep.mubr.f32.mxu0 %v17294_v34 }
  0x66   :  { %14361 = vmatmul.mubr.f32.gmra.mrb[6].mxu0 %v17332_v56 }
  0x67   :  { %14503 = vmatprep.mubr.msk.f32.mxu0 %vm17156_vm2, %v17157_v46 }
  0xf3   :  { %v14283_v11 = vpop.f32.mrb[0].mxu1 }
  0xf4   :  { %v192_v15 = vadd.f32 %v14283_v11, %v13472_v10  ;;  %v181_v22 = vpop.f32.mrb[1].mxu1  ;;  %v63_v11 = vld [vmem:[%s18848_s5 + $0x18] sm:$0xff] }
  0xf5   :  { %v182_v42 = vadd.f32 %v13472_v10, %v181_v22  ;;  %v52_v22 = vld [vmem:[%s18847_s4] sm:$0xff] }
  0xf7   :  { %v14286_v24 = vpop.f32.mrb[2].mxu1 }
  0xf8   :  { %v212_v27 = vadd.f32 %v14286_v24, %v13472_v10  ;;  %v201_v28 = vpop.f32.mrb[3].mxu1  ;;  %v53_v24 = vld [vmem:[%s18847_s4 + $0x8] sm:$0xff] }
  0xf9   :  { %v202_v29 = vadd.f32 %v13472_v10, %v201_v28  ;;  %v1860_v28 = vand.u32 4294901760, %v52_v22 }
 0x103   :  { %v14303_v30 = vpop.f32.mrb[4].mxu1 }
 0x104   :  { %v16923_v25 = vadd.f32 %v14303_v30, %v13472_v10  ;;  %v351_v31 = vpop.f32.mrb[5].mxu1 }
 0x105   :  { %v16925_v32 = vadd.f32 %v13472_v10, %v351_v31 }
 0x107   :  { %v14306_v33 = vpop.f32.mrb[6].mxu1 }
 0x108   :  { %v16927_v34 = vadd.f32 %v14306_v33, %v13472_v10  ;;  %v363_v38 = vpop.f32.mrb[7].mxu1 }
 0x109   :  { %v16929_v40 = vadd.f32 %v13472_v10, %v363_v38  ;;  %v1373_v10 = vand.u32 4294901760, %v61_v45 }
 0x10b   :  { %v17556_v30 = vpack.c.bf16 %v1373_v10, %v1370_v49  ;;  %v1457_v31 = vsub.f32 %v61_v45, %v1373_v10 }
 0x10d   :  { %16051 = vmatpush3.bf16.msra.mxu1 %v17556_v30  ;;  %v1458_v41 = vand.u32 4294901760, %v1457_v31 }
 0x10e   :  { %16052 = vmatprep.subr.bf16.mxu1 %v17155_v8 }
 0x10f   :  { %v1459_v54 = vsub.f32 %v1457_v31, %v1458_v41 }
 0x12d   :  { %v14353_v50 = vpop.f32.mrb[0].mxu0 }
 0x12e   :  { %v17506_v52 = vadd.f32 %v14353_v50, %v192_v15  ;;  %v810_v53 = vpop.f32.mrb[1].mxu0  ;;  %v1376_v15 = vand.u32 4294901760, %v62_v48 }
 0x12f   :  { %v16918_v55 = vadd.f32 %v810_v53, %v182_v42 }
 0x131   :  { %v14356_v56 = vpop.f32.mrb[2].mxu0 }
 0x132   :  { %v17508_v57 = vadd.f32 %v14356_v56, %v212_v27  ;;  %v822_v58 = vpop.f32.mrb[3].mxu0  ;;  %v1379_v27 = vand.u32 4294901760, %v63_v11  ;;  %v54_v56 = vld [vmem:[%s18847_s4 + $0x10] sm:$0xff] }
 0x133   :  { %v17510_v59 = vadd.f32 %v822_v58, %v202_v29  ;;  %v1341_v60 = vpop.f32.mrb[8].mxu1  ;;  %v1863_v29 = vand.u32 4294901760, %v53_v24  ;;  %v55_v58 = vld [vmem:[%s18847_s4 + $0x18] sm:$0xff] }
 0x134   :  { %v1345_v61 = vadd.f32 %v16918_v55, %v1341_v60  ;;  %v14428_v62 = vpop.f32.mrb[9].mxu1  ;;  %v1471_v33 = vsub.f32 %v63_v11, %v1379_v27  ;;  %v17561_v38 = vpack.c.bf16 %v1379_v27, %v1376_v15 }
 0x135   :  { %v14359_v0 = vpop.f32.mrb[4].mxu0  ;;  %v1460_v62 = vand.u32 4294901760, %v1459_v54 }
 0x136   :  { %v1346_v1 = vmul.f32 0.5, %v1345_v61  ;;  %v17516_v2 = vadd.f32 %v16923_v25, %v14359_v0  ;;  %v834_v3 = vpop.f32.mrb[5].mxu0  ;;  %v1450_v25 = vsub.f32 %v60_v44, %v1370_v49  ;;  %v1472_v50 = vand.u32 4294901760, %v1471_v33  ;;  %16054 = vmatpush3.bf16.msra.mxu1 %v17561_v38 }
 0x137   :  { %v17518_v4 = vadd.f32 %v16925_v32, %v834_v3  ;;  %v1464_v32 = vsub.f32 %v62_v48, %v1376_v15  ;;  %16055 = vmatprep.subr.bf16.mxu1 %v17155_v8 }
 0x138   :  { %v1347_v5 = vsel %vm17512_vm5, %v1345_v61, %v1346_v1  ;;  %v1473_v60 = vsub.f32 %v1471_v33, %v1472_v50 }
 0x139   :  { %17062 = vtanh.f32 %v1347_v5  ;;  %v14362_v6 = vpop.f32.mrb[6].mxu0  ;;  %v1465_v42 = vand.u32 4294901760, %v1464_v32  ;;  %v1866_v5 = vand.u32 4294901760, %v54_v56  ;;  %14438 = vmatmul.mubr.f32.vlgmr.msra.gmra.mrb[10].mxu1 %v17157_v46 }
 0x13a   :  { %v17522_v7 = vadd.f32 %v16927_v34, %v14362_v6  ;;  %v846_v12 = vpop.f32.mrb[7].mxu0  ;;  %v17558_v34 = vpack.c.bf16 %v1863_v29, %v1860_v28  ;;  %v1474_v3 = vand.u32 4294901760, %v1473_v60  ;;  %v1869_v6 = vand.u32 4294901760, %v55_v58  ;;  %14448 = vmatprep.mubr.msk.f32.mxu1 %vm17156_vm2, %v17157_v46 }
 0x13b   :  { %v17524_v13 = vadd.f32 %v16929_v40, %v846_v12  ;;  %v1451_v40 = vand.u32 4294901760, %v1450_v25  ;;  %v1466_v55 = vsub.f32 %v1464_v32, %v1465_v42  ;;  %v17617_v45 = vpack.c.bf16 %v1472_v50, %v1465_v42 }
 0x13c   :  { %16087 = vmatpush3.bf16.msra.mxu0 %v17558_v34  ;;  %v17622_v49 = vsub.f32 %v54_v56, %v1866_v5  ;;  %v17624_v10 = vsub.f32 %v55_v58, %v1869_v6 }
 0x13d   :  { %v1452_v53 = vsub.f32 %v1450_v25, %v1451_v40  ;;  %16088 = vmatprep.subr.bf16.mxu0 %v17155_v8  ;;  %v1467_v0 = vand.u32 4294901760, %v1466_v55 }
 0x13f   :  { %v1453_v61 = vand.u32 4294901760, %v1452_v53 }
 0x141   :  { %v17575_v12 = vpack.c.bf16 %v1460_v62, %v1453_v61 }
 0x143   :  { %v17063_v14 = vpop.eup %17062  ;;  %16057 = vmatpush3.bf16.msra.mxu1 %v17575_v12 }
 0x144   :  { %v1349_v16 = vadd.f32 1.0, %v17063_v14  ;;  %16058 = vmatprep.subr.bf16.mxu1 %v17155_v8 }
 0x146   :  { %v1350_v17 = vmul.f32 0.5, %v1349_v16  ;;  %v17581_v16 = vpack.c.bf16 %v1474_v3, %v1467_v0 }
 0x148   :  { %v17528_v20 = vsel %vm17512_vm5, %v17063_v14, %v1350_v17  ;;  %v17578_v14 = vpack.c.bf16 %v1869_v6, %v1866_v5  ;;  %16060 = vmatpush3.bf16.msra.mxu1 %v17581_v16  ;;  %v17589_v17 = vpack.c.bf16 %v1457_v31, %v1450_v25 }
 0x149   :  { %1354 = vrot.lane.b32.xlu0 %v17528_v20, %s17158_s3  ;;  %v1352_v36 = vmul.f32 0.0, %v17528_v20  ;;  %16061 = vmatprep.subr.bf16.mxu1 %v17155_v8 }
 0x14a   :  { %16090 = vmatpush3.bf16.msra.mxu0 %v17578_v14 }
 0x14b   :  { %16097 = vmatprep.subr.bf16.mxu0 %v17155_v8  ;;  %14449 = vmatmul.mubr.f32.vlgmr.msra.gmra.mrb[12].mxu1 %v17157_v46 }
 0x14c   :  { %16063 = vmatpush3.bf16.msra.mxu1 %v17589_v17  ;;  %14459 = vmatprep.mubr.msk.f32.mxu1 %vm17156_vm2, %v17157_v46 }
 0x14d   :  { %16064 = vmatprep.subr.bf16.mxu1 %v17155_v8 }
 0x1bb   :  { %v1355_v26 = vpop.permute.xlu0 %1354 }
 0x1bc   :  { %v1357_v35 = vmul.f32 %v1355_v26, %v17528_v20  ;;  %v17594_v26 = vpack.c.bf16 %v1471_v33, %v1464_v32 }
 0x1be   :  { %1359 = vrot.lane.b32.xlu0 %v1357_v35, %s17159_s26  ;;  %16066 = vmatpush3.bf16.msra.mxu1 %v17594_v26  ;;  %v17606_v35 = vsub.f32 %v52_v22, %v1860_v28  ;;  %v1955_v22 = vand.u32 4294901760, %v17622_v49 }
 0x1bf   :  { %16067 = vmatprep.subr.bf16.mxu1 %v17155_v8 }
 0x1c0   :  { %v1941_v44 = vand.u32 4294901760, %v17606_v35 }
 0x1c1   :  { %14460 = vmatmul.mubr.f32.vlgmr.msra.gmra.mrb[14].mxu1 %v17157_v46 }
 0x1c2   :  { %16069 = vmatpush3.bf16.msra.mxu1 %v17556_v30  ;;  %14470 = vmatprep.mubr.msk.f32.mxu1 %vm17156_vm2, %v17157_v46  ;;  %v1942_v11 = vsub.f32 %v17606_v35, %v1941_v44 }
 0x1c3   :  { %16070 = vmatprep.subr.bf16.mxu1 %v17155_v8 }
 0x1c4   :  { %v1943_v27 = vand.u32 4294901760, %v1942_v11 }
 0x1c6   :  { %16072 = vmatpush3.bf16.msra.mxu1 %v17561_v38 }
 0x1c7   :  { %16073 = vmatprep.subr.bf16.mxu1 %v17155_v8 }
 0x1c9   :  { %14471 = vmatmul.mubr.f32.vlgmr.msra.gmra.mrb[16].mxu1 %v17157_v46 }
 0x1ca   :  { %14481 = vmatprep.mubr.msk.f32.mxu1 %vm17156_vm2, %v17157_v46 }
 0x20c   :  { %v1444_v50 = vpop.f32.mrb[10].mxu1 }
 0x20d   :  { %v14439_v53 = vpop.f32.mrb[11].mxu1 }
 0x21e   :  { %v1535_v54 = vpop.f32.mrb[12].mxu1 }
 0x21f   :  { %v1536_v55 = vadd.f32 %v1535_v54, %v1444_v50  ;;  %v14450_v56 = vpop.f32.mrb[13].mxu1 }
 0x230   :  { %v1360_v39 = vpop.permute.xlu0 %1359 }
 0x231   :  { %v17535_v43 = vadd.f32 %v1360_v39, %v1352_v36  ;;  %v17609_v36 = vpack.c.bf16 %v1458_v41, %v1451_v40  ;;  %v17611_v39 = vsub.f32 %v53_v24, %v1863_v29  ;;  %v1962_v24 = vand.u32 4294901760, %v17624_v10 }
 0x232   :  { %v1956_v29 = vsub.f32 %v17622_v49, %v1955_v22 }
 0x233   :  { %17064 = vtanh.f32 %v17535_v43  ;;  %16075 = vmatpush3.bf16.msra.mxu1 %v17609_v36  ;;  %v1948_v48 = vand.u32 4294901760, %v17611_v39  ;;  %v1963_v25 = vsub.f32 %v17624_v10, %v1962_v24 }
 0x234   :  { %16076 = vmatprep.subr.bf16.mxu1 %v17155_v8  ;;  %v1957_v32 = vand.u32 4294901760, %v1956_v29  ;;  %v17690_v29 = vpack.c.bf16 %v17624_v10, %v17622_v49 }
 0x235   :  { %v1949_v15 = vsub.f32 %v17611_v39, %v1948_v48  ;;  %v1964_v33 = vand.u32 4294901760, %v1963_v25 }
 0x237   :  { %16078 = vmatpush3.bf16.msra.mxu1 %v17617_v45  ;;  %v1950_v28 = vand.u32 4294901760, %v1949_v15  ;;  %v17654_v40 = vpack.c.bf16 %v1964_v33, %v1957_v32 }
 0x238   :  { %16079 = vmatprep.subr.bf16.mxu1 %v17155_v8 }
 0x239   :  { %v17649_v31 = vpack.c.bf16 %v1950_v28, %v1943_v27  ;;  %v17682_v27 = vpack.c.bf16 %v17611_v39, %v17606_v35 }
 0x23a   :  { %14482 = vmatmul.mubr.f32.vlgmr.msra.gmra.mrb[18].mxu1 %v17157_v46 }
 0x23b   :  { %16081 = vmatpush3.bf16.msra.mxu1 %v17556_v30  ;;  %14492 = vmatprep.mubr.msk.f32.mxu1 %vm17156_vm2, %v17157_v46 }
 0x23c   :  { %16082 = vmatprep.subr.bf16.mxu1 %v17155_v8 }
 0x23d   :  { %v17065_v1 = vpop.eup %17064 }
 0x23e   :  { %1365 = vrot.lane.b32.xlu1 %v17065_v1, %s17158_s3 }
 0x23f   :  { %16084 = vmatpush3.bf16.msra.mxu1 %v17561_v38 }
 0x240   :  { %16091 = vmatprep.subr.bf16.mxu1 %v17155_v8 }
 0x242   :  { %14493 = vmatmul.mubr.f32.vlgmr.msra.gmra.mrb[20].mxu1 %v17157_v46 }
 0x243   :  { %16093 = vmatpush3.bf16.msra.mxu1 %v17649_v31  ;;  %14514 = vmatprep.mubr.msk.f32.mxu1 %vm17156_vm2, %v17157_v46 }
 0x244   :  { %16094 = vmatprep.subr.bf16.mxu1 %v17155_v8 }
 0x247   :  { %16096 = vmatpush3.bf16.msra.mxu1 %v17654_v40 }
 0x248   :  { %16103 = vmatprep.subr.bf16.mxu1 %v17155_v8 }
 0x294   :  { %v1615_v58 = vpop.f32.mrb[14].mxu1 }
 0x295   :  { %v1616_v60 = vadd.f32 %v1615_v58, %v1536_v55  ;;  %v14461_v61 = vpop.f32.mrb[15].mxu1 }
 0x2b0   :  { %v1366_v41 = vpop.permute.xlu1 %1365 }
 0x2b1   :  { %v1368_v42 = vmul.f32 %v1366_v41, %v17528_v20  ;;  %v1692_v20 = vpop.f32.mrb[16].mxu1  ;;  %v17704_v41 = vpack.c.bf16 %v1948_v48, %v1941_v44 }
 0x2b2   :  { %v1693_v6 = vadd.f32 %v1692_v20, %v1616_v60  ;;  %v14472_v11 = vpop.f32.mrb[17].mxu1  ;;  %v17779_v20 = vld [vmem:[%s18849_s6] ss:$0 sm:$0xff] }
 0x2b3   :  { %1855 = vrot.lane.b32.xlu1 %v1368_v42, %s17159_s26  ;;  %v17715_v42 = vpack.c.bf16 %v1962_v24, %v1955_v22 }
 0x30d   :  { %v1775_v25 = vpop.f32.mrb[18].mxu1 }
 0x30e   :  { %v1776_v32 = vadd.f32 %v1775_v25, %v1693_v6  ;;  %v14483_v33 = vpop.f32.mrb[19].mxu1 }
 0x315   :  { %v1850_v35 = vpop.f32.mrb[20].mxu1 }
 0x316   :  { %v1851_v39 = vadd.f32 %v1850_v35, %v1776_v32  ;;  %v14494_v44 = vpop.f32.mrb[21].mxu1 }
 0x325   :  { %v1856_v62 = vpop.permute.xlu1 %1855 }
 0x326   :  { %v1857_v0 = vsel %vm856_vm6, %v1856_v62, 0 }
 0x327   :  { %v17664_v1 = vand.u32 4294901760, %v1857_v0 }
 0x329   :  { %v17667_v3 = vsub.f32 %v1857_v0, %v17664_v1  ;;  %14515 = vmatmul.mubr.f32.vlgmr.msra.gmra.mrb[22].mxu1 %v17664_v1 }
 0x32a   :  { %16105 = vmatpush3.bf16.msra.mxu1 %v17558_v34  ;;  %14536 = vmatprep.mubr.msk.f32.mxu1 %vm17156_vm2, %v17157_v46 }
 0x32b   :  { %16106 = vmatprep.subr.bf16.mxu1 %v17155_v8  ;;  %v17675_v5 = vand.u32 4294901760, %v17667_v3 }
 0x32d   :  { %v1931_v15 = vsub.f32 %v17667_v3, %v17675_v5 }
 0x32e   :  { %16108 = vmatpush3.bf16.msra.mxu1 %v17578_v14 }
 0x32f   :  { %16115 = vmatprep.subr.bf16.mxu1 %v17155_v8  ;;  %v1932_v28 = vand.u32 4294901760, %v1931_v15 }
 0x331   :  { %14537 = vmatmul.mubr.f32.vlgmr.msra.gmra.mrb[24].mxu1 %v17675_v5  ;;  %14504 = vmatmul.mubr.f32.vlgmr.msra.gmra.mrb[8].mxu0 %v1932_v28 }
 0x332   :  { %16099 = vmatpush3.bf16.msra.mxu0 %v17682_v27  ;;  %16117 = vmatpush3.bf16.msra.mxu1 %v17558_v34 }
 0x333   :  { %16100 = vmatprep.subr.bf16.mxu0 %v17155_v8  ;;  %16118 = vmatprep.subr.bf16.mxu1 %v17155_v8 }
 0x334   :  { %14525 = vmatprep.mubr.msk.f32.mxu0 %vm17156_vm2, %v17157_v46  ;;  %14558 = vmatprep.mubr.msk.f32.mxu1 %vm17156_vm2, %v17157_v46 }
 0x336   :  { %16102 = vmatpush3.bf16.msra.mxu0 %v17690_v29  ;;  %16120 = vmatpush3.bf16.msra.mxu1 %v17578_v14 }
 0x337   :  { %16109 = vmatprep.subr.bf16.mxu0 %v17155_v8  ;;  %16157 = vmatprep.subr.bf16.mxu1 %v17155_v8 }
 0x339   :  { %14526 = vmatmul.mubr.f32.vlgmr.msra.gmra.mrb[10].mxu0 %v17667_v3  ;;  %14559 = vmatmul.mubr.f32.vlgmr.msra.gmra.mrb[26].mxu1 %v17664_v1 }
 0x33a   :  { %16111 = vmatpush3.bf16.msra.mxu0 %v17704_v41  ;;  %14547 = vmatprep.mubr.msk.f32.mxu0 %vm17156_vm2, %v17157_v46 }
 0x33b   :  { %16112 = vmatprep.subr.bf16.mxu0 %v17155_v8  ;;  %16159 = vmatpush3.bf16.msra.mxu1 %v17556_v30 }
 0x33c   :  { %16160 = vmatprep.subr.bf16.mxu1 %v17155_v8  ;;  %14635 = vmatprep.mubr.msk.f32.mxu1 %vm17156_vm2, %v17157_v46 }
 0x33e   :  { %16114 = vmatpush3.bf16.msra.mxu0 %v17715_v42 }
 0x33f   :  { %16121 = vmatprep.subr.bf16.mxu0 %v17155_v8  ;;  %16162 = vmatpush3.bf16.msra.mxu1 %v17561_v38 }
 0x340   :  { %16163 = vmatprep.subr.bf16.mxu1 %v17155_v8 }
 0x341   :  { %14548 = vmatmul.mubr.f32.vlgmr.msra.gmra.mrb[12].mxu0 %v17664_v1 }
 0x342   :  { %16123 = vmatpush3.bf16.msra.mxu0 %v17369_v18  ;;  %14569 = vmatprep.mubr.msk.f32.mxu0 %vm17156_vm2, %v17157_v46 }
 0x343   :  { %16124 = vmatprep.subr.bf16.mxu0 %v17155_v8 }
 0x346   :  { %16126 = vmatpush3.bf16.msra.mxu0 %v17384_v37 }
 0x347   :  { %16127 = vmatprep.subr.bf16.mxu0 %v17155_v8 }
 0x349   :  { %14570 = vmatmul.mubr.f32.vlgmr.msra.gmra.mrb[14].mxu0 %v1932_v28 }
 0x34a   :  { %16129 = vmatpush3.bf16.msra.mxu0 %v17401_v47  ;;  %14580 = vmatprep.mubr.msk.f32.mxu0 %vm17156_vm2, %v17157_v46 }
 0x34b   :  { %16130 = vmatprep.subr.bf16.mxu0 %v17155_v8 }
 0x34e   :  { %16132 = vmatpush3.bf16.msra.mxu0 %v17409_v51 }
 0x34f   :  { %16133 = vmatprep.subr.bf16.mxu0 %v17155_v8 }
 0x351   :  { %14581 = vmatmul.mubr.f32.vlgmr.msra.gmra.mrb[14].mxu0 %v17664_v1 }
 0x352   :  { %16135 = vmatpush3.bf16.msra.mxu0 %v17423_v19  ;;  %14591 = vmatprep.mubr.msk.f32.mxu0 %vm17156_vm2, %v17157_v46 }
 0x353   :  { %16136 = vmatprep.subr.bf16.mxu0 %v17155_v8 }
 0x356   :  { %16138 = vmatpush3.bf16.msra.mxu0 %v17434_v21 }
 0x357   :  { %16139 = vmatprep.subr.bf16.mxu0 %v17155_v8 }
 0x359   :  { %14592 = vmatmul.mubr.f32.vlgmr.msra.gmra.mrb[14].mxu0 %v17667_v3 }
 0x35a   :  { %16141 = vmatpush3.bf16.msra.mxu0 %v17369_v18  ;;  %14602 = vmatprep.mubr.msk.f32.mxu0 %vm17156_vm2, %v17157_v46 }
 0x35b   :  { %16142 = vmatprep.subr.bf16.mxu0 %v17155_v8 }
 0x35e   :  { %16144 = vmatpush3.bf16.msra.mxu0 %v17384_v37 }
 0x35f   :  { %16145 = vmatprep.subr.bf16.mxu0 %v17155_v8 }
 0x361   :  { %14603 = vmatmul.mubr.f32.vlgmr.msra.gmra.mrb[14].mxu0 %v17675_v5 }
 0x362   :  { %16147 = vmatpush3.bf16.msra.mxu0 %v17462_v23  ;;  %14613 = vmatprep.mubr.msk.f32.mxu0 %vm17156_vm2, %v17157_v46 }
 0x363   :  { %16148 = vmatprep.subr.bf16.mxu0 %v17155_v8 }
 0x366   :  { %16150 = vmatpush3.bf16.msra.mxu0 %v17473_v9 }
 0x367   :  { %16151 = vmatprep.subr.bf16.mxu0 %v17155_v8 }
 0x369   :  { %14614 = vmatmul.mubr.f32.vlgmr.msra.gmra.mrb[14].mxu0 %v17664_v1 }
 0x36a   :  { %16153 = vmatpush3.bf16.msra.mxu0 %v17369_v18  ;;  %14624 = vmatprep.mubr.msk.f32.mxu0 %vm17156_vm2, %v17157_v46 }
 0x36b   :  { %16154 = vmatprep.subr.bf16.mxu0 %v17155_v8 }
 0x36e   :  { %16156 = vmatpush3.bf16.msra.mxu0 %v17384_v37 }
 0x36f   :  { %16193 = vmatprep.subr.bf16.mxu0 %v17155_v8 }
 0x371   :  { %14625 = vmatmul.mubr.f32.vlgmr.msra.gmra.mrb[14].mxu0 %v17664_v1 }
 0x372   :  { %16195 = vmatpush3.bf16.msra.mxu0 %v17558_v34  ;;  %14701 = vmatprep.mubr.msk.f32.mxu0 %vm17156_vm2, %v17157_v46 }
 0x373   :  { %16196 = vmatprep.subr.bf16.mxu0 %v17155_v8 }
 0x376   :  { %16198 = vmatpush3.bf16.msra.mxu0 %v17578_v14 }
 0x377   :  { %16205 = vmatprep.subr.bf16.mxu0 %v17155_v8 }
 0x3fc   :  { %v2025_v48 = vpop.f32.mrb[22].mxu1 }
 0x3fd   :  { %v14516_v49 = vpop.f32.mrb[23].mxu1 }
 0x404   :  { %v2182_v10 = vpop.f32.mrb[24].mxu1  ;;  %v1934_v22 = vpop.f32.mrb[8].mxu0 }
 0x405   :  { %v1935_v24 = vadd.f32 %v1934_v22, %v1851_v39  ;;  %v14538_v50 = vpop.f32.mrb[25].mxu1  ;;  %v14505_v53 = vpop.f32.mrb[9].mxu0 }
 0x407   :  { %v2026_v54 = vadd.f32 %v2025_v48, %v1935_v24 }
 0x40c   :  { %v2105_v55 = vpop.f32.mrb[10].mxu0  ;;  %v2340_v56 = vpop.f32.mrb[26].mxu1 }
 0x40d   :  { %v2106_v58 = vadd.f32 %v2105_v55, %v2026_v54  ;;  %v14527_v60 = vpop.f32.mrb[11].mxu0  ;;  %v14560_v61 = vpop.f32.mrb[27].mxu1 }
 0x40f   :  { %v2183_v62 = vadd.f32 %v2182_v10, %v2106_v58 }
 0x414   :  { %v2265_v0 = vpop.f32.mrb[12].mxu0 }
 0x415   :  { %v2266_v1 = vadd.f32 %v2265_v0, %v2183_v62  ;;  %v14549_v3 = vpop.f32.mrb[13].mxu0 }
 0x417   :  { %v2341_v5 = vadd.f32 %v2340_v56, %v2266_v1 }
 0x419   :  { %v2350_v6 = vadd.f32 %v17779_v20, %v2341_v5 }
 0x41b   :  { %v2351_v11 = vmul.f32 0.5, %v2350_v6 }
 0x41d   :  { %v2352_v15 = vsel %vm17512_vm5, %v2350_v6, %v2351_v11 }
 0x41e   :  { %17066 = vtanh.f32 %v2352_v15 }
 0x428   :  { %v17067_v28 = vpop.eup %17066 }
 0x429   :  { %v2354_v25 = vadd.f32 1.0, %v17067_v28 }
 0x42b   :  { %v2355_v32 = vmul.f32 0.5, %v2354_v25 }
 0x42d   :  { %v2356_v33 = vsel %vm17512_vm5, %v17067_v28, %v2355_v32 }
 0x42e   :  { %2359 = vrot.lane.b32.xlu0 %v2356_v33, %s17158_s3  ;;  %v2357_v56 = vmul.f32 0.0, %v2356_v33 }
 0x444   :  { %v2855_v35 = vpop.f32.mrb[14].mxu0 }
 0x445   :  { %v2859_v39 = vadd.f32 %v17506_v52, %v2855_v35  ;;  %v14626_v44 = vpop.f32.mrb[15].mxu0 }
 0x447   :  { %v2860_v48 = vmul.f32 0.5, %v2859_v39 }
 0x449   :  { %v2861_v49 = vsel %vm17512_vm5, %v2859_v39, %v2860_v48 }
 0x44a   :  { %17068 = vtanh.f32 %v2861_v49 }
 0x454   :  { %v17069_v10 = vpop.eup %17068 }
 0x455   :  { %v2863_v22 = vadd.f32 1.0, %v17069_v10 }
 0x457   :  { %v2864_v24 = vmul.f32 0.5, %v2863_v22 }
 0x459   :  { %v2865_v50 = vsel %vm17512_vm5, %v17069_v10, %v2864_v24 }
 0x45a   :  { %2868 = vrot.lane.b32.xlu1 %v2865_v50, %s17158_s3  ;;  %v2866_v62 = vmul.f32 %v2865_v50, %v17535_v43 }
 0x4a0   :  { %v2360_v53 = vpop.permute.xlu0 %2359 }
 0x4a1   :  { %v2362_v54 = vmul.f32 %v2360_v53, %v2356_v33 }
 0x4a3   :  { %2364 = vrot.lane.b32.xlu0 %v2362_v54, %s17159_s26 }
 0x4cc   :  { %v2869_v55 = vpop.permute.xlu1 %2868 }
 0x4cd   :  { %v2871_v52 = vmul.f32 %v2869_v55, %v2865_v50 }
 0x4cf   :  { %2873 = vrot.lane.b32.xlu1 %v2871_v52, %s17159_s26 }
 0x515   :  { %v2365_v58 = vpop.permute.xlu0 %2364 }
 0x516   :  { %v17795_v60 = vadd.f32 %v2365_v58, %v2357_v56 }
 0x518   :  { %17070 = vtanh.f32 %v17795_v60 }
 0x522   :  { %v17071_v61 = vpop.eup %17070 }
 0x523   :  { %2370 = vrot.lane.b32.xlu0 %v17071_v61, %s17158_s3 }
 0x541   :  { %v2874_v0 = vpop.permute.xlu1 %2873 }
 0x542   :  { %v17800_v1 = vadd.f32 %v2874_v0, %v2866_v62 }
 0x544   :  { %17072 = vtanh.f32 %v17800_v1 }
 0x54e   :  { %v17073_v3 = vpop.eup %17072 }
 0x54f   :  { %2879 = vrot.lane.b32.xlu1 %v17073_v3, %s17158_s3 }
 0x595   :  { %v2371_v5 = vpop.permute.xlu0 %2370 }
 0x596   :  { %v2373_v6 = vmul.f32 %v2371_v5, %v2356_v33 }
 0x598   :  { %2884 = vrot.lane.b32.xlu0 %v2373_v6, %s17159_s26 }
 0x5c1   :  { %v2880_v11 = vpop.permute.xlu1 %2879 }
 0x5c2   :  { %v2882_v15 = vmul.f32 %v2880_v11, %v2865_v50 }
 0x5c4   :  { %3374 = vrot.lane.b32.xlu1 %v2882_v15, %s17159_s26 }
 0x60a   :  { %v2885_v28 = vpop.permute.xlu0 %2884 }
 0x60b   :  { %v2886_v25 = vsel %vm856_vm6, %v2885_v28, 0 }
 0x60c   :  { %v2957_v43 = vand.u32 4294901760, %v2886_v25 }
 0x60e   :  { %v2958_v32 = vsub.f32 %v2886_v25, %v2957_v43 }
 0x610   :  { %v2959_v35 = vand.u32 4294901760, %v2958_v32 }
 0x612   :  { %v2960_v39 = vsub.f32 %v2958_v32, %v2959_v35 }
 0x614   :  { %v2961_v44 = vand.u32 4294901760, %v2960_v39 }
 0x616   :  { %14636 = vmatmul.mubr.f32.vlgmr.msra.gmra.mrb[28].mxu1 %v2961_v44 }
 0x617   :  { %16165 = vmatpush3.bf16.msra.mxu1 %v17575_v12  ;;  %14646 = vmatprep.mubr.msk.f32.mxu1 %vm17156_vm2, %v17157_v46 }
 0x618   :  { %16166 = vmatprep.subr.bf16.mxu1 %v17155_v8 }
 0x61b   :  { %16168 = vmatpush3.bf16.msra.mxu1 %v17581_v16 }
 0x61c   :  { %16169 = vmatprep.subr.bf16.mxu1 %v17155_v8 }
 0x61e   :  { %14647 = vmatmul.mubr.f32.vlgmr.msra.gmra.mrb[30].mxu1 %v2957_v43 }
 0x61f   :  { %16171 = vmatpush3.bf16.msra.mxu1 %v17589_v17  ;;  %14657 = vmatprep.mubr.msk.f32.mxu1 %vm17156_vm2, %v17157_v46 }
 0x620   :  { %16172 = vmatprep.subr.bf16.mxu1 %v17155_v8 }
 0x623   :  { %16174 = vmatpush3.bf16.msra.mxu1 %v17594_v26 }
 0x624   :  { %16175 = vmatprep.subr.bf16.mxu1 %v17155_v8 }
 0x626   :  { %14658 = vmatmul.mubr.f32.vlgmr.msra.gmra.mrb[32].mxu1 %v2958_v32 }
 0x627   :  { %16177 = vmatpush3.bf16.msra.mxu1 %v17556_v30  ;;  %14668 = vmatprep.mubr.msk.f32.mxu1 %vm17156_vm2, %v17157_v46 }
 0x628   :  { %16178 = vmatprep.subr.bf16.mxu1 %v17155_v8 }
 0x62b   :  { %16180 = vmatpush3.bf16.msra.mxu1 %v17561_v38 }
 0x62c   :  { %16181 = vmatprep.subr.bf16.mxu1 %v17155_v8 }
 0x62e   :  { %14669 = vmatmul.mubr.f32.vlgmr.msra.gmra.mrb[34].mxu1 %v2959_v35 }
 0x62f   :  { %16183 = vmatpush3.bf16.msra.mxu1 %v17609_v36  ;;  %14679 = vmatprep.mubr.msk.f32.mxu1 %vm17156_vm2, %v17157_v46 }
 0x630   :  { %16184 = vmatprep.subr.bf16.mxu1 %v17155_v8 }
 0x633   :  { %16186 = vmatpush3.bf16.msra.mxu1 %v17617_v45 }
 0x634   :  { %16187 = vmatprep.subr.bf16.mxu1 %v17155_v8 }
 0x636   :  { %14680 = vmatmul.mubr.f32.vlgmr.msra.gmra.mrb[36].mxu1 %v2957_v43  ;;  %v3375_v33 = vpop.permute.xlu1 %3374 }
 0x637   :  { %16189 = vmatpush3.bf16.msra.mxu1 %v17556_v30  ;;  %v3376_v48 = vsel %vm856_vm6, %v3375_v33, 0  ;;  %14690 = vmatprep.mubr.msk.f32.mxu1 %vm17156_vm2, %v17157_v46 }
 0x638   :  { %v17835_v49 = vand.u32 4294901760, %v3376_v48  ;;  %16190 = vmatprep.subr.bf16.mxu1 %v17155_v8 }
 0x63a   :  { %v3448_v10 = vsub.f32 %v3376_v48, %v17835_v49 }
 0x63b   :  { %16192 = vmatpush3.bf16.msra.mxu1 %v17561_v38 }
 0x63c   :  { %v17840_v22 = vand.u32 4294901760, %v3448_v10  ;;  %16199 = vmatprep.subr.bf16.mxu1 %v17155_v8 }
 0x63e   :  { %14691 = vmatmul.mubr.f32.vlgmr.msra.gmra.mrb[38].mxu1 %v2957_v43  ;;  %v3450_v24 = vsub.f32 %v3448_v10, %v17840_v22 }
 0x63f   :  { %16201 = vmatpush3.bf16.msra.mxu1 %v17649_v31  ;;  %14712 = vmatprep.mubr.msk.f32.mxu1 %vm17156_vm2, %v17157_v46 }
 0x640   :  { %16202 = vmatprep.subr.bf16.mxu1 %v17155_v8  ;;  %v3451_v50 = vand.u32 4294901760, %v3450_v24 }
 0x642   :  { %14702 = vmatmul.mubr.f32.vlgmr.msra.gmra.mrb[16].mxu0 %v3451_v50 }
 0x643   :  { %16204 = vmatpush3.bf16.msra.mxu1 %v17654_v40  ;;  %16207 = vmatpush3.bf16.msra.mxu0 %v17682_v27 }
 0x644   :  { %16208 = vmatprep.subr.bf16.mxu0 %v17155_v8  ;;  %16211 = vmatprep.subr.bf16.mxu1 %v17155_v8 }
 0x645   :  { %14723 = vmatprep.mubr.msk.f32.mxu0 %vm17156_vm2, %v17157_v46 }
 0x646   :  { %14713 = vmatmul.mubr.f32.vlgmr.msra.gmra.mrb[40].mxu1 %v17835_v49 }
 0x647   :  { %16210 = vmatpush3.bf16.msra.mxu0 %v17690_v29  ;;  %16213 = vmatpush3.bf16.msra.mxu1 %v17558_v34 }
 0x648   :  { %16214 = vmatprep.subr.bf16.mxu1 %v17155_v8  ;;  %16217 = vmatprep.subr.bf16.mxu0 %v17155_v8 }
 0x649   :  { %14734 = vmatprep.mubr.msk.f32.mxu1 %vm17156_vm2, %v17157_v46 }
 0x64a   :  { %14724 = vmatmul.mubr.f32.vlgmr.msra.gmra.mrb[18].mxu0 %v3448_v10 }
 0x64b   :  { %16216 = vmatpush3.bf16.msra.mxu1 %v17578_v14  ;;  %16219 = vmatpush3.bf16.msra.mxu0 %v17704_v41 }
 0x64c   :  { %16220 = vmatprep.subr.bf16.mxu0 %v17155_v8  ;;  %16223 = vmatprep.subr.bf16.mxu1 %v17155_v8 }
 0x64d   :  { %14745 = vmatprep.mubr.msk.f32.mxu0 %vm17156_vm2, %v17157_v46 }
 0x64e   :  { %14735 = vmatmul.mubr.f32.vlgmr.msra.gmra.mrb[42].mxu1 %v17840_v22 }
 0x64f   :  { %16222 = vmatpush3.bf16.msra.mxu0 %v17715_v42  ;;  %16225 = vmatpush3.bf16.msra.mxu1 %v17558_v34 }
 0x650   :  { %16226 = vmatprep.subr.bf16.mxu1 %v17155_v8  ;;  %16229 = vmatprep.subr.bf16.mxu0 %v17155_v8 }
 0x651   :  { %14756 = vmatprep.mubr.msk.f32.mxu1 %vm17156_vm2, %v17157_v46 }
 0x652   :  { %14746 = vmatmul.mubr.f32.vlgmr.msra.gmra.mrb[20].mxu0 %v17835_v49 }
 0x653   :  { %16228 = vmatpush3.bf16.msra.mxu1 %v17578_v14  ;;  %16231 = vmatpush3.bf16.msra.mxu0 %v17369_v18 }
 0x654   :  { %16232 = vmatprep.subr.bf16.mxu0 %v17155_v8  ;;  %14767 = vmatprep.mubr.msk.f32.mxu0 %vm17156_vm2, %v17157_v46 }
 0x655   :  { %16265 = vmatprep.subr.bf16.mxu1 %v17155_v8 }
 0x656   :  { %14757 = vmatmul.mubr.f32.vlgmr.msra.gmra.mrb[44].mxu1 %v17835_v49 }
 0x657   :  { %16234 = vmatpush3.bf16.msra.mxu0 %v17384_v37  ;;  %16267 = vmatpush3.bf16.msra.mxu1 %v17556_v30 }
 0x658   :  { %16235 = vmatprep.subr.bf16.mxu0 %v17155_v8  ;;  %16268 = vmatprep.subr.bf16.mxu1 %v17155_v8 }
 0x659   :  { %14833 = vmatprep.mubr.msk.f32.mxu1 %vm17156_vm2, %v17157_v46 }
 0x65a   :  { %14768 = vmatmul.mubr.f32.vlgmr.msra.gmra.mrb[22].mxu0 %v3451_v50 }
 0x65b   :  { %16237 = vmatpush3.bf16.msra.mxu0 %v17401_v47  ;;  %14778 = vmatprep.mubr.msk.f32.mxu0 %vm17156_vm2, %v17157_v46 }
 0x65c   :  { %16238 = vmatprep.subr.bf16.mxu0 %v17155_v8  ;;  %16270 = vmatpush3.bf16.msra.mxu1 %v17561_v38 }
 0x65d   :  { %16271 = vmatprep.subr.bf16.mxu1 %v17155_v8 }
 0x65f   :  { %16240 = vmatpush3.bf16.msra.mxu0 %v17409_v51 }
 0x660   :  { %16241 = vmatprep.subr.bf16.mxu0 %v17155_v8 }
 0x662   :  { %14779 = vmatmul.mubr.f32.vlgmr.msra.gmra.mrb[22].mxu0 %v17835_v49 }
 0x663   :  { %16243 = vmatpush3.bf16.msra.mxu0 %v17423_v19  ;;  %14789 = vmatprep.mubr.msk.f32.mxu0 %vm17156_vm2, %v17157_v46 }
 0x664   :  { %16244 = vmatprep.subr.bf16.mxu0 %v17155_v8 }
 0x667   :  { %16246 = vmatpush3.bf16.msra.mxu0 %v17434_v21 }
 0x668   :  { %16247 = vmatprep.subr.bf16.mxu0 %v17155_v8 }
 0x66a   :  { %14790 = vmatmul.mubr.f32.vlgmr.msra.gmra.mrb[22].mxu0 %v3448_v10 }
 0x66b   :  { %16249 = vmatpush3.bf16.msra.mxu0 %v17369_v18  ;;  %14800 = vmatprep.mubr.msk.f32.mxu0 %vm17156_vm2, %v17157_v46 }
 0x66c   :  { %16250 = vmatprep.subr.bf16.mxu0 %v17155_v8 }
 0x66f   :  { %16252 = vmatpush3.bf16.msra.mxu0 %v17384_v37 }
 0x670   :  { %16253 = vmatprep.subr.bf16.mxu0 %v17155_v8 }
 0x672   :  { %14801 = vmatmul.mubr.f32.vlgmr.msra.gmra.mrb[22].mxu0 %v17840_v22 }
 0x673   :  { %16255 = vmatpush3.bf16.msra.mxu0 %v17462_v23  ;;  %14811 = vmatprep.mubr.msk.f32.mxu0 %vm17156_vm2, %v17157_v46 }
 0x674   :  { %16256 = vmatprep.subr.bf16.mxu0 %v17155_v8 }
 0x677   :  { %16258 = vmatpush3.bf16.msra.mxu0 %v17473_v9 }
 0x678   :  { %16259 = vmatprep.subr.bf16.mxu0 %v17155_v8 }
 0x67a   :  { %14812 = vmatmul.mubr.f32.vlgmr.msra.gmra.mrb[22].mxu0 %v17835_v49 }
 0x67b   :  { %16261 = vmatpush3.bf16.msra.mxu0 %v17369_v18  ;;  %14822 = vmatprep.mubr.msk.f32.mxu0 %vm17156_vm2, %v17157_v46 }
 0x67c   :  { %16262 = vmatprep.subr.bf16.mxu0 %v17155_v8 }
 0x67f   :  { %16264 = vmatpush3.bf16.msra.mxu0 %v17384_v37 }
 0x680   :  { %16301 = vmatprep.subr.bf16.mxu0 %v17155_v8 }
 0x682   :  { %14823 = vmatmul.mubr.f32.vlgmr.msra.gmra.mrb[22].mxu0 %v17835_v49 }
 0x683   :  { %16303 = vmatpush3.bf16.msra.mxu0 %v17558_v34  ;;  %14899 = vmatprep.mubr.msk.f32.mxu0 %vm17156_vm2, %v17157_v46 }
 0x684   :  { %16304 = vmatprep.subr.bf16.mxu0 %v17155_v8 }
 0x687   :  { %16306 = vmatpush3.bf16.msra.mxu0 %v17578_v14 }
 0x688   :  { %16313 = vmatprep.subr.bf16.mxu0 %v17155_v8 }
 0x6e9   :  { %v2963_v53 = vpop.f32.mrb[28].mxu1 }
 0x6ea   :  { %v14637_v54 = vpop.f32.mrb[29].mxu1 }
 0x6f1   :  { %v3054_v55 = vpop.f32.mrb[30].mxu1 }
 0x6f2   :  { %v3055_v52 = vadd.f32 %v3054_v55, %v2963_v53  ;;  %v14648_v56 = vpop.f32.mrb[31].mxu1 }
 0x6f9   :  { %v3134_v58 = vpop.f32.mrb[32].mxu1 }
 0x6fa   :  { %v3135_v61 = vadd.f32 %v3134_v58, %v3055_v52  ;;  %v14659_v62 = vpop.f32.mrb[33].mxu1 }
 0x701   :  { %v3211_v0 = vpop.f32.mrb[34].mxu1 }
 0x702   :  { %v3212_v3 = vadd.f32 %v3211_v0, %v3135_v61  ;;  %v14670_v5 = vpop.f32.mrb[35].mxu1 }
 0x709   :  { %v3294_v6 = vpop.f32.mrb[36].mxu1 }
 0x70a   :  { %v3295_v11 = vadd.f32 %v3294_v6, %v3212_v3  ;;  %v14681_v15 = vpop.f32.mrb[37].mxu1 }
 0x711   :  { %v3369_v28 = vpop.f32.mrb[38].mxu1 }
 0x712   :  { %v3370_v25 = vadd.f32 %v3369_v28, %v3295_v11  ;;  %v14692_v43 = vpop.f32.mrb[39].mxu1 }
 0x715   :  { %v3453_v32 = vpop.f32.mrb[16].mxu0 }
 0x716   :  { %v3454_v35 = vadd.f32 %v3453_v32, %v3370_v25  ;;  %v14703_v39 = vpop.f32.mrb[17].mxu0 }
 0x719   :  { %v3544_v44 = vpop.f32.mrb[40].mxu1 }
 0x71a   :  { %v3545_v33 = vadd.f32 %v3544_v44, %v3454_v35  ;;  %v14714_v48 = vpop.f32.mrb[41].mxu1 }
 0x71d   :  { %v3624_v49 = vpop.f32.mrb[18].mxu0 }
 0x71e   :  { %v3625_v10 = vadd.f32 %v3624_v49, %v3545_v33  ;;  %v14725_v22 = vpop.f32.mrb[19].mxu0 }
 0x721   :  { %v3701_v24 = vpop.f32.mrb[42].mxu1 }
 0x722   :  { %v3702_v50 = vadd.f32 %v3701_v24, %v3625_v10  ;;  %v14736_v53 = vpop.f32.mrb[43].mxu1 }
 0x725   :  { %v3784_v54 = vpop.f32.mrb[20].mxu0 }
 0x726   :  { %v3785_v55 = vadd.f32 %v3784_v54, %v3702_v50  ;;  %v14747_v52 = vpop.f32.mrb[21].mxu0 }
 0x729   :  { %v3859_v56 = vpop.f32.mrb[44].mxu1 }
 0x72a   :  { %v3860_v58 = vadd.f32 %v3859_v56, %v3785_v55  ;;  %v14758_v61 = vpop.f32.mrb[45].mxu1 }
 0x72c   :  { %v3863_v62 = vadd.f32 %v17779_v20, %v3860_v58 }
 0x72e   :  { %v3864_v0 = vmul.f32 0.5, %v3863_v62 }
 0x730   :  { %v3865_v3 = vsel %vm17512_vm5, %v3863_v62, %v3864_v0 }
 0x731   :  { %17074 = vtanh.f32 %v3865_v3 }
 0x73b   :  { %v17075_v5 = vpop.eup %17074 }
 0x73c   :  { %v3867_v6 = vadd.f32 1.0, %v17075_v5 }
 0x73e   :  { %v3868_v11 = vmul.f32 0.5, %v3867_v6 }
 0x740   :  { %v3869_v15 = vsel %vm17512_vm5, %v17075_v5, %v3868_v11 }
 0x741   :  { %3872 = vrot.lane.b32.xlu0 %v3869_v15, %s17158_s3  ;;  %v3870_v24 = vmul.f32 %v3869_v15, %v17795_v60 }
 0x755   :  { %v4368_v28 = vpop.f32.mrb[22].mxu0 }
 0x756   :  { %v4372_v25 = vadd.f32 %v17510_v59, %v4368_v28  ;;  %v14824_v43 = vpop.f32.mrb[23].mxu0 }
 0x758   :  { %v4373_v32 = vmul.f32 0.5, %v4372_v25 }
 0x75a   :  { %v4374_v35 = vsel %vm17512_vm5, %v4372_v25, %v4373_v32 }
 0x75b   :  { %17076 = vtanh.f32 %v4374_v35 }
 0x765   :  { %v17077_v39 = vpop.eup %17076 }
 0x766   :  { %v4376_v44 = vadd.f32 1.0, %v17077_v39 }
 0x768   :  { %v4377_v33 = vmul.f32 0.5, %v4376_v44 }
 0x76a   :  { %v4378_v48 = vsel %vm17512_vm5, %v17077_v39, %v4377_v33 }
 0x76b   :  { %4381 = vrot.lane.b32.xlu1 %v4378_v48, %s17158_s3  ;;  %v4379_v55 = vmul.f32 %v4378_v48, %v17800_v1 }
 0x7b3   :  { %v3873_v49 = vpop.permute.xlu0 %3872 }
 0x7b4   :  { %v3875_v10 = vmul.f32 %v3873_v49, %v3869_v15 }
 0x7b6   :  { %3877 = vrot.lane.b32.xlu0 %v3875_v10, %s17159_s26 }
 0x7dd   :  { %v4382_v22 = vpop.permute.xlu1 %4381 }
 0x7de   :  { %v4384_v59 = vmul.f32 %v4382_v22, %v4378_v48 }
 0x7e0   :  { %4386 = vrot.lane.b32.xlu1 %v4384_v59, %s17159_s26 }
 0x828   :  { %v3878_v50 = vpop.permute.xlu0 %3877 }
 0x829   :  { %v17945_v53 = vadd.f32 %v3878_v50, %v3870_v24 }
 0x82b   :  { %17078 = vtanh.f32 %v17945_v53 }
 0x835   :  { %v17079_v54 = vpop.eup %17078 }
 0x836   :  { %3883 = vrot.lane.b32.xlu0 %v17079_v54, %s17158_s3 }
 0x852   :  { %v4387_v52 = vpop.permute.xlu1 %4386 }
 0x853   :  { %v17950_v56 = vadd.f32 %v4387_v52, %v4379_v55 }
 0x855   :  { %17080 = vtanh.f32 %v17950_v56 }
 0x85f   :  { %v17081_v58 = vpop.eup %17080 }
 0x860   :  { %4392 = vrot.lane.b32.xlu1 %v17081_v58, %s17158_s3 }
 0x8a8   :  { %v3884_v61 = vpop.permute.xlu0 %3883 }
 0x8a9   :  { %v3886_v60 = vmul.f32 %v3884_v61, %v3869_v15 }
 0x8ab   :  { %4397 = vrot.lane.b32.xlu0 %v3886_v60, %s17159_s26 }
 0x8d2   :  { %v4393_v62 = vpop.permute.xlu1 %4392 }
 0x8d3   :  { %v4395_v0 = vmul.f32 %v4393_v62, %v4378_v48 }
 0x8d5   :  { %4887 = vrot.lane.b32.xlu1 %v4395_v0, %s17159_s26 }
 0x91d   :  { %v4398_v3 = vpop.permute.xlu0 %4397 }
 0x91e   :  { %v4399_v5 = vsel %vm856_vm6, %v4398_v3, 0 }
 0x91f   :  { %v4470_v1 = vand.u32 4294901760, %v4399_v5 }
 0x921   :  { %v4471_v6 = vsub.f32 %v4399_v5, %v4470_v1 }
 0x923   :  { %v4472_v11 = vand.u32 4294901760, %v4471_v6 }
 0x925   :  { %v4473_v28 = vsub.f32 %v4471_v6, %v4472_v11 }
 0x927   :  { %v4474_v25 = vand.u32 4294901760, %v4473_v28 }
 0x929   :  { %14834 = vmatmul.mubr.f32.vlgmr.msra.gmra.mrb[46].mxu1 %v4474_v25 }
 0x92a   :  { %16273 = vmatpush3.bf16.msra.mxu1 %v17575_v12  ;;  %14844 = vmatprep.mubr.msk.f32.mxu1 %vm17156_vm2, %v17157_v46 }
 0x92b   :  { %16274 = vmatprep.subr.bf16.mxu1 %v17155_v8 }
 0x92e   :  { %16276 = vmatpush3.bf16.msra.mxu1 %v17581_v16 }
 0x92f   :  { %16277 = vmatprep.subr.bf16.mxu1 %v17155_v8 }
 0x931   :  { %14845 = vmatmul.mubr.f32.vlgmr.msra.gmra.mrb[48].mxu1 %v4470_v1 }
 0x932   :  { %16279 = vmatpush3.bf16.msra.mxu1 %v17589_v17  ;;  %14855 = vmatprep.mubr.msk.f32.mxu1 %vm17156_vm2, %v17157_v46 }
 0x933   :  { %16280 = vmatprep.subr.bf16.mxu1 %v17155_v8 }
 0x936   :  { %16282 = vmatpush3.bf16.msra.mxu1 %v17594_v26 }
 0x937   :  { %16283 = vmatprep.subr.bf16.mxu1 %v17155_v8 }
 0x939   :  { %14856 = vmatmul.mubr.f32.vlgmr.msra.gmra.mrb[50].mxu1 %v4471_v6 }
 0x93a   :  { %16285 = vmatpush3.bf16.msra.mxu1 %v17556_v30  ;;  %14866 = vmatprep.mubr.msk.f32.mxu1 %vm17156_vm2, %v17157_v46 }
 0x93b   :  { %16286 = vmatprep.subr.bf16.mxu1 %v17155_v8 }
 0x93e   :  { %16288 = vmatpush3.bf16.msra.mxu1 %v17561_v38 }
 0x93f   :  { %16289 = vmatprep.subr.bf16.mxu1 %v17155_v8 }
 0x941   :  { %14867 = vmatmul.mubr.f32.vlgmr.msra.gmra.mrb[52].mxu1 %v4472_v11 }
 0x942   :  { %16291 = vmatpush3.bf16.msra.mxu1 %v17609_v36  ;;  %14877 = vmatprep.mubr.msk.f32.mxu1 %vm17156_vm2, %v17157_v46 }
 0x943   :  { %16292 = vmatprep.subr.bf16.mxu1 %v17155_v8 }
 0x946   :  { %16294 = vmatpush3.bf16.msra.mxu1 %v17617_v45 }
 0x947   :  { %v4888_v15 = vpop.permute.xlu1 %4887  ;;  %16295 = vmatprep.subr.bf16.mxu1 %v17155_v8 }
 0x948   :  { %v4889_v43 = vsel %vm856_vm6, %v4888_v15, 0 }
 0x949   :  { %v17982_v32 = vand.u32 4294901760, %v4889_v43  ;;  %14878 = vmatmul.mubr.f32.vlgmr.msra.gmra.mrb[54].mxu1 %v4470_v1 }
 0x94a   :  { %16297 = vmatpush3.bf16.msra.mxu1 %v17556_v30  ;;  %14888 = vmatprep.mubr.msk.f32.mxu1 %vm17156_vm2, %v17157_v46 }
 0x94b   :  { %v4961_v35 = vsub.f32 %v4889_v43, %v17982_v32  ;;  %16298 = vmatprep.subr.bf16.mxu1 %v17155_v8 }
 0x94d   :  { %v17989_v39 = vand.u32 4294901760, %v4961_v35 }
 0x94e   :  { %16300 = vmatpush3.bf16.msra.mxu1 %v17561_v38 }
 0x94f   :  { %16307 = vmatprep.subr.bf16.mxu1 %v17155_v8  ;;  %v4963_v44 = vsub.f32 %v4961_v35, %v17989_v39 }
 0x951   :  { %14889 = vmatmul.mubr.f32.vlgmr.msra.gmra.mrb[56].mxu1 %v4470_v1  ;;  %v4964_v33 = vand.u32 4294901760, %v4963_v44 }
 0x952   :  { %16309 = vmatpush3.bf16.msra.mxu1 %v17649_v31  ;;  %14910 = vmatprep.mubr.msk.f32.mxu1 %vm17156_vm2, %v17157_v46 }
 0x953   :  { %14900 = vmatmul.mubr.f32.vlgmr.msra.gmra.mrb[24].mxu0 %v4964_v33  ;;  %16310 = vmatprep.subr.bf16.mxu1 %v17155_v8 }
 0x954   :  { %16315 = vmatpush3.bf16.msra.mxu0 %v17682_v27  ;;  %14921 = vmatprep.mubr.msk.f32.mxu0 %vm17156_vm2, %v17157_v46 }
 0x955   :  { %16316 = vmatprep.subr.bf16.mxu0 %v17155_v8 }
 0x956   :  { %16312 = vmatpush3.bf16.msra.mxu1 %v17654_v40 }
 0x957   :  { %16319 = vmatprep.subr.bf16.mxu1 %v17155_v8 }
 0x958   :  { %16318 = vmatpush3.bf16.msra.mxu0 %v17690_v29 }
 0x959   :  { %14911 = vmatmul.mubr.f32.vlgmr.msra.gmra.mrb[58].mxu1 %v17982_v32  ;;  %16325 = vmatprep.subr.bf16.mxu0 %v17155_v8 }
 0x95a   :  { %16321 = vmatpush3.bf16.msra.mxu1 %v17558_v34  ;;  %14932 = vmatprep.mubr.msk.f32.mxu1 %vm17156_vm2, %v17157_v46 }
 0x95b   :  { %14922 = vmatmul.mubr.f32.vlgmr.msra.gmra.mrb[26].mxu0 %v4961_v35  ;;  %16322 = vmatprep.subr.bf16.mxu1 %v17155_v8 }
 0x95c   :  { %16327 = vmatpush3.bf16.msra.mxu0 %v17704_v41  ;;  %14943 = vmatprep.mubr.msk.f32.mxu0 %vm17156_vm2, %v17157_v46 }
 0x95d   :  { %16328 = vmatprep.subr.bf16.mxu0 %v17155_v8 }
 0x95e   :  { %16324 = vmatpush3.bf16.msra.mxu1 %v17578_v14 }
 0x95f   :  { %16331 = vmatprep.subr.bf16.mxu1 %v17155_v8 }
 0x960   :  { %16330 = vmatpush3.bf16.msra.mxu0 %v17715_v42 }
 0x961   :  { %14933 = vmatmul.mubr.f32.vlgmr.msra.gmra.mrb[60].mxu1 %v17989_v39  ;;  %16337 = vmatprep.subr.bf16.mxu0 %v17155_v8 }
 0x962   :  { %16333 = vmatpush3.bf16.msra.mxu1 %v17558_v34  ;;  %14954 = vmatprep.mubr.msk.f32.mxu1 %vm17156_vm2, %v17157_v46 }
 0x963   :  { %14944 = vmatmul.mubr.f32.vlgmr.msra.gmra.mrb[28].mxu0 %v17982_v32  ;;  %16334 = vmatprep.subr.bf16.mxu1 %v17155_v8 }
 0x964   :  { %16339 = vmatpush3.bf16.msra.mxu0 %v17369_v18  ;;  %14965 = vmatprep.mubr.msk.f32.mxu0 %vm17156_vm2, %v17157_v46 }
 0x965   :  { %16340 = vmatprep.subr.bf16.mxu0 %v17155_v8 }
 0x966   :  { %16336 = vmatpush3.bf16.msra.mxu1 %v17578_v14 }
 0x967   :  { %16373 = vmatprep.subr.bf16.mxu1 %v17155_v8 }
 0x968   :  { %16342 = vmatpush3.bf16.msra.mxu0 %v17384_v37 }
 0x969   :  { %14955 = vmatmul.mubr.f32.vlgmr.msra.gmra.mrb[62].mxu1 %v17982_v32  ;;  %16343 = vmatprep.subr.bf16.mxu0 %v17155_v8 }
 0x96a   :  { %16375 = vmatpush3.bf16.msra.mxu1 %v17556_v30  ;;  %15031 = vmatprep.mubr.msk.f32.mxu1 %vm17156_vm2, %v17157_v46 }
 0x96b   :  { %14966 = vmatmul.mubr.f32.vlgmr.msra.gmra.mrb[30].mxu0 %v4964_v33  ;;  %16376 = vmatprep.subr.bf16.mxu1 %v17155_v8 }
 0x96c   :  { %16345 = vmatpush3.bf16.msra.mxu0 %v17401_v47  ;;  %14976 = vmatprep.mubr.msk.f32.mxu0 %vm17156_vm2, %v17157_v46 }
 0x96d   :  { %16346 = vmatprep.subr.bf16.mxu0 %v17155_v8 }
 0x96e   :  { %16378 = vmatpush3.bf16.msra.mxu1 %v17561_v38 }
 0x96f   :  { %16379 = vmatprep.subr.bf16.mxu1 %v17155_v8 }
 0x970   :  { %16348 = vmatpush3.bf16.msra.mxu0 %v17409_v51 }
 0x971   :  { %16349 = vmatprep.subr.bf16.mxu0 %v17155_v8 }
 0x973   :  { %14977 = vmatmul.mubr.f32.vlgmr.msra.gmra.mrb[30].mxu0 %v17982_v32 }
 0x974   :  { %16351 = vmatpush3.bf16.msra.mxu0 %v17423_v19  ;;  %14987 = vmatprep.mubr.msk.f32.mxu0 %vm17156_vm2, %v17157_v46 }
 0x975   :  { %16352 = vmatprep.subr.bf16.mxu0 %v17155_v8 }
 0x978   :  { %16354 = vmatpush3.bf16.msra.mxu0 %v17434_v21 }
 0x979   :  { %16355 = vmatprep.subr.bf16.mxu0 %v17155_v8 }
 0x97b   :  { %14988 = vmatmul.mubr.f32.vlgmr.msra.gmra.mrb[30].mxu0 %v4961_v35 }
 0x97c   :  { %16357 = vmatpush3.bf16.msra.mxu0 %v17369_v18  ;;  %14998 = vmatprep.mubr.msk.f32.mxu0 %vm17156_vm2, %v17157_v46 }
 0x97d   :  { %16358 = vmatprep.subr.bf16.mxu0 %v17155_v8 }
 0x980   :  { %16360 = vmatpush3.bf16.msra.mxu0 %v17384_v37 }
 0x981   :  { %16361 = vmatprep.subr.bf16.mxu0 %v17155_v8 }
 0x983   :  { %14999 = vmatmul.mubr.f32.vlgmr.msra.gmra.mrb[30].mxu0 %v17989_v39 }
 0x984   :  { %16363 = vmatpush3.bf16.msra.mxu0 %v17462_v23  ;;  %15009 = vmatprep.mubr.msk.f32.mxu0 %vm17156_vm2, %v17157_v46 }
 0x985   :  { %16364 = vmatprep.subr.bf16.mxu0 %v17155_v8 }
 0x988   :  { %16366 = vmatpush3.bf16.msra.mxu0 %v17473_v9 }
 0x989   :  { %16367 = vmatprep.subr.bf16.mxu0 %v17155_v8 }
 0x98b   :  { %15010 = vmatmul.mubr.f32.vlgmr.msra.gmra.mrb[30].mxu0 %v17982_v32 }
 0x98c   :  { %16369 = vmatpush3.bf16.msra.mxu0 %v17369_v18  ;;  %15020 = vmatprep.mubr.msk.f32.mxu0 %vm17156_vm2, %v17157_v46 }
 0x98d   :  { %16370 = vmatprep.subr.bf16.mxu0 %v17155_v8 }
 0x990   :  { %16372 = vmatpush3.bf16.msra.mxu0 %v17384_v37 }
 0x991   :  { %16409 = vmatprep.subr.bf16.mxu0 %v17155_v8 }
 0x993   :  { %15021 = vmatmul.mubr.f32.vlgmr.msra.gmra.mrb[30].mxu0 %v17982_v32 }
 0x994   :  { %16411 = vmatpush3.bf16.msra.mxu0 %v17558_v34  ;;  %15097 = vmatprep.mubr.msk.f32.mxu0 %vm17156_vm2, %v17157_v46 }
 0x995   :  { %16412 = vmatprep.subr.bf16.mxu0 %v17155_v8 }
 0x998   :  { %16414 = vmatpush3.bf16.msra.mxu0 %v17578_v14 }
 0x999   :  { %16421 = vmatprep.subr.bf16.mxu0 %v17155_v8 }
 0x9fc   :  { %v4476_v48 = vpop.f32.mrb[46].mxu1 }
 0x9fd   :  { %v14835_v49 = vpop.f32.mrb[47].mxu1 }
 0xa04   :  { %v4567_v10 = vpop.f32.mrb[48].mxu1 }
 0xa05   :  { %v4568_v22 = vadd.f32 %v4567_v10, %v4476_v48  ;;  %v14846_v59 = vpop.f32.mrb[49].mxu1 }
 0xa0c   :  { %v4647_v24 = vpop.f32.mrb[50].mxu1 }
 0xa0d   :  { %v4648_v50 = vadd.f32 %v4647_v24, %v4568_v22  ;;  %v14857_v54 = vpop.f32.mrb[51].mxu1 }
 0xa14   :  { %v4724_v55 = vpop.f32.mrb[52].mxu1 }
 0xa15   :  { %v4725_v52 = vadd.f32 %v4724_v55, %v4648_v50  ;;  %v14868_v58 = vpop.f32.mrb[53].mxu1 }
 0xa1c   :  { %v4807_v61 = vpop.f32.mrb[54].mxu1 }
 0xa1d   :  { %v4808_v60 = vadd.f32 %v4807_v61, %v4725_v52  ;;  %v14879_v62 = vpop.f32.mrb[55].mxu1 }
 0xa24   :  { %v4882_v0 = vpop.f32.mrb[56].mxu1 }
 0xa25   :  { %v4883_v3 = vadd.f32 %v4882_v0, %v4808_v60  ;;  %v14890_v5 = vpop.f32.mrb[57].mxu1 }
 0xa26   :  { %v4966_v1 = vpop.f32.mrb[24].mxu0 }
 0xa27   :  { %v4967_v6 = vadd.f32 %v4966_v1, %v4883_v3  ;;  %v14901_v11 = vpop.f32.mrb[25].mxu0 }
 0xa2c   :  { %v5057_v28 = vpop.f32.mrb[58].mxu1 }
 0xa2d   :  { %v5058_v25 = vadd.f32 %v5057_v28, %v4967_v6  ;;  %v14912_v15 = vpop.f32.mrb[59].mxu1 }
 0xa2e   :  { %v5137_v43 = vpop.f32.mrb[26].mxu0 }
 0xa2f   :  { %v5138_v32 = vadd.f32 %v5137_v43, %v5058_v25  ;;  %v14923_v35 = vpop.f32.mrb[27].mxu0 }
 0xa34   :  { %v5214_v39 = vpop.f32.mrb[60].mxu1 }
 0xa35   :  { %v5215_v44 = vadd.f32 %v5214_v39, %v5138_v32  ;;  %v14934_v33 = vpop.f32.mrb[61].mxu1 }
 0xa36   :  { %v5297_v48 = vpop.f32.mrb[28].mxu0 }
 0xa37   :  { %v5298_v49 = vadd.f32 %v5297_v48, %v5215_v44  ;;  %v14945_v10 = vpop.f32.mrb[29].mxu0 }
 0xa3c   :  { %v5372_v22 = vpop.f32.mrb[62].mxu1 }
 0xa3d   :  { %v5373_v59 = vadd.f32 %v5372_v22, %v5298_v49  ;;  %v14956_v24 = vpop.f32.mrb[63].mxu1 }
 0xa3f   :  { %v5376_v50 = vadd.f32 %v17779_v20, %v5373_v59 }
 0xa41   :  { %v5377_v54 = vmul.f32 0.5, %v5376_v50 }
 0xa43   :  { %v5378_v55 = vsel %vm17512_vm5, %v5376_v50, %v5377_v54 }
 0xa44   :  { %17082 = vtanh.f32 %v5378_v55 }
 0xa4e   :  { %v17083_v52 = vpop.eup %17082 }
 0xa4f   :  { %v5380_v58 = vadd.f32 1.0, %v17083_v52 }
 0xa51   :  { %v5381_v61 = vmul.f32 0.5, %v5380_v58 }
 0xa53   :  { %v5382_v60 = vsel %vm17512_vm5, %v17083_v52, %v5381_v61 }
 0xa54   :  { %5385 = vrot.lane.b32.xlu0 %v5382_v60, %s17158_s3  ;;  %v5383_v32 = vmul.f32 %v5382_v60, %v17945_v53 }
 0xa66   :  { %v5881_v62 = vpop.f32.mrb[30].mxu0 }
 0xa67   :  { %v5885_v0 = vadd.f32 %v17508_v57, %v5881_v62  ;;  %v15022_v3 = vpop.f32.mrb[31].mxu0 }
 0xa69   :  { %v5886_v5 = vmul.f32 0.5, %v5885_v0 }
 0xa6b   :  { %v5887_v20 = vsel %vm17512_vm5, %v5885_v0, %v5886_v5 }
 0xa6c   :  { %17084 = vtanh.f32 %v5887_v20 }
 0xa76   :  { %v17085_v1 = vpop.eup %17084 }
 0xa77   :  { %v5889_v6 = vadd.f32 1.0, %v17085_v1 }
 0xa79   :  { %v5890_v11 = vmul.f32 0.5, %v5889_v6 }
 0xa7b   :  { %v5891_v28 = vsel %vm17512_vm5, %v17085_v1, %v5890_v11 }
 0xa7c   :  { %5894 = vrot.lane.b32.xlu1 %v5891_v28, %s17158_s3  ;;  %v5892_v33 = vmul.f32 %v5891_v28, %v17950_v56 }
 0xac6   :  { %v5386_v25 = vpop.permute.xlu0 %5385 }
 0xac7   :  { %v5388_v15 = vmul.f32 %v5386_v25, %v5382_v60 }
 0xac9   :  { %5390 = vrot.lane.b32.xlu0 %v5388_v15, %s17159_s26 }
 0xaee   :  { %v5895_v43 = vpop.permute.xlu1 %5894 }
 0xaef   :  { %v5897_v57 = vmul.f32 %v5895_v43, %v5891_v28 }
 0xaf1   :  { %5899 = vrot.lane.b32.xlu1 %v5897_v57, %s17159_s26 }
 0xb3b   :  { %v5391_v35 = vpop.permute.xlu0 %5390 }
 0xb3c   :  { %v18095_v39 = vadd.f32 %v5391_v35, %v5383_v32 }
 0xb3e   :  { %17086 = vtanh.f32 %v18095_v39 }
 0xb48   :  { %v17087_v44 = vpop.eup %17086 }
 0xb49   :  { %5396 = vrot.lane.b32.xlu0 %v17087_v44, %s17158_s3 }
 0xb63   :  { %v5900_v48 = vpop.permute.xlu1 %5899 }
 0xb64   :  { %v18100_v49 = vadd.f32 %v5900_v48, %v5892_v33 }
 0xb66   :  { %17088 = vtanh.f32 %v18100_v49 }
 0xb70   :  { %v17089_v10 = vpop.eup %17088 }
 0xb71   :  { %5905 = vrot.lane.b32.xlu1 %v17089_v10, %s17158_s3 }
 0xbbb   :  { %v5397_v22 = vpop.permute.xlu0 %5396 }
 0xbbc   :  { %v5399_v53 = vmul.f32 %v5397_v22, %v5382_v60 }
 0xbbe   :  { %5910 = vrot.lane.b32.xlu0 %v5399_v53, %s17159_s26 }
 0xbe3   :  { %v5906_v59 = vpop.permute.xlu1 %5905 }
 0xbe4   :  { %v5908_v24 = vmul.f32 %v5906_v59, %v5891_v28 }
 0xbe6   :  { %6400 = vrot.lane.b32.xlu1 %v5908_v24, %s17159_s26 }
 0xc30   :  { %v5911_v50 = vpop.permute.xlu0 %5910 }
 0xc31   :  { %v5912_v54 = vsel %vm856_vm6, %v5911_v50, 0 }
 0xc32   :  { %v5983_v56 = vand.u32 4294901760, %v5912_v54 }
 0xc34   :  { %v5984_v55 = vsub.f32 %v5912_v54, %v5983_v56 }
 0xc36   :  { %v5985_v52 = vand.u32 4294901760, %v5984_v55 }
 0xc38   :  { %v5986_v58 = vsub.f32 %v5984_v55, %v5985_v52 }
 0xc3a   :  { %v5987_v61 = vand.u32 4294901760, %v5986_v58 }
 0xc3c   :  { %15032 = vmatmul.mubr.f32.vlgmr.msra.gmra.mrb[64].mxu1 %v5987_v61 }
 0xc3d   :  { %16381 = vmatpush3.bf16.msra.mxu1 %v17575_v12  ;;  %15042 = vmatprep.mubr.msk.f32.mxu1 %vm17156_vm2, %v17157_v46 }
 0xc3e   :  { %16382 = vmatprep.subr.bf16.mxu1 %v17155_v8 }
 0xc41   :  { %16384 = vmatpush3.bf16.msra.mxu1 %v17581_v16 }
 0xc42   :  { %16385 = vmatprep.subr.bf16.mxu1 %v17155_v8 }
 0xc44   :  { %15043 = vmatmul.mubr.f32.vlgmr.msra.gmra.mrb[66].mxu1 %v5983_v56 }
 0xc45   :  { %16387 = vmatpush3.bf16.msra.mxu1 %v17589_v17  ;;  %15053 = vmatprep.mubr.msk.f32.mxu1 %vm17156_vm2, %v17157_v46 }
 0xc46   :  { %16388 = vmatprep.subr.bf16.mxu1 %v17155_v8 }
 0xc49   :  { %16390 = vmatpush3.bf16.msra.mxu1 %v17594_v26 }
 0xc4a   :  { %16391 = vmatprep.subr.bf16.mxu1 %v17155_v8 }
 0xc4c   :  { %15054 = vmatmul.mubr.f32.vlgmr.msra.gmra.mrb[68].mxu1 %v5984_v55 }
 0xc4d   :  { %16393 = vmatpush3.bf16.msra.mxu1 %v17556_v30  ;;  %15064 = vmatprep.mubr.msk.f32.mxu1 %vm17156_vm2, %v17157_v46 }
 0xc4e   :  { %16394 = vmatprep.subr.bf16.mxu1 %v17155_v8 }
 0xc51   :  { %16396 = vmatpush3.bf16.msra.mxu1 %v17561_v38 }
 0xc52   :  { %16397 = vmatprep.subr.bf16.mxu1 %v17155_v8 }
 0xc54   :  { %15065 = vmatmul.mubr.f32.vlgmr.msra.gmra.mrb[70].mxu1 %v5985_v52 }
 0xc55   :  { %16399 = vmatpush3.bf16.msra.mxu1 %v17609_v36  ;;  %15075 = vmatprep.mubr.msk.f32.mxu1 %vm17156_vm2, %v17157_v46 }
 0xc56   :  { %16400 = vmatprep.subr.bf16.mxu1 %v17155_v8 }
 0xc58   :  { %v6401_v60 = vpop.permute.xlu1 %6400 }
 0xc59   :  { %16402 = vmatpush3.bf16.msra.mxu1 %v17617_v45  ;;  %v6402_v62 = vsel %vm856_vm6, %v6401_v60, 0 }
 0xc5a   :  { %v18131_v0 = vand.u32 4294901760, %v6402_v62  ;;  %16403 = vmatprep.subr.bf16.mxu1 %v17155_v8 }
 0xc5c   :  { %v18135_v3 = vsub.f32 %v6402_v62, %v18131_v0  ;;  %15076 = vmatmul.mubr.f32.vlgmr.msra.gmra.mrb[72].mxu1 %v5983_v56 }
 0xc5d   :  { %16405 = vmatpush3.bf16.msra.mxu1 %v17556_v30  ;;  %15086 = vmatprep.mubr.msk.f32.mxu1 %vm17156_vm2, %v17157_v46 }
 0xc5e   :  { %v18141_v5 = vand.u32 4294901760, %v18135_v3  ;;  %16406 = vmatprep.subr.bf16.mxu1 %v17155_v8 }
 0xc60   :  { %v6476_v20 = vsub.f32 %v18135_v3, %v18141_v5 }
 0xc61   :  { %16408 = vmatpush3.bf16.msra.mxu1 %v17561_v38 }
 0xc62   :  { %16415 = vmatprep.subr.bf16.mxu1 %v17155_v8  ;;  %v6477_v1 = vand.u32 4294901760, %v6476_v20 }
 0xc64   :  { %15087 = vmatmul.mubr.f32.vlgmr.msra.gmra.mrb[74].mxu1 %v5983_v56  ;;  %15098 = vmatmul.mubr.f32.vlgmr.msra.gmra.mrb[32].mxu0 %v6477_v1 }
 0xc65   :  { %16417 = vmatpush3.bf16.msra.mxu1 %v17649_v31  ;;  %16423 = vmatpush3.bf16.msra.mxu0 %v17682_v27 }
 0xc66   :  { %16418 = vmatprep.subr.bf16.mxu1 %v17155_v8  ;;  %16424 = vmatprep.subr.bf16.mxu0 %v17155_v8 }
 0xc67   :  { %15108 = vmatprep.mubr.msk.f32.mxu1 %vm17156_vm2, %v17157_v46  ;;  %15119 = vmatprep.mubr.msk.f32.mxu0 %vm17156_vm2, %v17157_v46 }
 0xc69   :  { %16420 = vmatpush3.bf16.msra.mxu1 %v17654_v40  ;;  %16426 = vmatpush3.bf16.msra.mxu0 %v17690_v29 }
 0xc6a   :  { %16427 = vmatprep.subr.bf16.mxu1 %v17155_v8  ;;  %16433 = vmatprep.subr.bf16.mxu0 %v17155_v8 }
 0xc6c   :  { %15109 = vmatmul.mubr.f32.vlgmr.msra.gmra.mrb[76].mxu1 %v18131_v0  ;;  %15120 = vmatmul.mubr.f32.vlgmr.msra.gmra.mrb[34].mxu0 %v18135_v3 }
 0xc6d   :  { %16429 = vmatpush3.bf16.msra.mxu1 %v17558_v34  ;;  %16435 = vmatpush3.bf16.msra.mxu0 %v17704_v41 }
 0xc6e   :  { %16430 = vmatprep.subr.bf16.mxu1 %v17155_v8  ;;  %16436 = vmatprep.subr.bf16.mxu0 %v17155_v8 }
 0xc6f   :  { %15130 = vmatprep.mubr.msk.f32.mxu1 %vm17156_vm2, %v17157_v46  ;;  %15141 = vmatprep.mubr.msk.f32.mxu0 %vm17156_vm2, %v17157_v46 }
 0xc71   :  { %16432 = vmatpush3.bf16.msra.mxu1 %v17578_v14  ;;  %16438 = vmatpush3.bf16.msra.mxu0 %v17715_v42 }
 0xc72   :  { %16439 = vmatprep.subr.bf16.mxu1 %v17155_v8  ;;  %16445 = vmatprep.subr.bf16.mxu0 %v17155_v8 }
 0xc74   :  { %15131 = vmatmul.mubr.f32.vlgmr.msra.gmra.mrb[78].mxu1 %v18141_v5  ;;  %15142 = vmatmul.mubr.f32.vlgmr.msra.gmra.mrb[36].mxu0 %v18131_v0 }
 0xc75   :  { %16441 = vmatpush3.bf16.msra.mxu1 %v17558_v34  ;;  %16447 = vmatpush3.bf16.msra.mxu0 %v17369_v18 }
 0xc76   :  { %16442 = vmatprep.subr.bf16.mxu1 %v17155_v8  ;;  %16448 = vmatprep.subr.bf16.mxu0 %v17155_v8 }
 0xc77   :  { %15152 = vmatprep.mubr.msk.f32.mxu1 %vm17156_vm2, %v17157_v46  ;;  %15163 = vmatprep.mubr.msk.f32.mxu0 %vm17156_vm2, %v17157_v46 }
 0xc79   :  { %16444 = vmatpush3.bf16.msra.mxu1 %v17578_v14  ;;  %16450 = vmatpush3.bf16.msra.mxu0 %v17384_v37 }
 0xc7a   :  { %16451 = vmatprep.subr.bf16.mxu0 %v17155_v8  ;;  %16481 = vmatprep.subr.bf16.mxu1 %v17155_v8 }
 0xc7c   :  { %15153 = vmatmul.mubr.f32.vlgmr.msra.gmra.mrb[80].mxu1 %v18131_v0  ;;  %15164 = vmatmul.mubr.f32.vlgmr.msra.gmra.mrb[38].mxu0 %v6477_v1 }
 0xc7d   :  { %16453 = vmatpush3.bf16.msra.mxu0 %v17401_v47  ;;  %15174 = vmatprep.mubr.msk.f32.mxu0 %vm17156_vm2, %v17157_v46 }
 0xc7e   :  { %16454 = vmatprep.subr.bf16.mxu0 %v17155_v8  ;;  %16483 = vmatpush3.bf16.msra.mxu1 %v17556_v30 }
 0xc7f   :  { %16484 = vmatprep.subr.bf16.mxu1 %v17155_v8  ;;  %15229 = vmatprep.mubr.msk.f32.mxu1 %vm17156_vm2, %v17157_v46 }
 0xc81   :  { %16456 = vmatpush3.bf16.msra.mxu0 %v17409_v51 }
 0xc82   :  { %16457 = vmatprep.subr.bf16.mxu0 %v17155_v8  ;;  %16486 = vmatpush3.bf16.msra.mxu1 %v17561_v38 }
 0xc83   :  { %16487 = vmatprep.subr.bf16.mxu1 %v17155_v8 }
 0xc84   :  { %15175 = vmatmul.mubr.f32.vlgmr.msra.gmra.mrb[38].mxu0 %v18131_v0 }
 0xc85   :  { %16459 = vmatpush3.bf16.msra.mxu0 %v17423_v19  ;;  %15185 = vmatprep.mubr.msk.f32.mxu0 %vm17156_vm2, %v17157_v46 }
 0xc86   :  { %16460 = vmatprep.subr.bf16.mxu0 %v17155_v8 }
 0xc89   :  { %16462 = vmatpush3.bf16.msra.mxu0 %v17434_v21 }
 0xc8a   :  { %16463 = vmatprep.subr.bf16.mxu0 %v17155_v8 }
 0xc8c   :  { %15186 = vmatmul.mubr.f32.vlgmr.msra.gmra.mrb[38].mxu0 %v18135_v3 }
 0xc8d   :  { %16465 = vmatpush3.bf16.msra.mxu0 %v17369_v18  ;;  %15196 = vmatprep.mubr.msk.f32.mxu0 %vm17156_vm2, %v17157_v46 }
 0xc8e   :  { %16466 = vmatprep.subr.bf16.mxu0 %v17155_v8 }
 0xc91   :  { %16468 = vmatpush3.bf16.msra.mxu0 %v17384_v37 }
 0xc92   :  { %16469 = vmatprep.subr.bf16.mxu0 %v17155_v8 }
 0xc94   :  { %15197 = vmatmul.mubr.f32.vlgmr.msra.gmra.mrb[38].mxu0 %v18141_v5 }
 0xc95   :  { %16471 = vmatpush3.bf16.msra.mxu0 %v17462_v23  ;;  %15207 = vmatprep.mubr.msk.f32.mxu0 %vm17156_vm2, %v17157_v46 }
 0xc96   :  { %16472 = vmatprep.subr.bf16.mxu0 %v17155_v8 }
 0xc99   :  { %16474 = vmatpush3.bf16.msra.mxu0 %v17473_v9 }
 0xc9a   :  { %16475 = vmatprep.subr.bf16.mxu0 %v17155_v8 }
 0xc9c   :  { %15208 = vmatmul.mubr.f32.vlgmr.msra.gmra.mrb[38].mxu0 %v18131_v0 }
 0xc9d   :  { %16477 = vmatpush3.bf16.msra.mxu0 %v17369_v18  ;;  %15218 = vmatprep.mubr.msk.f32.mxu0 %vm17156_vm2, %v17157_v46 }
 0xc9e   :  { %16478 = vmatprep.subr.bf16.mxu0 %v17155_v8 }
 0xca1   :  { %16480 = vmatpush3.bf16.msra.mxu0 %v17384_v37 }
 0xca2   :  { %16517 = vmatprep.subr.bf16.mxu0 %v17155_v8 }
 0xca4   :  { %15219 = vmatmul.mubr.f32.vlgmr.msra.gmra.mrb[38].mxu0 %v18131_v0 }
 0xca5   :  { %16519 = vmatpush3.bf16.msra.mxu0 %v17558_v34  ;;  %15295 = vmatprep.mubr.msk.f32.mxu0 %vm17156_vm2, %v17157_v46 }
 0xca6   :  { %16520 = vmatprep.subr.bf16.mxu0 %v17155_v8 }
 0xca9   :  { %16522 = vmatpush3.bf16.msra.mxu0 %v17578_v14 }
 0xcaa   :  { %16529 = vmatprep.subr.bf16.mxu0 %v17155_v8 }
 0xd0f   :  { %v5989_v6 = vpop.f32.mrb[64].mxu1 }
 0xd10   :  { %v15033_v11 = vpop.f32.mrb[65].mxu1 }
 0xd17   :  { %v6080_v28 = vpop.f32.mrb[66].mxu1 }
 0xd18   :  { %v6081_v25 = vadd.f32 %v6080_v28, %v5989_v6  ;;  %v15044_v15 = vpop.f32.mrb[67].mxu1 }
 0xd19   :  { %v18239_v15 = vld [vmem:[%s18849_s6] ss:$0 sm:$0xff] }
 0xd1f   :  { %v6160_v43 = vpop.f32.mrb[68].mxu1 }
 0xd20   :  { %v6161_v57 = vadd.f32 %v6160_v43, %v6081_v25  ;;  %v15055_v32 = vpop.f32.mrb[69].mxu1 }
 0xd27   :  { %v6237_v35 = vpop.f32.mrb[70].mxu1 }
 0xd28   :  { %v6238_v44 = vadd.f32 %v6237_v35, %v6161_v57  ;;  %v15066_v33 = vpop.f32.mrb[71].mxu1 }
 0xd2f   :  { %v6320_v48 = vpop.f32.mrb[72].mxu1 }
 0xd30   :  { %v6321_v10 = vadd.f32 %v6320_v48, %v6238_v44  ;;  %v15077_v22 = vpop.f32.mrb[73].mxu1 }
 0xd37   :  { %v6395_v53 = vpop.f32.mrb[74].mxu1  ;;  %v6479_v59 = vpop.f32.mrb[32].mxu0 }
 0xd38   :  { %v6396_v24 = vadd.f32 %v6395_v53, %v6321_v10  ;;  %v15088_v50 = vpop.f32.mrb[75].mxu1  ;;  %v15099_v54 = vpop.f32.mrb[33].mxu0 }
 0xd3a   :  { %v6480_v56 = vadd.f32 %v6479_v59, %v6396_v24 }
 0xd3f   :  { %v6570_v55 = vpop.f32.mrb[76].mxu1  ;;  %v6650_v52 = vpop.f32.mrb[34].mxu0 }
 0xd40   :  { %v6571_v58 = vadd.f32 %v6570_v55, %v6480_v56  ;;  %v15110_v61 = vpop.f32.mrb[77].mxu1  ;;  %v15121_v60 = vpop.f32.mrb[35].mxu0 }
 0xd42   :  { %v6651_v62 = vadd.f32 %v6650_v52, %v6571_v58 }
 0xd47   :  { %v6727_v0 = vpop.f32.mrb[78].mxu1  ;;  %v6810_v3 = vpop.f32.mrb[36].mxu0 }
 0xd48   :  { %v6728_v5 = vadd.f32 %v6727_v0, %v6651_v62  ;;  %v15132_v20 = vpop.f32.mrb[79].mxu1  ;;  %v15143_v1 = vpop.f32.mrb[37].mxu0 }
 0xd4a   :  { %v6811_v6 = vadd.f32 %v6810_v3, %v6728_v5 }
 0xd4f   :  { %v6885_v11 = vpop.f32.mrb[80].mxu1 }
 0xd50   :  { %v6886_v28 = vadd.f32 %v6885_v11, %v6811_v6  ;;  %v15154_v25 = vpop.f32.mrb[81].mxu1 }
 0xd52   :  { %v6889_v43 = vadd.f32 %v18239_v15, %v6886_v28 }
 0xd54   :  { %v6890_v57 = vmul.f32 0.5, %v6889_v43 }
 0xd56   :  { %v6891_v32 = vsel %vm17512_vm5, %v6889_v43, %v6890_v57 }
 0xd57   :  { %17090 = vtanh.f32 %v6891_v32 }
 0xd61   :  { %v17091_v35 = vpop.eup %17090 }
 0xd62   :  { %v6893_v44 = vadd.f32 1.0, %v17091_v35 }
 0xd64   :  { %v6894_v33 = vmul.f32 0.5, %v6893_v44 }
 0xd66   :  { %v6895_v48 = vsel %vm17512_vm5, %v17091_v35, %v6894_v33 }
 0xd67   :  { %6898 = vrot.lane.b32.xlu0 %v6895_v48, %s17158_s3  ;;  %v6896_v60 = vmul.f32 %v6895_v48, %v18095_v39 }
 0xd77   :  { %v7394_v10 = vpop.f32.mrb[38].mxu0 }
 0xd78   :  { %v7398_v22 = vadd.f32 %v17518_v4, %v7394_v10  ;;  %v15220_v53 = vpop.f32.mrb[39].mxu0 }
 0xd7a   :  { %v7399_v59 = vmul.f32 0.5, %v7398_v22 }
 0xd7c   :  { %v7400_v24 = vsel %vm17512_vm5, %v7398_v22, %v7399_v59 }
 0xd7d   :  { %17092 = vtanh.f32 %v7400_v24 }
 0xd87   :  { %v17093_v50 = vpop.eup %17092 }
 0xd88   :  { %v7402_v54 = vadd.f32 1.0, %v17093_v50 }
 0xd8a   :  { %v7403_v56 = vmul.f32 0.5, %v7402_v54 }
 0xd8c   :  { %v7404_v55 = vsel %vm17512_vm5, %v17093_v50, %v7403_v56 }
 0xd8d   :  { %7407 = vrot.lane.b32.xlu1 %v7404_v55, %s17158_s3  ;;  %v7405_v5 = vmul.f32 %v7404_v55, %v18100_v49 }
 0xdd9   :  { %v6899_v52 = vpop.permute.xlu0 %6898 }
 0xdda   :  { %v6901_v58 = vmul.f32 %v6899_v52, %v6895_v48 }
 0xddc   :  { %6903 = vrot.lane.b32.xlu0 %v6901_v58, %s17159_s26 }
 0xdff   :  { %v7408_v61 = vpop.permute.xlu1 %7407 }
 0xe00   :  { %v7410_v4 = vmul.f32 %v7408_v61, %v7404_v55 }
 0xe02   :  { %7412 = vrot.lane.b32.xlu1 %v7410_v4, %s17159_s26 }
 0xe4e   :  { %v6904_v62 = vpop.permute.xlu0 %6903 }
 0xe4f   :  { %v18256_v0 = vadd.f32 %v6904_v62, %v6896_v60 }
 0xe51   :  { %17094 = vtanh.f32 %v18256_v0 }
 0xe5b   :  { %v17095_v3 = vpop.eup %17094 }
 0xe5c   :  { %6909 = vrot.lane.b32.xlu0 %v17095_v3, %s17158_s3 }
 0xe74   :  { %v7413_v20 = vpop.permute.xlu1 %7412 }
 0xe75   :  { %v18261_v1 = vadd.f32 %v7413_v20, %v7405_v5 }
 0xe77   :  { %17096 = vtanh.f32 %v18261_v1 }
 0xe81   :  { %v17097_v6 = vpop.eup %17096 }
 0xe82   :  { %7418 = vrot.lane.b32.xlu1 %v17097_v6, %s17158_s3 }
 0xece   :  { %v6910_v11 = vpop.permute.xlu0 %6909 }
 0xecf   :  { %v6912_v39 = vmul.f32 %v6910_v11, %v6895_v48 }
 0xed1   :  { %7423 = vrot.lane.b32.xlu0 %v6912_v39, %s17159_s26 }
 0xef4   :  { %v7419_v28 = vpop.permute.xlu1 %7418 }
 0xef5   :  { %v7421_v25 = vmul.f32 %v7419_v28, %v7404_v55 }
 0xef7   :  { %7913 = vrot.lane.b32.xlu1 %v7421_v25, %s17159_s26 }
 0xf43   :  { %v7424_v43 = vpop.permute.xlu0 %7423 }
 0xf44   :  { %v7425_v57 = vsel %vm856_vm6, %v7424_v43, 0 }
 0xf45   :  { %v7496_v49 = vand.u32 4294901760, %v7425_v57 }
 0xf47   :  { %v7497_v32 = vsub.f32 %v7425_v57, %v7496_v49 }
 0xf49   :  { %v7498_v35 = vand.u32 4294901760, %v7497_v32 }
 0xf4b   :  { %v7499_v44 = vsub.f32 %v7497_v32, %v7498_v35 }
 0xf4d   :  { %v7500_v33 = vand.u32 4294901760, %v7499_v44 }
 0xf4f   :  { %15230 = vmatmul.mubr.f32.vlgmr.msra.gmra.mrb[82].mxu1 %v7500_v33 }
 0xf50   :  { %16489 = vmatpush3.bf16.msra.mxu1 %v17575_v12  ;;  %15240 = vmatprep.mubr.msk.f32.mxu1 %vm17156_vm2, %v17157_v46 }
 0xf51   :  { %16490 = vmatprep.subr.bf16.mxu1 %v17155_v8 }
 0xf54   :  { %16492 = vmatpush3.bf16.msra.mxu1 %v17581_v16 }
 0xf55   :  { %16493 = vmatprep.subr.bf16.mxu1 %v17155_v8 }
 0xf57   :  { %15241 = vmatmul.mubr.f32.vlgmr.msra.gmra.mrb[84].mxu1 %v7496_v49 }
 0xf58   :  { %16495 = vmatpush3.bf16.msra.mxu1 %v17589_v17  ;;  %15251 = vmatprep.mubr.msk.f32.mxu1 %vm17156_vm2, %v17157_v46 }
 0xf59   :  { %16496 = vmatprep.subr.bf16.mxu1 %v17155_v8 }
 0xf5c   :  { %16498 = vmatpush3.bf16.msra.mxu1 %v17594_v26 }
 0xf5d   :  { %16499 = vmatprep.subr.bf16.mxu1 %v17155_v8 }
 0xf5f   :  { %15252 = vmatmul.mubr.f32.vlgmr.msra.gmra.mrb[86].mxu1 %v7497_v32 }
 0xf60   :  { %16501 = vmatpush3.bf16.msra.mxu1 %v17556_v30  ;;  %15262 = vmatprep.mubr.msk.f32.mxu1 %vm17156_vm2, %v17157_v46 }
 0xf61   :  { %16502 = vmatprep.subr.bf16.mxu1 %v17155_v8 }
 0xf64   :  { %16504 = vmatpush3.bf16.msra.mxu1 %v17561_v38 }
 0xf65   :  { %16505 = vmatprep.subr.bf16.mxu1 %v17155_v8 }
 0xf67   :  { %15263 = vmatmul.mubr.f32.vlgmr.msra.gmra.mrb[88].mxu1 %v7498_v35 }
 0xf68   :  { %16507 = vmatpush3.bf16.msra.mxu1 %v17609_v36  ;;  %15273 = vmatprep.mubr.msk.f32.mxu1 %vm17156_vm2, %v17157_v46 }
 0xf69   :  { %v7914_v48 = vpop.permute.xlu1 %7913  ;;  %16508 = vmatprep.subr.bf16.mxu1 %v17155_v8 }
 0xf6a   :  { %v7915_v10 = vsel %vm856_vm6, %v7914_v48, 0 }
 0xf6b   :  { %v18291_v22 = vand.u32 4294901760, %v7915_v10 }
 0xf6c   :  { %16510 = vmatpush3.bf16.msra.mxu1 %v17617_v45 }
 0xf6d   :  { %v18295_v53 = vsub.f32 %v7915_v10, %v18291_v22  ;;  %16511 = vmatprep.subr.bf16.mxu1 %v17155_v8 }
 0xf6f   :  { %v18299_v59 = vand.u32 4294901760, %v18295_v53  ;;  %15274 = vmatmul.mubr.f32.vlgmr.msra.gmra.mrb[90].mxu1 %v7496_v49 }
 0xf70   :  { %16513 = vmatpush3.bf16.msra.mxu1 %v17556_v30  ;;  %15284 = vmatprep.mubr.msk.f32.mxu1 %vm17156_vm2, %v17157_v46 }
 0xf71   :  { %16514 = vmatprep.subr.bf16.mxu1 %v17155_v8  ;;  %v7989_v24 = vsub.f32 %v18295_v53, %v18299_v59 }
 0xf73   :  { %v7990_v50 = vand.u32 4294901760, %v7989_v24 }
 0xf74   :  { %16516 = vmatpush3.bf16.msra.mxu1 %v17561_v38 }
 0xf75   :  { %15296 = vmatmul.mubr.f32.vlgmr.msra.gmra.mrb[40].mxu0 %v7990_v50  ;;  %16523 = vmatprep.subr.bf16.mxu1 %v17155_v8 }
 0xf76   :  { %16531 = vmatpush3.bf16.msra.mxu0 %v17682_v27  ;;  %15317 = vmatprep.mubr.msk.f32.mxu0 %vm17156_vm2, %v17157_v46 }
 0xf77   :  { %15285 = vmatmul.mubr.f32.vlgmr.msra.gmra.mrb[92].mxu1 %v7496_v49  ;;  %16532 = vmatprep.subr.bf16.mxu0 %v17155_v8 }
 0xf78   :  { %16525 = vmatpush3.bf16.msra.mxu1 %v17649_v31  ;;  %15306 = vmatprep.mubr.msk.f32.mxu1 %vm17156_vm2, %v17157_v46 }
 0xf79   :  { %16526 = vmatprep.subr.bf16.mxu1 %v17155_v8 }
 0xf7a   :  { %16534 = vmatpush3.bf16.msra.mxu0 %v17690_v29 }
 0xf7b   :  { %16541 = vmatprep.subr.bf16.mxu0 %v17155_v8 }
 0xf7c   :  { %16528 = vmatpush3.bf16.msra.mxu1 %v17654_v40 }
 0xf7d   :  { %15318 = vmatmul.mubr.f32.vlgmr.msra.gmra.mrb[42].mxu0 %v18295_v53  ;;  %16535 = vmatprep.subr.bf16.mxu1 %v17155_v8 }
 0xf7e   :  { %16543 = vmatpush3.bf16.msra.mxu0 %v17704_v41  ;;  %15339 = vmatprep.mubr.msk.f32.mxu0 %vm17156_vm2, %v17157_v46 }
 0xf7f   :  { %15307 = vmatmul.mubr.f32.vlgmr.msra.gmra.mrb[94].mxu1 %v18291_v22  ;;  %16544 = vmatprep.subr.bf16.mxu0 %v17155_v8 }
 0xf80   :  { %16537 = vmatpush3.bf16.msra.mxu1 %v17558_v34  ;;  %15328 = vmatprep.mubr.msk.f32.mxu1 %vm17156_vm2, %v17157_v46 }
 0xf81   :  { %16538 = vmatprep.subr.bf16.mxu1 %v17155_v8 }
 0xf82   :  { %16546 = vmatpush3.bf16.msra.mxu0 %v17715_v42 }
 0xf83   :  { %16553 = vmatprep.subr.bf16.mxu0 %v17155_v8 }
 0xf84   :  { %16540 = vmatpush3.bf16.msra.mxu1 %v17578_v14 }
 0xf85   :  { %15340 = vmatmul.mubr.f32.vlgmr.msra.gmra.mrb[44].mxu0 %v18291_v22  ;;  %16547 = vmatprep.subr.bf16.mxu1 %v17155_v8 }
 0xf86   :  { %16555 = vmatpush3.bf16.msra.mxu0 %v17369_v18  ;;  %15361 = vmatprep.mubr.msk.f32.mxu0 %vm17156_vm2, %v17157_v46 }
 0xf87   :  { %15329 = vmatmul.mubr.f32.vlgmr.msra.gmra.mrb[96].mxu1 %v18299_v59  ;;  %16556 = vmatprep.subr.bf16.mxu0 %v17155_v8 }
 0xf88   :  { %16549 = vmatpush3.bf16.msra.mxu1 %v17558_v34  ;;  %15350 = vmatprep.mubr.msk.f32.mxu1 %vm17156_vm2, %v17157_v46 }
 0xf89   :  { %16550 = vmatprep.subr.bf16.mxu1 %v17155_v8 }
 0xf8a   :  { %16558 = vmatpush3.bf16.msra.mxu0 %v17384_v37 }
 0xf8b   :  { %16559 = vmatprep.subr.bf16.mxu0 %v17155_v8 }
 0xf8c   :  { %16552 = vmatpush3.bf16.msra.mxu1 %v17578_v14 }
 0xf8d   :  { %15362 = vmatmul.mubr.f32.vlgmr.msra.gmra.mrb[46].mxu0 %v7990_v50  ;;  %16589 = vmatprep.subr.bf16.mxu1 %v17155_v8 }
 0xf8e   :  { %16561 = vmatpush3.bf16.msra.mxu0 %v17401_v47  ;;  %15372 = vmatprep.mubr.msk.f32.mxu0 %vm17156_vm2, %v17157_v46 }
 0xf8f   :  { %15351 = vmatmul.mubr.f32.vlgmr.msra.gmra.mrb[98].mxu1 %v18291_v22  ;;  %16562 = vmatprep.subr.bf16.mxu0 %v17155_v8 }
 0xf90   :  { %16591 = vmatpush3.bf16.msra.mxu1 %v17556_v30  ;;  %15427 = vmatprep.mubr.msk.f32.mxu1 %vm17156_vm2, %v17157_v46 }
 0xf91   :  { %16592 = vmatprep.subr.bf16.mxu1 %v17155_v8 }
 0xf92   :  { %16564 = vmatpush3.bf16.msra.mxu0 %v17409_v51 }
 0xf93   :  { %16565 = vmatprep.subr.bf16.mxu0 %v17155_v8 }
 0xf94   :  { %16594 = vmatpush3.bf16.msra.mxu1 %v17561_v38 }
 0xf95   :  { %15373 = vmatmul.mubr.f32.vlgmr.msra.gmra.mrb[46].mxu0 %v18291_v22  ;;  %16595 = vmatprep.subr.bf16.mxu1 %v17155_v8 }
 0xf96   :  { %16567 = vmatpush3.bf16.msra.mxu0 %v17423_v19  ;;  %15383 = vmatprep.mubr.msk.f32.mxu0 %vm17156_vm2, %v17157_v46 }
 0xf97   :  { %16568 = vmatprep.subr.bf16.mxu0 %v17155_v8 }
 0xf9a   :  { %16570 = vmatpush3.bf16.msra.mxu0 %v17434_v21 }
 0xf9b   :  { %16571 = vmatprep.subr.bf16.mxu0 %v17155_v8 }
 0xf9d   :  { %15384 = vmatmul.mubr.f32.vlgmr.msra.gmra.mrb[46].mxu0 %v18295_v53 }
 0xf9e   :  { %16573 = vmatpush3.bf16.msra.mxu0 %v17369_v18  ;;  %15394 = vmatprep.mubr.msk.f32.mxu0 %vm17156_vm2, %v17157_v46 }
 0xf9f   :  { %16574 = vmatprep.subr.bf16.mxu0 %v17155_v8 }
 0xfa2   :  { %16576 = vmatpush3.bf16.msra.mxu0 %v17384_v37 }
 0xfa3   :  { %16577 = vmatprep.subr.bf16.mxu0 %v17155_v8 }
 0xfa5   :  { %15395 = vmatmul.mubr.f32.vlgmr.msra.gmra.mrb[46].mxu0 %v18299_v59 }
 0xfa6   :  { %16579 = vmatpush3.bf16.msra.mxu0 %v17462_v23  ;;  %15405 = vmatprep.mubr.msk.f32.mxu0 %vm17156_vm2, %v17157_v46 }
 0xfa7   :  { %16580 = vmatprep.subr.bf16.mxu0 %v17155_v8 }
 0xfaa   :  { %16582 = vmatpush3.bf16.msra.mxu0 %v17473_v9 }
 0xfab   :  { %16583 = vmatprep.subr.bf16.mxu0 %v17155_v8 }
 0xfad   :  { %15406 = vmatmul.mubr.f32.vlgmr.msra.gmra.mrb[46].mxu0 %v18291_v22 }
 0xfae   :  { %16585 = vmatpush3.bf16.msra.mxu0 %v17369_v18  ;;  %15416 = vmatprep.mubr.msk.f32.mxu0 %vm17156_vm2, %v17157_v46 }
 0xfaf   :  { %16586 = vmatprep.subr.bf16.mxu0 %v17155_v8 }
 0xfb2   :  { %16588 = vmatpush3.bf16.msra.mxu0 %v17384_v37 }
 0xfb3   :  { %16625 = vmatprep.subr.bf16.mxu0 %v17155_v8 }
 0xfb5   :  { %15417 = vmatmul.mubr.f32.vlgmr.msra.gmra.mrb[46].mxu0 %v18291_v22 }
 0xfb6   :  { %16627 = vmatpush3.bf16.msra.mxu0 %v17558_v34  ;;  %15493 = vmatprep.mubr.msk.f32.mxu0 %vm17156_vm2, %v17157_v46 }
 0xfb7   :  { %16628 = vmatprep.subr.bf16.mxu0 %v17155_v8 }
 0xfba   :  { %16630 = vmatpush3.bf16.msra.mxu0 %v17578_v14 }
 0xfbb   :  { %16637 = vmatprep.subr.bf16.mxu0 %v17155_v8 }
0x1022   :  { %v7502_v54 = vpop.f32.mrb[82].mxu1 }
0x1023   :  { %v15231_v56 = vpop.f32.mrb[83].mxu1 }
0x102a   :  { %v7593_v55 = vpop.f32.mrb[84].mxu1 }
0x102b   :  { %v7594_v52 = vadd.f32 %v7593_v55, %v7502_v54  ;;  %v15242_v58 = vpop.f32.mrb[85].mxu1 }
0x1032   :  { %v7673_v61 = vpop.f32.mrb[86].mxu1 }
0x1033   :  { %v7674_v4 = vadd.f32 %v7673_v61, %v7594_v52  ;;  %v15253_v60 = vpop.f32.mrb[87].mxu1 }
0x103a   :  { %v7750_v62 = vpop.f32.mrb[88].mxu1 }
0x103b   :  { %v7751_v3 = vadd.f32 %v7750_v62, %v7674_v4  ;;  %v15264_v5 = vpop.f32.mrb[89].mxu1 }
0x1042   :  { %v7833_v20 = vpop.f32.mrb[90].mxu1 }
0x1043   :  { %v7834_v6 = vadd.f32 %v7833_v20, %v7751_v3  ;;  %v15275_v11 = vpop.f32.mrb[91].mxu1 }
0x1048   :  { %v7992_v39 = vpop.f32.mrb[40].mxu0 }
0x1049   :  { %v15297_v28 = vpop.f32.mrb[41].mxu0 }
0x104a   :  { %v7908_v25 = vpop.f32.mrb[92].mxu1 }
0x104b   :  { %v7909_v43 = vadd.f32 %v7908_v25, %v7834_v6  ;;  %v15286_v57 = vpop.f32.mrb[93].mxu1 }
0x104d   :  { %v7993_v49 = vadd.f32 %v7992_v39, %v7909_v43 }
0x1050   :  { %v8163_v32 = vpop.f32.mrb[42].mxu0 }
0x1051   :  { %v15319_v35 = vpop.f32.mrb[43].mxu0 }
0x1052   :  { %v8083_v44 = vpop.f32.mrb[94].mxu1 }
0x1053   :  { %v8084_v33 = vadd.f32 %v8083_v44, %v7993_v49  ;;  %v15308_v48 = vpop.f32.mrb[95].mxu1 }
0x1055   :  { %v8164_v10 = vadd.f32 %v8163_v32, %v8084_v33 }
0x1058   :  { %v8323_v22 = vpop.f32.mrb[44].mxu0 }
0x1059   :  { %v15341_v53 = vpop.f32.mrb[45].mxu0 }
0x105a   :  { %v8240_v59 = vpop.f32.mrb[96].mxu1 }
0x105b   :  { %v8241_v24 = vadd.f32 %v8240_v59, %v8164_v10  ;;  %v15330_v50 = vpop.f32.mrb[97].mxu1 }
0x105d   :  { %v8324_v54 = vadd.f32 %v8323_v22, %v8241_v24 }
0x1062   :  { %v8398_v56 = vpop.f32.mrb[98].mxu1 }
0x1063   :  { %v8399_v55 = vadd.f32 %v8398_v56, %v8324_v54  ;;  %v15352_v52 = vpop.f32.mrb[99].mxu1 }
0x1065   :  { %v8402_v58 = vadd.f32 %v18239_v15, %v8399_v55 }
0x1067   :  { %v8403_v61 = vmul.f32 0.5, %v8402_v58 }
0x1069   :  { %v8404_v4 = vsel %vm17512_vm5, %v8402_v58, %v8403_v61 }
0x106a   :  { %17098 = vtanh.f32 %v8404_v4 }
0x1074   :  { %v17099_v60 = vpop.eup %17098 }
0x1075   :  { %v8406_v62 = vadd.f32 1.0, %v17099_v60 }
0x1077   :  { %v8407_v3 = vmul.f32 0.5, %v8406_v62 }
0x1079   :  { %v8408_v5 = vsel %vm17512_vm5, %v17099_v60, %v8407_v3 }
0x107a   :  { %8411 = vrot.lane.b32.xlu0 %v8408_v5, %s17158_s3  ;;  %v8409_v33 = vmul.f32 %v8408_v5, %v18256_v0 }
0x1088   :  { %v8907_v20 = vpop.f32.mrb[46].mxu0 }
0x1089   :  { %v8911_v6 = vadd.f32 %v17516_v2, %v8907_v20  ;;  %v15418_v11 = vpop.f32.mrb[47].mxu0 }
0x108b   :  { %v8912_v39 = vmul.f32 0.5, %v8911_v6 }
0x108d   :  { %v8913_v28 = vsel %vm17512_vm5, %v8911_v6, %v8912_v39 }
0x108e   :  { %17100 = vtanh.f32 %v8913_v28 }
0x1098   :  { %v17101_v25 = vpop.eup %17100 }
0x1099   :  { %v8915_v43 = vadd.f32 1.0, %v17101_v25 }
0x109b   :  { %v8916_v57 = vmul.f32 0.5, %v8915_v43 }
0x109d   :  { %v8917_v49 = vsel %vm17512_vm5, %v17101_v25, %v8916_v57 }
0x109e   :  { %8920 = vrot.lane.b32.xlu1 %v8917_v49, %s17158_s3  ;;  %v8918_v53 = vmul.f32 %v8917_v49, %v18261_v1 }
0x10ec   :  { %v8412_v32 = vpop.permute.xlu0 %8411 }
0x10ed   :  { %v8414_v35 = vmul.f32 %v8412_v32, %v8408_v5 }
0x10ef   :  { %8416 = vrot.lane.b32.xlu0 %v8414_v35, %s17159_s26 }
0x1110   :  { %v8921_v44 = vpop.permute.xlu1 %8920 }
0x1111   :  { %v8923_v2 = vmul.f32 %v8921_v44, %v8917_v49 }
0x1113   :  { %8925 = vrot.lane.b32.xlu1 %v8923_v2, %s17159_s26 }
0x1161   :  { %v8417_v48 = vpop.permute.xlu0 %8416 }
0x1162   :  { %v18412_v10 = vadd.f32 %v8417_v48, %v8409_v33 }
0x1164   :  { %17102 = vtanh.f32 %v18412_v10 }
0x116e   :  { %v17103_v22 = vpop.eup %17102 }
0x116f   :  { %8422 = vrot.lane.b32.xlu0 %v17103_v22, %s17158_s3 }
0x1185   :  { %v8926_v59 = vpop.permute.xlu1 %8925 }
0x1186   :  { %v18417_v24 = vadd.f32 %v8926_v59, %v8918_v53 }
0x1188   :  { %17104 = vtanh.f32 %v18417_v24 }
0x1192   :  { %v17105_v50 = vpop.eup %17104 }
0x1193   :  { %8931 = vrot.lane.b32.xlu1 %v17105_v50, %s17158_s3 }
0x11e1   :  { %v8423_v54 = vpop.permute.xlu0 %8422 }
0x11e2   :  { %v8425_v0 = vmul.f32 %v8423_v54, %v8408_v5 }
0x11e4   :  { %8936 = vrot.lane.b32.xlu0 %v8425_v0, %s17159_s26 }
0x1205   :  { %v8932_v56 = vpop.permute.xlu1 %8931 }
0x1206   :  { %v8934_v55 = vmul.f32 %v8932_v56, %v8917_v49 }
0x1208   :  { %9426 = vrot.lane.b32.xlu1 %v8934_v55, %s17159_s26 }
0x1256   :  { %v8937_v52 = vpop.permute.xlu0 %8936 }
0x1257   :  { %v8938_v58 = vsel %vm856_vm6, %v8937_v52, 0 }
0x1258   :  { %v9009_v1 = vand.u32 4294901760, %v8938_v58 }
0x125a   :  { %v9010_v61 = vsub.f32 %v8938_v58, %v9009_v1 }
0x125c   :  { %v9011_v4 = vand.u32 4294901760, %v9010_v61 }
0x125e   :  { %v9012_v60 = vsub.f32 %v9010_v61, %v9011_v4 }
0x1260   :  { %v9013_v62 = vand.u32 4294901760, %v9012_v60 }
0x1262   :  { %15428 = vmatmul.mubr.f32.vlgmr.msra.gmra.mrb[100].mxu1 %v9013_v62 }
0x1263   :  { %16597 = vmatpush3.bf16.msra.mxu1 %v17575_v12  ;;  %15438 = vmatprep.mubr.msk.f32.mxu1 %vm17156_vm2, %v17157_v46 }
0x1264   :  { %16598 = vmatprep.subr.bf16.mxu1 %v17155_v8 }
0x1267   :  { %16600 = vmatpush3.bf16.msra.mxu1 %v17581_v16 }
0x1268   :  { %16601 = vmatprep.subr.bf16.mxu1 %v17155_v8 }
0x126a   :  { %15439 = vmatmul.mubr.f32.vlgmr.msra.gmra.mrb[102].mxu1 %v9009_v1 }
0x126b   :  { %16603 = vmatpush3.bf16.msra.mxu1 %v17589_v17  ;;  %15449 = vmatprep.mubr.msk.f32.mxu1 %vm17156_vm2, %v17157_v46 }
0x126c   :  { %16604 = vmatprep.subr.bf16.mxu1 %v17155_v8 }
0x126f   :  { %16606 = vmatpush3.bf16.msra.mxu1 %v17594_v26 }
0x1270   :  { %16607 = vmatprep.subr.bf16.mxu1 %v17155_v8 }
0x1272   :  { %15450 = vmatmul.mubr.f32.vlgmr.msra.gmra.mrb[104].mxu1 %v9010_v61 }
0x1273   :  { %16609 = vmatpush3.bf16.msra.mxu1 %v17556_v30  ;;  %15460 = vmatprep.mubr.msk.f32.mxu1 %vm17156_vm2, %v17157_v46 }
0x1274   :  { %16610 = vmatprep.subr.bf16.mxu1 %v17155_v8 }
0x1277   :  { %16612 = vmatpush3.bf16.msra.mxu1 %v17561_v38 }
0x1278   :  { %16613 = vmatprep.subr.bf16.mxu1 %v17155_v8 }
0x127a   :  { %15461 = vmatmul.mubr.f32.vlgmr.msra.gmra.mrb[106].mxu1 %v9011_v4  ;;  %v9427_v3 = vpop.permute.xlu1 %9426 }
0x127b   :  { %16615 = vmatpush3.bf16.msra.mxu1 %v17609_v36  ;;  %v9428_v5 = vsel %vm856_vm6, %v9427_v3, 0  ;;  %15471 = vmatprep.mubr.msk.f32.mxu1 %vm17156_vm2, %v17157_v46 }
0x127c   :  { %v18446_v20 = vand.u32 4294901760, %v9428_v5  ;;  %16616 = vmatprep.subr.bf16.mxu1 %v17155_v8 }
0x127e   :  { %v18450_v6 = vsub.f32 %v9428_v5, %v18446_v20 }
0x127f   :  { %16618 = vmatpush3.bf16.msra.mxu1 %v17617_v45 }
0x1280   :  { %v18454_v11 = vand.u32 4294901760, %v18450_v6  ;;  %16619 = vmatprep.subr.bf16.mxu1 %v17155_v8 }
0x1282   :  { %15472 = vmatmul.mubr.f32.vlgmr.msra.gmra.mrb[108].mxu1 %v9009_v1  ;;  %v9502_v39 = vsub.f32 %v18450_v6, %v18454_v11 }
0x1283   :  { %16621 = vmatpush3.bf16.msra.mxu1 %v17556_v30  ;;  %15482 = vmatprep.mubr.msk.f32.mxu1 %vm17156_vm2, %v17157_v46 }
0x1284   :  { %16622 = vmatprep.subr.bf16.mxu1 %v17155_v8  ;;  %v9503_v28 = vand.u32 4294901760, %v9502_v39 }
0x1286   :  { %15494 = vmatmul.mubr.f32.vlgmr.msra.gmra.mrb[48].mxu0 %v9503_v28 }
0x1287   :  { %16624 = vmatpush3.bf16.msra.mxu1 %v17561_v38  ;;  %16639 = vmatpush3.bf16.msra.mxu0 %v17682_v27 }
0x1288   :  { %16631 = vmatprep.subr.bf16.mxu1 %v17155_v8  ;;  %16640 = vmatprep.subr.bf16.mxu0 %v17155_v8 }
0x1289   :  { %15515 = vmatprep.mubr.msk.f32.mxu0 %vm17156_vm2, %v17157_v46 }
0x128a   :  { %15483 = vmatmul.mubr.f32.vlgmr.msra.gmra.mrb[110].mxu1 %v9009_v1 }
0x128b   :  { %16633 = vmatpush3.bf16.msra.mxu1 %v17649_v31  ;;  %16642 = vmatpush3.bf16.msra.mxu0 %v17690_v29 }
0x128c   :  { %16634 = vmatprep.subr.bf16.mxu1 %v17155_v8  ;;  %16649 = vmatprep.subr.bf16.mxu0 %v17155_v8 }
0x128d   :  { %15504 = vmatprep.mubr.msk.f32.mxu1 %vm17156_vm2, %v17157_v46 }
0x128e   :  { %15516 = vmatmul.mubr.f32.vlgmr.msra.gmra.mrb[50].mxu0 %v18450_v6 }
0x128f   :  { %16636 = vmatpush3.bf16.msra.mxu1 %v17654_v40  ;;  %16651 = vmatpush3.bf16.msra.mxu0 %v17704_v41 }
0x1290   :  { %16643 = vmatprep.subr.bf16.mxu1 %v17155_v8  ;;  %16652 = vmatprep.subr.bf16.mxu0 %v17155_v8 }
0x1291   :  { %15537 = vmatprep.mubr.msk.f32.mxu0 %vm17156_vm2, %v17157_v46 }
0x1292   :  { %15505 = vmatmul.mubr.f32.vlgmr.msra.gmra.mrb[112].mxu1 %v18446_v20 }
0x1293   :  { %16645 = vmatpush3.bf16.msra.mxu1 %v17558_v34  ;;  %16654 = vmatpush3.bf16.msra.mxu0 %v17715_v42 }
0x1294   :  { %16646 = vmatprep.subr.bf16.mxu1 %v17155_v8  ;;  %16661 = vmatprep.subr.bf16.mxu0 %v17155_v8 }
0x1295   :  { %15526 = vmatprep.mubr.msk.f32.mxu1 %vm17156_vm2, %v17157_v46 }
0x1296   :  { %15538 = vmatmul.mubr.f32.vlgmr.msra.gmra.mrb[52].mxu0 %v18446_v20 }
0x1297   :  { %16648 = vmatpush3.bf16.msra.mxu1 %v17578_v14  ;;  %16663 = vmatpush3.bf16.msra.mxu0 %v17369_v18 }
0x1298   :  { %16655 = vmatprep.subr.bf16.mxu1 %v17155_v8  ;;  %16664 = vmatprep.subr.bf16.mxu0 %v17155_v8 }
0x1299   :  { %15559 = vmatprep.mubr.msk.f32.mxu0 %vm17156_vm2, %v17157_v46 }
0x129a   :  { %15527 = vmatmul.mubr.f32.vlgmr.msra.gmra.mrb[114].mxu1 %v18454_v11 }
0x129b   :  { %16657 = vmatpush3.bf16.msra.mxu1 %v17558_v34  ;;  %16666 = vmatpush3.bf16.msra.mxu0 %v17384_v37 }
0x129c   :  { %16658 = vmatprep.subr.bf16.mxu1 %v17155_v8  ;;  %16667 = vmatprep.subr.bf16.mxu0 %v17155_v8 }
0x129d   :  { %15548 = vmatprep.mubr.msk.f32.mxu1 %vm17156_vm2, %v17157_v46 }
0x129e   :  { %15560 = vmatmul.mubr.f32.vlgmr.msra.gmra.mrb[54].mxu0 %v9503_v28 }
0x129f   :  { %16660 = vmatpush3.bf16.msra.mxu1 %v17578_v14  ;;  %16669 = vmatpush3.bf16.msra.mxu0 %v17401_v47 }
0x12a0   :  { %16670 = vmatprep.subr.bf16.mxu0 %v17155_v8  ;;  %15570 = vmatprep.mubr.msk.f32.mxu0 %vm17156_vm2, %v17157_v46 }
0x12a1   :  { %16697 = vmatprep.subr.bf16.mxu1 %v17155_v8 }
0x12a2   :  { %15549 = vmatmul.mubr.f32.vlgmr.msra.gmra.mrb[116].mxu1 %v18446_v20 }
0x12a3   :  { %16672 = vmatpush3.bf16.msra.mxu0 %v17409_v51  ;;  %16699 = vmatpush3.bf16.msra.mxu1 %v17556_v30 }
0x12a4   :  { %16673 = vmatprep.subr.bf16.mxu0 %v17155_v8  ;;  %16700 = vmatprep.subr.bf16.mxu1 %v17155_v8 }
0x12a5   :  { %15625 = vmatprep.mubr.msk.f32.mxu1 %vm17156_vm2, %v17157_v46 }
0x12a6   :  { %15571 = vmatmul.mubr.f32.vlgmr.msra.gmra.mrb[54].mxu0 %v18446_v20 }
0x12a7   :  { %16675 = vmatpush3.bf16.msra.mxu0 %v17423_v19  ;;  %15581 = vmatprep.mubr.msk.f32.mxu0 %vm17156_vm2, %v17157_v46 }
0x12a8   :  { %16676 = vmatprep.subr.bf16.mxu0 %v17155_v8  ;;  %16702 = vmatpush3.bf16.msra.mxu1 %v17561_v38 }
0x12a9   :  { %16703 = vmatprep.subr.bf16.mxu1 %v17155_v8 }
0x12ab   :  { %16678 = vmatpush3.bf16.msra.mxu0 %v17434_v21 }
0x12ac   :  { %16679 = vmatprep.subr.bf16.mxu0 %v17155_v8 }
0x12ae   :  { %15582 = vmatmul.mubr.f32.vlgmr.msra.gmra.mrb[54].mxu0 %v18450_v6 }
0x12af   :  { %16681 = vmatpush3.bf16.msra.mxu0 %v17369_v18  ;;  %15592 = vmatprep.mubr.msk.f32.mxu0 %vm17156_vm2, %v17157_v46 }
0x12b0   :  { %16682 = vmatprep.subr.bf16.mxu0 %v17155_v8 }
0x12b3   :  { %16684 = vmatpush3.bf16.msra.mxu0 %v17384_v37 }
0x12b4   :  { %16685 = vmatprep.subr.bf16.mxu0 %v17155_v8 }
0x12b6   :  { %15593 = vmatmul.mubr.f32.vlgmr.msra.gmra.mrb[54].mxu0 %v18454_v11 }
0x12b7   :  { %16687 = vmatpush3.bf16.msra.mxu0 %v17462_v23  ;;  %15603 = vmatprep.mubr.msk.f32.mxu0 %vm17156_vm2, %v17157_v46 }
0x12b8   :  { %16688 = vmatprep.subr.bf16.mxu0 %v17155_v8 }
0x12bb   :  { %16690 = vmatpush3.bf16.msra.mxu0 %v17473_v9 }
0x12bc   :  { %16691 = vmatprep.subr.bf16.mxu0 %v17155_v8 }
0x12be   :  { %15604 = vmatmul.mubr.f32.vlgmr.msra.gmra.mrb[54].mxu0 %v18446_v20 }
0x12bf   :  { %16693 = vmatpush3.bf16.msra.mxu0 %v17369_v18  ;;  %15614 = vmatprep.mubr.msk.f32.mxu0 %vm17156_vm2, %v17157_v46 }
0x12c0   :  { %16694 = vmatprep.subr.bf16.mxu0 %v17155_v8 }
0x12c3   :  { %16696 = vmatpush3.bf16.msra.mxu0 %v17384_v37 }
0x12c4   :  { %16733 = vmatprep.subr.bf16.mxu0 %v17155_v8 }
0x12c6   :  { %15615 = vmatmul.mubr.f32.vlgmr.msra.gmra.mrb[54].mxu0 %v18446_v20 }
0x12c7   :  { %16735 = vmatpush3.bf16.msra.mxu0 %v17558_v34  ;;  %15691 = vmatprep.mubr.msk.f32.mxu0 %vm17156_vm2, %v17157_v46 }
0x12c8   :  { %16736 = vmatprep.subr.bf16.mxu0 %v17155_v8 }
0x12cb   :  { %16738 = vmatpush3.bf16.msra.mxu0 %v17578_v14 }
0x12cc   :  { %16745 = vmatprep.subr.bf16.mxu0 %v17155_v8 }
0x1335   :  { %v9015_v25 = vpop.f32.mrb[100].mxu1 }
0x1336   :  { %v15429_v43 = vpop.f32.mrb[101].mxu1 }
0x133d   :  { %v9106_v57 = vpop.f32.mrb[102].mxu1 }
0x133e   :  { %v9107_v49 = vadd.f32 %v9106_v57, %v9015_v25  ;;  %v15440_v32 = vpop.f32.mrb[103].mxu1 }
0x1345   :  { %v9186_v35 = vpop.f32.mrb[104].mxu1 }
0x1346   :  { %v9187_v44 = vadd.f32 %v9186_v35, %v9107_v49  ;;  %v15451_v2 = vpop.f32.mrb[105].mxu1 }
0x134d   :  { %v9263_v33 = vpop.f32.mrb[106].mxu1 }
0x134e   :  { %v9264_v48 = vadd.f32 %v9263_v33, %v9187_v44  ;;  %v15462_v22 = vpop.f32.mrb[107].mxu1 }
0x1355   :  { %v9346_v53 = vpop.f32.mrb[108].mxu1 }
0x1356   :  { %v9347_v59 = vadd.f32 %v9346_v53, %v9264_v48  ;;  %v15473_v50 = vpop.f32.mrb[109].mxu1 }
0x1359   :  { %v9505_v54 = vpop.f32.mrb[48].mxu0 }
0x135a   :  { %v15495_v0 = vpop.f32.mrb[49].mxu0 }
0x135d   :  { %v9421_v56 = vpop.f32.mrb[110].mxu1 }
0x135e   :  { %v9422_v55 = vadd.f32 %v9421_v56, %v9347_v59  ;;  %v15484_v52 = vpop.f32.mrb[111].mxu1 }
0x1360   :  { %v9506_v58 = vadd.f32 %v9505_v54, %v9422_v55 }
0x1361   :  { %v9676_v1 = vpop.f32.mrb[50].mxu0 }
0x1362   :  { %v15517_v61 = vpop.f32.mrb[51].mxu0 }
0x1365   :  { %v9596_v4 = vpop.f32.mrb[112].mxu1 }
0x1366   :  { %v9597_v60 = vadd.f32 %v9596_v4, %v9506_v58  ;;  %v15506_v62 = vpop.f32.mrb[113].mxu1 }
0x1368   :  { %v9677_v3 = vadd.f32 %v9676_v1, %v9597_v60 }
0x1369   :  { %v9836_v5 = vpop.f32.mrb[52].mxu0 }
0x136a   :  { %v15539_v20 = vpop.f32.mrb[53].mxu0 }
0x136d   :  { %v9753_v6 = vpop.f32.mrb[114].mxu1 }
0x136e   :  { %v9754_v11 = vadd.f32 %v9753_v6, %v9677_v3  ;;  %v15528_v39 = vpop.f32.mrb[115].mxu1 }
0x1370   :  { %v9837_v28 = vadd.f32 %v9836_v5, %v9754_v11 }
0x1375   :  { %v9911_v25 = vpop.f32.mrb[116].mxu1 }
0x1376   :  { %v9912_v43 = vadd.f32 %v9911_v25, %v9837_v28  ;;  %v15550_v57 = vpop.f32.mrb[117].mxu1 }
0x1378   :  { %v9915_v49 = vadd.f32 %v18239_v15, %v9912_v43 }
0x137a   :  { %v9916_v32 = vmul.f32 0.5, %v9915_v49 }
0x137c   :  { %v9917_v35 = vsel %vm17512_vm5, %v9915_v49, %v9916_v32 }
0x137d   :  { %17106 = vtanh.f32 %v9917_v35 }
0x1387   :  { %v17107_v44 = vpop.eup %17106 }
0x1388   :  { %v9919_v2 = vadd.f32 1.0, %v17107_v44 }
0x138a   :  { %v9920_v33 = vmul.f32 0.5, %v9919_v2 }
0x138c   :  { %v9921_v48 = vsel %vm17512_vm5, %v17107_v44, %v9920_v33 }
0x138d   :  { %9924 = vrot.lane.b32.xlu0 %v9921_v48, %s17158_s3  ;;  %v9922_v61 = vmul.f32 %v9921_v48, %v18412_v10 }
0x1399   :  { %v10420_v22 = vpop.f32.mrb[54].mxu0 }
0x139a   :  { %v10424_v53 = vadd.f32 %v17524_v13, %v10420_v22  ;;  %v15616_v59 = vpop.f32.mrb[55].mxu0 }
0x139c   :  { %v10425_v50 = vmul.f32 0.5, %v10424_v53 }
0x139e   :  { %v10426_v15 = vsel %vm17512_vm5, %v10424_v53, %v10425_v50 }
0x139f   :  { %17108 = vtanh.f32 %v10426_v15 }
0x13a9   :  { %v17109_v54 = vpop.eup %17108 }
0x13aa   :  { %v10428_v0 = vadd.f32 1.0, %v17109_v54 }
0x13ac   :  { %v10429_v56 = vmul.f32 0.5, %v10428_v0 }
0x13ae   :  { %v10430_v55 = vsel %vm17512_vm5, %v17109_v54, %v10429_v56 }
0x13af   :  { %10433 = vrot.lane.b32.xlu1 %v10430_v55, %s17158_s3  ;;  %v10431_v3 = vmul.f32 %v10430_v55, %v18417_v24 }
0x13ff   :  { %v9925_v52 = vpop.permute.xlu0 %9924 }
0x1400   :  { %v9927_v58 = vmul.f32 %v9925_v52, %v9921_v48 }
0x1402   :  { %9929 = vrot.lane.b32.xlu0 %v9927_v58, %s17159_s26 }
0x1421   :  { %v10434_v1 = vpop.permute.xlu1 %10433 }
0x1422   :  { %v10436_v13 = vmul.f32 %v10434_v1, %v10430_v55 }
0x1424   :  { %10438 = vrot.lane.b32.xlu1 %v10436_v13, %s17159_s26 }
0x1474   :  { %v9930_v4 = vpop.permute.xlu0 %9929 }
0x1475   :  { %v18568_v60 = vadd.f32 %v9930_v4, %v9922_v61 }
0x1477   :  { %17110 = vtanh.f32 %v18568_v60 }
0x1481   :  { %v17111_v62 = vpop.eup %17110 }
0x1482   :  { %9935 = vrot.lane.b32.xlu0 %v17111_v62, %s17158_s3 }
0x1496   :  { %v10439_v5 = vpop.permute.xlu1 %10438 }
0x1497   :  { %v18573_v20 = vadd.f32 %v10439_v5, %v10431_v3 }
0x1499   :  { %17112 = vtanh.f32 %v18573_v20 }
0x14a3   :  { %v17113_v6 = vpop.eup %17112 }
0x14a4   :  { %10444 = vrot.lane.b32.xlu1 %v17113_v6, %s17158_s3 }
0x14f4   :  { %v9936_v11 = vpop.permute.xlu0 %9935 }
0x14f5   :  { %v9938_v10 = vmul.f32 %v9936_v11, %v9921_v48 }
0x14f7   :  { %10449 = vrot.lane.b32.xlu0 %v9938_v10, %s17159_s26 }
0x1516   :  { %v10445_v39 = vpop.permute.xlu1 %10444 }
0x1517   :  { %v10447_v28 = vmul.f32 %v10445_v39, %v10430_v55 }
0x1519   :  { %10939 = vrot.lane.b32.xlu1 %v10447_v28, %s17159_s26 }
0x1569   :  { %v10450_v25 = vpop.permute.xlu0 %10449 }
0x156a   :  { %v10451_v43 = vsel %vm856_vm6, %v10450_v25, 0 }
0x156b   :  { %v10522_v24 = vand.u32 4294901760, %v10451_v43 }
0x156d   :  { %v10523_v57 = vsub.f32 %v10451_v43, %v10522_v24 }
0x156f   :  { %v10524_v49 = vand.u32 4294901760, %v10523_v57 }
0x1571   :  { %v10525_v32 = vsub.f32 %v10523_v57, %v10524_v49 }
0x1573   :  { %v10526_v35 = vand.u32 4294901760, %v10525_v32 }
0x1575   :  { %15626 = vmatmul.mubr.f32.vlgmr.msra.gmra.mrb[118].mxu1 %v10526_v35 }
0x1576   :  { %16705 = vmatpush3.bf16.msra.mxu1 %v17575_v12  ;;  %15636 = vmatprep.mubr.msk.f32.mxu1 %vm17156_vm2, %v17157_v46 }
0x1577   :  { %16706 = vmatprep.subr.bf16.mxu1 %v17155_v8 }
0x157a   :  { %16708 = vmatpush3.bf16.msra.mxu1 %v17581_v16 }
0x157b   :  { %16709 = vmatprep.subr.bf16.mxu1 %v17155_v8 }
0x157d   :  { %15637 = vmatmul.mubr.f32.vlgmr.msra.gmra.mrb[120].mxu1 %v10522_v24 }
0x157e   :  { %16711 = vmatpush3.bf16.msra.mxu1 %v17589_v17  ;;  %15647 = vmatprep.mubr.msk.f32.mxu1 %vm17156_vm2, %v17157_v46 }
0x157f   :  { %16712 = vmatprep.subr.bf16.mxu1 %v17155_v8 }
0x1582   :  { %16714 = vmatpush3.bf16.msra.mxu1 %v17594_v26 }
0x1583   :  { %16715 = vmatprep.subr.bf16.mxu1 %v17155_v8 }
0x1585   :  { %15648 = vmatmul.mubr.f32.vlgmr.msra.gmra.mrb[122].mxu1 %v10523_v57 }
0x1586   :  { %16717 = vmatpush3.bf16.msra.mxu1 %v17556_v30  ;;  %15658 = vmatprep.mubr.msk.f32.mxu1 %vm17156_vm2, %v17157_v46 }
0x1587   :  { %16718 = vmatprep.subr.bf16.mxu1 %v17155_v8 }
0x158a   :  { %16720 = vmatpush3.bf16.msra.mxu1 %v17561_v38 }
0x158b   :  { %v10940_v44 = vpop.permute.xlu1 %10939  ;;  %16721 = vmatprep.subr.bf16.mxu1 %v17155_v8 }
0x158c   :  { %v10941_v2 = vsel %vm856_vm6, %v10940_v44, 0  ;;  %v18712_v44 = vld [vmem:[%s18849_s6] ss:$0 sm:$0xff] }
0x158d   :  { %v18599_v33 = vand.u32 4294901760, %v10941_v2  ;;  %15659 = vmatmul.mubr.f32.vlgmr.msra.gmra.mrb[124].mxu1 %v10524_v49 }
0x158e   :  { %16723 = vmatpush3.bf16.msra.mxu1 %v17609_v36  ;;  %15669 = vmatprep.mubr.msk.f32.mxu1 %vm17156_vm2, %v17157_v46 }
0x158f   :  { %v18605_v48 = vsub.f32 %v10941_v2, %v18599_v33  ;;  %16724 = vmatprep.subr.bf16.mxu1 %v17155_v8 }
0x1591   :  { %v18609_v22 = vand.u32 4294901760, %v18605_v48 }
0x1592   :  { %16726 = vmatpush3.bf16.msra.mxu1 %v17617_v45 }
0x1593   :  { %16727 = vmatprep.subr.bf16.mxu1 %v17155_v8  ;;  %v11015_v53 = vsub.f32 %v18605_v48, %v18609_v22 }
0x1595   :  { %15670 = vmatmul.mubr.f32.vlgmr.msra.gmra.mrb[126].mxu1 %v10522_v24  ;;  %v11016_v59 = vand.u32 4294901760, %v11015_v53 }
0x1596   :  { %16729 = vmatpush3.bf16.msra.mxu1 %v17556_v30  ;;  %15680 = vmatprep.mubr.msk.f32.mxu1 %vm17156_vm2, %v17157_v46 }
0x1597   :  { %15692 = vmatmul.mubr.f32.vlgmr.msra.gmra.mrb[56].mxu0 %v11016_v59  ;;  %16730 = vmatprep.subr.bf16.mxu1 %v17155_v8 }
0x1598   :  { %16747 = vmatpush3.bf16.msra.mxu0 %v17682_v27  ;;  %15713 = vmatprep.mubr.msk.f32.mxu0 %vm17156_vm2, %v17157_v46 }
0x1599   :  { %16748 = vmatprep.subr.bf16.mxu0 %v17155_v8 }
0x159a   :  { %16732 = vmatpush3.bf16.msra.mxu1 %v17561_v38 }
0x159b   :  { %16739 = vmatprep.subr.bf16.mxu1 %v17155_v8 }
0x159c   :  { %16750 = vmatpush3.bf16.msra.mxu0 %v17690_v29 }
0x159d   :  { %15681 = vmatmul.mubr.f32.vlgmr.msra.gmra.mrb[128].mxu1 %v10522_v24  ;;  %16757 = vmatprep.subr.bf16.mxu0 %v17155_v8 }
0x159e   :  { %16741 = vmatpush3.bf16.msra.mxu1 %v17649_v31  ;;  %15702 = vmatprep.mubr.msk.f32.mxu1 %vm17156_vm2, %v17157_v46 }
0x159f   :  { %15714 = vmatmul.mubr.f32.vlgmr.msra.gmra.mrb[58].mxu0 %v18605_v48  ;;  %16742 = vmatprep.subr.bf16.mxu1 %v17155_v8 }
0x15a0   :  { %16759 = vmatpush3.bf16.msra.mxu0 %v17704_v41  ;;  %15735 = vmatprep.mubr.msk.f32.mxu0 %vm17156_vm2, %v17157_v46 }
0x15a1   :  { %16760 = vmatprep.subr.bf16.mxu0 %v17155_v8 }
0x15a2   :  { %16744 = vmatpush3.bf16.msra.mxu1 %v17654_v40 }
0x15a3   :  { %16751 = vmatprep.subr.bf16.mxu1 %v17155_v8 }
0x15a4   :  { %16762 = vmatpush3.bf16.msra.mxu0 %v17715_v42 }
0x15a5   :  { %15703 = vmatmul.mubr.f32.vlgmr.msra.gmra.mrb[130].mxu1 %v18599_v33  ;;  %16769 = vmatprep.subr.bf16.mxu0 %v17155_v8 }
0x15a6   :  { %16753 = vmatpush3.bf16.msra.mxu1 %v17558_v34  ;;  %15724 = vmatprep.mubr.msk.f32.mxu1 %vm17156_vm2, %v17157_v46 }
0x15a7   :  { %15736 = vmatmul.mubr.f32.vlgmr.msra.gmra.mrb[60].mxu0 %v18599_v33  ;;  %16754 = vmatprep.subr.bf16.mxu1 %v17155_v8 }
0x15a8   :  { %16771 = vmatpush3.bf16.msra.mxu0 %v17369_v18  ;;  %15757 = vmatprep.mubr.msk.f32.mxu0 %vm17156_vm2, %v17157_v46 }
0x15a9   :  { %16772 = vmatprep.subr.bf16.mxu0 %v17155_v8 }
0x15aa   :  { %16756 = vmatpush3.bf16.msra.mxu1 %v17578_v14 }
0x15ab   :  { %16763 = vmatprep.subr.bf16.mxu1 %v17155_v8 }
0x15ac   :  { %16774 = vmatpush3.bf16.msra.mxu0 %v17384_v37 }
0x15ad   :  { %15725 = vmatmul.mubr.f32.vlgmr.msra.gmra.mrb[132].mxu1 %v18609_v22  ;;  %16775 = vmatprep.subr.bf16.mxu0 %v17155_v8 }
0x15ae   :  { %16765 = vmatpush3.bf16.msra.mxu1 %v17558_v34  ;;  %15746 = vmatprep.mubr.msk.f32.mxu1 %vm17156_vm2, %v17157_v46 }
0x15af   :  { %15758 = vmatmul.mubr.f32.vlgmr.msra.gmra.mrb[62].mxu0 %v11016_v59  ;;  %16766 = vmatprep.subr.bf16.mxu1 %v17155_v8 }
0x15b0   :  { %16777 = vmatpush3.bf16.msra.mxu0 %v17401_v47  ;;  %15768 = vmatprep.mubr.msk.f32.mxu0 %vm17156_vm2, %v17157_v46 }
0x15b1   :  { %16778 = vmatprep.subr.bf16.mxu0 %v17155_v8 }
0x15b2   :  { %16768 = vmatpush3.bf16.msra.mxu1 %v17578_v14 }
0x15b3   :  { %16805 = vmatprep.subr.bf16.mxu1 %v17155_v8 }
0x15b4   :  { %16780 = vmatpush3.bf16.msra.mxu0 %v17409_v51 }
0x15b5   :  { %15747 = vmatmul.mubr.f32.vlgmr.msra.gmra.mrb[134].mxu1 %v18599_v33  ;;  %16781 = vmatprep.subr.bf16.mxu0 %v17155_v8 }
0x15b6   :  { %16807 = vmatpush3.bf16.msra.mxu1 %v17556_v30  ;;  %15823 = vmatprep.mubr.msk.f32.mxu1 %vm17156_vm2, %v17157_v46 }
0x15b7   :  { %15769 = vmatmul.mubr.f32.vlgmr.msra.gmra.mrb[62].mxu0 %v18599_v33  ;;  %16808 = vmatprep.subr.bf16.mxu1 %v17155_v8 }
0x15b8   :  { %16783 = vmatpush3.bf16.msra.mxu0 %v17423_v19  ;;  %15779 = vmatprep.mubr.msk.f32.mxu0 %vm17156_vm2, %v17157_v46 }
0x15b9   :  { %16784 = vmatprep.subr.bf16.mxu0 %v17155_v8 }
0x15ba   :  { %16810 = vmatpush3.bf16.msra.mxu1 %v17561_v38 }
0x15bb   :  { %16811 = vmatprep.subr.bf16.mxu1 %v17155_v8 }
0x15bc   :  { %16786 = vmatpush3.bf16.msra.mxu0 %v17434_v21 }
0x15bd   :  { %16787 = vmatprep.subr.bf16.mxu0 %v17155_v8 }
0x15bf   :  { %15780 = vmatmul.mubr.f32.vlgmr.msra.gmra.mrb[62].mxu0 %v18605_v48 }
0x15c0   :  { %16789 = vmatpush3.bf16.msra.mxu0 %v17369_v18  ;;  %15790 = vmatprep.mubr.msk.f32.mxu0 %vm17156_vm2, %v17157_v46 }
0x15c1   :  { %16790 = vmatprep.subr.bf16.mxu0 %v17155_v8 }
0x15c4   :  { %16792 = vmatpush3.bf16.msra.mxu0 %v17384_v37 }
0x15c5   :  { %16793 = vmatprep.subr.bf16.mxu0 %v17155_v8 }
0x15c7   :  { %15791 = vmatmul.mubr.f32.vlgmr.msra.gmra.mrb[62].mxu0 %v18609_v22 }
0x15c8   :  { %16795 = vmatpush3.bf16.msra.mxu0 %v17462_v23  ;;  %15801 = vmatprep.mubr.msk.f32.mxu0 %vm17156_vm2, %v17157_v46 }
0x15c9   :  { %16796 = vmatprep.subr.bf16.mxu0 %v17155_v8 }
0x15cc   :  { %16798 = vmatpush3.bf16.msra.mxu0 %v17473_v9 }
0x15cd   :  { %16799 = vmatprep.subr.bf16.mxu0 %v17155_v8 }
0x15cf   :  { %15802 = vmatmul.mubr.f32.vlgmr.msra.gmra.mrb[62].mxu0 %v18599_v33 }
0x15d0   :  { %16801 = vmatpush3.bf16.msra.mxu0 %v17369_v18  ;;  %15812 = vmatprep.mubr.msk.f32.mxu0 %vm17156_vm2, %v17157_v46 }
0x15d1   :  { %16802 = vmatprep.subr.bf16.mxu0 %v17155_v8 }
0x15d4   :  { %16804 = vmatpush3.bf16.msra.mxu0 %v17384_v37 }
0x15d5   :  { %16841 = vmatprep.subr.bf16.mxu0 %v17155_v8 }
0x15d7   :  { %15813 = vmatmul.mubr.f32.vlgmr.msra.gmra.mrb[62].mxu0 %v18599_v33 }
0x15d8   :  { %16843 = vmatpush3.bf16.msra.mxu0 %v17558_v34  ;;  %15889 = vmatprep.mubr.msk.f32.mxu0 %vm17156_vm2, %v17157_v46 }
0x15d9   :  { %16844 = vmatprep.subr.bf16.mxu0 %v17155_v8 }
0x15dc   :  { %16846 = vmatpush3.bf16.msra.mxu0 %v17578_v14 }
0x15dd   :  { %16853 = vmatprep.subr.bf16.mxu0 %v17155_v8 }
0x1648   :  { %v10528_v18 = vpop.f32.mrb[118].mxu1 }
0x1649   :  { %v15627_v47 = vpop.f32.mrb[119].mxu1 }
0x1650   :  { %v10619_v51 = vpop.f32.mrb[120].mxu1 }
0x1651   :  { %v10620_v19 = vadd.f32 %v10619_v51, %v10528_v18  ;;  %v15638_v37 = vpop.f32.mrb[121].mxu1 }
0x1658   :  { %v10699_v21 = vpop.f32.mrb[122].mxu1 }
0x1659   :  { %v10700_v23 = vadd.f32 %v10699_v21, %v10620_v19  ;;  %v15649_v9 = vpop.f32.mrb[123].mxu1 }
0x1660   :  { %v10776_v50 = vpop.f32.mrb[124].mxu1 }
0x1661   :  { %v10777_v15 = vadd.f32 %v10776_v50, %v10700_v23  ;;  %v15660_v54 = vpop.f32.mrb[125].mxu1 }
0x1668   :  { %v10859_v0 = vpop.f32.mrb[126].mxu1 }
0x1669   :  { %v10860_v56 = vadd.f32 %v10859_v0, %v10777_v15  ;;  %v15671_v55 = vpop.f32.mrb[127].mxu1 }
0x166a   :  { %v11018_v52 = vpop.f32.mrb[56].mxu0 }
0x166b   :  { %v15693_v58 = vpop.f32.mrb[57].mxu0 }
0x1670   :  { %v10934_v1 = vpop.f32.mrb[128].mxu1 }
0x1671   :  { %v10935_v13 = vadd.f32 %v10934_v1, %v10860_v56  ;;  %v15682_v61 = vpop.f32.mrb[129].mxu1 }
0x1672   :  { %v11189_v4 = vpop.f32.mrb[58].mxu0 }
0x1673   :  { %v15715_v62 = vpop.f32.mrb[59].mxu0  ;;  %v11019_v3 = vadd.f32 %v11018_v52, %v10935_v13 }
0x1678   :  { %v11109_v5 = vpop.f32.mrb[130].mxu1 }
0x1679   :  { %v11110_v6 = vadd.f32 %v11109_v5, %v11019_v3  ;;  %v15704_v11 = vpop.f32.mrb[131].mxu1 }
0x167a   :  { %v11349_v10 = vpop.f32.mrb[60].mxu0 }
0x167b   :  { %v15737_v39 = vpop.f32.mrb[61].mxu0  ;;  %v11190_v28 = vadd.f32 %v11189_v4, %v11110_v6 }
0x1680   :  { %v11266_v25 = vpop.f32.mrb[132].mxu1 }
0x1681   :  { %v11267_v43 = vadd.f32 %v11266_v25, %v11190_v28  ;;  %v15726_v24 = vpop.f32.mrb[133].mxu1 }
0x1683   :  { %v11350_v57 = vadd.f32 %v11349_v10, %v11267_v43 }
0x1688   :  { %v11424_v49 = vpop.f32.mrb[134].mxu1 }
0x1689   :  { %v11425_v32 = vadd.f32 %v11424_v49, %v11350_v57  ;;  %v15748_v35 = vpop.f32.mrb[135].mxu1 }
0x168b   :  { %v11428_v2 = vadd.f32 %v18712_v44, %v11425_v32 }
0x168d   :  { %v11429_v33 = vmul.f32 0.5, %v11428_v2 }
0x168f   :  { %v11430_v48 = vsel %vm17512_vm5, %v11428_v2, %v11429_v33 }
0x1690   :  { %17114 = vtanh.f32 %v11430_v48 }
0x169a   :  { %v17115_v22 = vpop.eup %17114 }
0x169b   :  { %v11432_v53 = vadd.f32 1.0, %v17115_v22 }
0x169d   :  { %v11433_v59 = vmul.f32 0.5, %v11432_v53 }
0x169f   :  { %v11434_v18 = vsel %vm17512_vm5, %v17115_v22, %v11433_v59 }
0x16a0   :  { %11437 = vrot.lane.b32.xlu0 %v11434_v18, %s17158_s3  ;;  %v11435_v55 = vmul.f32 %v11434_v18, %v18568_v60 }
0x16aa   :  { %v11933_v47 = vpop.f32.mrb[62].mxu0 }
0x16ab   :  { %v11937_v51 = vadd.f32 %v17522_v7, %v11933_v47  ;;  %v15814_v19 = vpop.f32.mrb[63].mxu0 }
0x16ad   :  { %v11938_v37 = vmul.f32 0.5, %v11937_v51 }
0x16af   :  { %v11939_v21 = vsel %vm17512_vm5, %v11937_v51, %v11938_v37 }
0x16b0   :  { %17116 = vtanh.f32 %v11939_v21 }
0x16ba   :  { %v17117_v23 = vpop.eup %17116 }
0x16bb   :  { %v11941_v9 = vadd.f32 1.0, %v17117_v23 }
0x16bd   :  { %v11942_v50 = vmul.f32 0.5, %v11941_v9 }
0x16bf   :  { %v11943_v15 = vsel %vm17512_vm5, %v17117_v23, %v11942_v50 }
0x16c0   :  { %11946 = vrot.lane.b32.xlu1 %v11943_v15, %s17158_s3  ;;  %v11944_v13 = vmul.f32 %v11943_v15, %v18573_v20 }
0x1712   :  { %v11438_v54 = vpop.permute.xlu0 %11437 }
0x1713   :  { %v11440_v0 = vmul.f32 %v11438_v54, %v11434_v18 }
0x1715   :  { %11442 = vrot.lane.b32.xlu0 %v11440_v0, %s17159_s26 }
0x1732   :  { %v11947_v56 = vpop.permute.xlu1 %11946 }
0x1733   :  { %v11949_v7 = vmul.f32 %v11947_v56, %v11943_v15 }
0x1735   :  { %11951 = vrot.lane.b32.xlu1 %v11949_v7, %s17159_s26 }
0x1787   :  { %v11443_v52 = vpop.permute.xlu0 %11442 }
0x1788   :  { %v18729_v58 = vadd.f32 %v11443_v52, %v11435_v55 }
0x178a   :  { %17118 = vtanh.f32 %v18729_v58 }
0x1794   :  { %v17119_v1 = vpop.eup %17118 }
0x1795   :  { %11448 = vrot.lane.b32.xlu0 %v17119_v1, %s17158_s3 }
0x17a7   :  { %v11952_v61 = vpop.permute.xlu1 %11951 }
0x17a8   :  { %v11954_v4 = vadd.f32 %v11952_v61, %v11944_v13 }
0x17aa   :  { %17120 = vtanh.f32 %v11954_v4 }
0x17b4   :  { %v17121_v62 = vpop.eup %17120 }
0x17b5   :  { %11957 = vrot.lane.b32.xlu1 %v17121_v62, %s17158_s3 }
0x1807   :  { %v11449_v3 = vpop.permute.xlu0 %11448 }
0x1808   :  { %v11451_v5 = vmul.f32 %v11449_v3, %v11434_v18 }
0x180a   :  { %11962 = vrot.lane.b32.xlu0 %v11451_v5, %s17159_s26 }
0x1827   :  { %v11958_v60 = vpop.permute.xlu1 %11957 }
0x1828   :  { %v11960_v6 = vmul.f32 %v11958_v60, %v11943_v15 }
0x182a   :  { %12452 = vrot.lane.b32.xlu1 %v11960_v6, %s17159_s26 }
0x187c   :  { %v11963_v11 = vpop.permute.xlu0 %11962 }
0x187d   :  { %v11964_v10 = vsel %vm856_vm6, %v11963_v11, 0 }
0x187e   :  { %v12035_v39 = vand.u32 4294901760, %v11964_v10 }
0x1880   :  { %v12036_v28 = vsub.f32 %v11964_v10, %v12035_v39 }
0x1882   :  { %v12037_v20 = vand.u32 4294901760, %v12036_v28 }
0x1884   :  { %v12038_v25 = vsub.f32 %v12036_v28, %v12037_v20 }
0x1886   :  { %v12039_v43 = vand.u32 4294901760, %v12038_v25 }
0x1888   :  { %15824 = vmatmul.mubr.f32.vlgmr.msra.gmra.mrb[136].mxu1 %v12039_v43 }
0x1889   :  { %16813 = vmatpush3.bf16.msra.mxu1 %v17575_v12  ;;  %15834 = vmatprep.mubr.msk.f32.mxu1 %vm17156_vm2, %v17157_v46 }
0x188a   :  { %16814 = vmatprep.subr.bf16.mxu1 %v17155_v8 }
0x188d   :  { %16816 = vmatpush3.bf16.msra.mxu1 %v17581_v16 }
0x188e   :  { %16817 = vmatprep.subr.bf16.mxu1 %v17155_v8 }
0x1890   :  { %15835 = vmatmul.mubr.f32.vlgmr.msra.gmra.mrb[138].mxu1 %v12035_v39 }
0x1891   :  { %16819 = vmatpush3.bf16.msra.mxu1 %v17589_v17  ;;  %15845 = vmatprep.mubr.msk.f32.mxu1 %vm17156_vm2, %v17157_v46 }
0x1892   :  { %16820 = vmatprep.subr.bf16.mxu1 %v17155_v8 }
0x1895   :  { %16822 = vmatpush3.bf16.msra.mxu1 %v17594_v26 }
0x1896   :  { %16823 = vmatprep.subr.bf16.mxu1 %v17155_v8 }
0x1898   :  { %15846 = vmatmul.mubr.f32.vlgmr.msra.gmra.mrb[140].mxu1 %v12036_v28  ;;  %v12966_v28 = vld [vmem:[#allocation2 + $0x8] sm:$0xff] }
0x1899   :  { %16825 = vmatpush3.bf16.msra.mxu1 %v17556_v30  ;;  %15856 = vmatprep.mubr.msk.f32.mxu1 %vm17156_vm2, %v17157_v46  ;;  %v12985_v25 = vand.u32 4294901760, %v12966_v28 }
0x189a   :  { %16826 = vmatprep.subr.bf16.mxu1 %v17155_v8 }
0x189c   :  { %v12453_v12 = vpop.permute.xlu1 %12452 }
0x189d   :  { %16828 = vmatpush3.bf16.msra.mxu1 %v17561_v38  ;;  %v12454_v16 = vsel %vm856_vm6, %v12453_v12, 0  ;;  %v13069_v12 = vsub.f32 %v12966_v28, %v12985_v25 }
0x189e   :  { %v12525_v17 = vand.u32 4294901760, %v12454_v16  ;;  %16829 = vmatprep.subr.bf16.mxu1 %v17155_v8 }
0x18a0   :  { %v12526_v24 = vsub.f32 %v12454_v16, %v12525_v17  ;;  %15857 = vmatmul.mubr.f32.vlgmr.msra.gmra.mrb[142].mxu1 %v12037_v20  ;;  %v12967_v16 = vld [vmem:[#allocation2 + $0x10] sm:$0xff] }
0x18a1   :  { %16831 = vmatpush3.bf16.msra.mxu1 %v17609_v36  ;;  %15867 = vmatprep.mubr.msk.f32.mxu1 %vm17156_vm2, %v17157_v46 }
0x18a2   :  { %v12527_v26 = vand.u32 4294901760, %v12526_v24  ;;  %16832 = vmatprep.subr.bf16.mxu1 %v17155_v8 }
0x18a4   :  { %v12528_v57 = vsub.f32 %v12526_v24, %v12527_v26 }
0x18a5   :  { %16834 = vmatpush3.bf16.msra.mxu1 %v17617_v45 }
0x18a6   :  { %v12529_v49 = vand.u32 4294901760, %v12528_v57  ;;  %16835 = vmatprep.subr.bf16.mxu1 %v17155_v8  ;;  %v13070_v57 = vand.u32 4294901760, %v13069_v12 }
0x18a8   :  { %15868 = vmatmul.mubr.f32.vlgmr.msra.gmra.mrb[144].mxu1 %v12035_v39  ;;  %15890 = vmatmul.mubr.f32.vlgmr.msra.gmra.mrb[64].mxu0 %v12529_v49 }
0x18a9   :  { %16837 = vmatpush3.bf16.msra.mxu1 %v17556_v30  ;;  %16855 = vmatpush3.bf16.msra.mxu0 %v17682_v27 }
0x18aa   :  { %16838 = vmatprep.subr.bf16.mxu1 %v17155_v8  ;;  %16856 = vmatprep.subr.bf16.mxu0 %v17155_v8 }
0x18ab   :  { %15878 = vmatprep.mubr.msk.f32.mxu1 %vm17156_vm2, %v17157_v46  ;;  %15911 = vmatprep.mubr.msk.f32.mxu0 %vm17156_vm2, %v17157_v46 }
0x18ad   :  { %16840 = vmatpush3.bf16.msra.mxu1 %v17561_v38  ;;  %16858 = vmatpush3.bf16.msra.mxu0 %v17690_v29 }
0x18ae   :  { %16847 = vmatprep.subr.bf16.mxu1 %v17155_v8  ;;  %16865 = vmatprep.subr.bf16.mxu0 %v17155_v8 }
0x18b0   :  { %15879 = vmatmul.mubr.f32.vlgmr.msra.gmra.mrb[146].mxu1 %v12035_v39  ;;  %15912 = vmatmul.mubr.f32.vlgmr.msra.gmra.mrb[66].mxu0 %v12526_v24  ;;  %v12965_v39 = vld [vmem:[#allocation2] sm:$0xff]  ;;  %v12988_v24 = vand.u32 4294901760, %v12967_v16 }
0x18b1   :  { %16849 = vmatpush3.bf16.msra.mxu1 %v17649_v31  ;;  %16867 = vmatpush3.bf16.msra.mxu0 %v17704_v41  ;;  %v12982_v20 = vand.u32 4294901760, %v12965_v39 }
0x18b2   :  { %16850 = vmatprep.subr.bf16.mxu1 %v17155_v8  ;;  %16868 = vmatprep.subr.bf16.mxu0 %v17155_v8 }
0x18b3   :  { %15900 = vmatprep.mubr.msk.f32.mxu1 %vm17156_vm2, %v17157_v46  ;;  %15933 = vmatprep.mubr.msk.f32.mxu0 %vm17156_vm2, %v17157_v46  ;;  %v18809_v63 = vpack.c.bf16 %v12985_v25, %v12982_v20  ;;  %v13062_v43 = vsub.f32 %v12965_v39, %v12982_v20 }
0x18b5   :  { %16852 = vmatpush3.bf16.msra.mxu1 %v17654_v40  ;;  %16870 = vmatpush3.bf16.msra.mxu0 %v17715_v42 }
0x18b6   :  { %16859 = vmatprep.subr.bf16.mxu1 %v17155_v8  ;;  %16877 = vmatprep.subr.bf16.mxu0 %v17155_v8 }
0x18b8   :  { %15901 = vmatmul.mubr.f32.vlgmr.msra.gmra.mrb[148].mxu1 %v12525_v17  ;;  %15934 = vmatmul.mubr.f32.vlgmr.msra.gmra.mrb[68].mxu0 %v12525_v17 }
0x18b9   :  { %16861 = vmatpush3.bf16.msra.mxu1 %v17558_v34  ;;  %15922 = vmatprep.mubr.msk.f32.mxu1 %vm17156_vm2, %v17157_v46 }
0x18ba   :  { %16862 = vmatprep.subr.bf16.mxu1 %v17155_v8  ;;  %15955 = vmatprep.mubr.msk.f32.mxu0 %vm17156_vm2, %v17157_v46 }
0x18bb   :  { %16879 = vmatpush3.bf16.msra.mxu0 %v18809_v63 }
0x18bc   :  { %16880 = vmatprep.subr.bf16.mxu0 %v17155_v8 }
0x18bd   :  { %16864 = vmatpush3.bf16.msra.mxu1 %v17578_v14 }
0x18be   :  { %16871 = vmatprep.subr.bf16.mxu1 %v17155_v8 }
0x18c0   :  { %15923 = vmatmul.mubr.f32.vlgmr.msra.gmra.mrb[150].mxu1 %v12527_v26  ;;  %v13063_v26 = vand.u32 4294901760, %v13062_v43 }
0x18c1   :  { %16873 = vmatpush3.bf16.msra.mxu1 %v17558_v34  ;;  %15944 = vmatprep.mubr.msk.f32.mxu1 %vm17156_vm2, %v17157_v46 }
0x18c2   :  { %16874 = vmatprep.subr.bf16.mxu1 %v17155_v8 }
0x18c5   :  { %16876 = vmatpush3.bf16.msra.mxu1 %v17578_v14 }
0x18c8   :  { %15945 = vmatmul.mubr.f32.vlgmr.msra.gmra.mrb[152].mxu1 %v12525_v17  ;;  %v12968_v17 = vld [vmem:[#allocation2 + $0x18] sm:$0xff] }
0x195b   :  { %v12041_v30 = vpop.f32.mrb[136].mxu1 }
0x195c   :  { %v15825_v38 = vpop.f32.mrb[137].mxu1 }
0x1963   :  { %v12132_v36 = vpop.f32.mrb[138].mxu1 }
0x1964   :  { %v12133_v45 = vadd.f32 %v12132_v36, %v12041_v30  ;;  %v15836_v31 = vpop.f32.mrb[139].mxu1  ;;  %v13076_v30 = vsub.f32 %v12967_v16, %v12988_v24  ;;  %v13064_v36 = vsub.f32 %v13062_v43, %v13063_v26 }
0x1966   :  { %v13065_v31 = vand.u32 4294901760, %v13064_v36 }
0x196b   :  { %v12212_v40 = vpop.f32.mrb[140].mxu1 }
0x196c   :  { %v12213_v27 = vadd.f32 %v12212_v40, %v12133_v45  ;;  %v15847_v29 = vpop.f32.mrb[141].mxu1  ;;  %v13071_v45 = vsub.f32 %v13069_v12, %v13070_v57  ;;  %v13077_v40 = vand.u32 4294901760, %v13076_v30 }
0x196e   :  { %v13072_v29 = vand.u32 4294901760, %v13071_v45 }
0x1973   :  { %v12289_v41 = vpop.f32.mrb[142].mxu1 }
0x1974   :  { %v12290_v42 = vadd.f32 %v12289_v41, %v12213_v27  ;;  %v15858_v32 = vpop.f32.mrb[143].mxu1 }
0x197b   :  { %v12372_v34 = vpop.f32.mrb[144].mxu1  ;;  %v12531_v35 = vpop.f32.mrb[64].mxu0 }
0x197c   :  { %v12373_v2 = vadd.f32 %v12372_v34, %v12290_v42  ;;  %v15869_v33 = vpop.f32.mrb[145].mxu1  ;;  %v15891_v48 = vpop.f32.mrb[65].mxu0  ;;  %v13078_v42 = vsub.f32 %v13076_v30, %v13077_v40 }
0x1983   :  { %v12447_v22 = vpop.f32.mrb[146].mxu1  ;;  %v12702_v53 = vpop.f32.mrb[66].mxu0 }
0x1984   :  { %v12448_v14 = vadd.f32 %v12447_v22, %v12373_v2  ;;  %v15880_v59 = vpop.f32.mrb[147].mxu1  ;;  %v15913_v18 = vpop.f32.mrb[67].mxu0  ;;  %v13079_v2 = vand.u32 4294901760, %v13078_v42  ;;  %v16890_v22 = vpack.c.bf16 %v13069_v12, %v13062_v43 }
0x1986   :  { %v12532_v47 = vadd.f32 %v12531_v35, %v12448_v14  ;;  %v16884_v35 = vpack.c.bf16 %v13072_v29, %v13065_v31  ;;  %v16902_v14 = vpack.c.bf16 %v13070_v57, %v13063_v26 }
0x198b   :  { %v12622_v51 = vpop.f32.mrb[148].mxu1  ;;  %v12862_v19 = vpop.f32.mrb[68].mxu0 }
0x198c   :  { %v12623_v37 = vadd.f32 %v12622_v51, %v12532_v47  ;;  %v15902_v21 = vpop.f32.mrb[149].mxu1  ;;  %v15935_v23 = vpop.f32.mrb[69].mxu0 }
0x198e   :  { %v12703_v9 = vadd.f32 %v12702_v53, %v12623_v37 }
0x1993   :  { %v12779_v50 = vpop.f32.mrb[150].mxu1 }
0x1994   :  { %v12780_v15 = vadd.f32 %v12779_v50, %v12703_v9  ;;  %v15924_v54 = vpop.f32.mrb[151].mxu1  ;;  %v13474_v9 = vld [vmem:[%s18851_s8] ss:$0 sm:$0xff] }
0x1996   :  { %v12863_v0 = vadd.f32 %v12862_v19, %v12780_v15 }
0x199b   :  { %v12937_v56 = vpop.f32.mrb[152].mxu1 }
0x199c   :  { %v12938_v7 = vadd.f32 %v12937_v56, %v12863_v0  ;;  %v15946_v55 = vpop.f32.mrb[153].mxu1 }
0x199e   :  { %v12941_v52 = vadd.f32 %v18712_v44, %v12938_v7 }
0x19a0   :  { %v12942_v1 = vmul.f32 0.5, %v12941_v52 }
0x19a2   :  { %v12943_v13 = vsel %vm17512_vm5, %v12941_v52, %v12942_v1 }
0x19a3   :  { %17122 = vtanh.f32 %v12943_v13 }
0x19ad   :  { %v17123_v61 = vpop.eup %17122 }
0x19ae   :  { %v12945_v4 = vadd.f32 1.0, %v17123_v61 }
0x19b0   :  { %v12946_v62 = vmul.f32 0.5, %v12945_v4 }
0x19b2   :  { %v12947_v3 = vsel %vm17512_vm5, %v17123_v61, %v12946_v62 }
0x19b3   :  { %12950 = vrot.lane.b32.xlu0 %v12947_v3, %s17158_s3  ;;  %v12948_v6 = vmul.f32 %v12947_v3, %v18729_v58  ;;  %v12991_v58 = vand.u32 4294901760, %v12968_v17 }
0x19b5   :  { %v16881_v49 = vpack.c.bf16 %v12991_v58, %v12988_v24  ;;  %v13083_v38 = vsub.f32 %v12968_v17, %v12991_v58 }
0x19b7   :  { %16882 = vmatpush3.bf16.msra.mxu0 %v16881_v49  ;;  %v13084_v27 = vand.u32 4294901760, %v13083_v38  ;;  %v16893_v53 = vpack.c.bf16 %v13083_v38, %v13076_v30 }
0x19b8   :  { %16883 = vmatprep.subr.bf16.mxu0 %v17155_v8 }
0x19b9   :  { %v13085_v32 = vsub.f32 %v13083_v38, %v13084_v27  ;;  %v16905_v59 = vpack.c.bf16 %v13084_v27, %v13077_v40 }
0x19bb   :  { %v13086_v33 = vand.u32 4294901760, %v13085_v32 }
0x19bd   :  { %v16887_v48 = vpack.c.bf16 %v13086_v33, %v13079_v2 }
0x1a25   :  { %v12951_v5 = vpop.permute.xlu0 %12950 }
0x1a26   :  { %v12953_v60 = vmul.f32 %v12951_v5, %v12947_v3 }
0x1a28   :  { %12955 = vrot.lane.b32.xlu1 %v12953_v60, %s17159_s26 }
0x1a9a   :  { %v12956_v44 = vpop.permute.xlu1 %12955 }
0x1a9b   :  { %v12958_v11 = vadd.f32 %v12956_v44, %v12948_v6 }
0x1a9d   :  { %17124 = vtanh.f32 %v12958_v11 }
0x1aa7   :  { %v17125_v10 = vpop.eup %17124 }
0x1aa8   :  { %12961 = vrot.lane.b32.xlu0 %v17125_v10, %s17158_s3 }
0x1b1a   :  { %v12962_v41 = vpop.permute.xlu0 %12961 }
0x1b1b   :  { %v12964_v34 = vmul.f32 %v12962_v41, %v12947_v3 }
0x1b1d   :  { %12977 = vrot.lane.b32.xlu1 %v12964_v34, %s17159_s26 }
0x1b8f   :  { %v12978_v18 = vpop.permute.xlu1 %12977 }
0x1b90   :  { %v12979_v47 = vsel %vm856_vm6, %v12978_v18, 0 }
0x1b91   :  { %v13050_v51 = vand.u32 4294901760, %v12979_v47 }
0x1b93   :  { %v13051_v19 = vsub.f32 %v12979_v47, %v13050_v51 }
0x1b95   :  { %v13052_v37 = vand.u32 4294901760, %v13051_v19 }
0x1b97   :  { %v13053_v21 = vsub.f32 %v13051_v19, %v13052_v37 }
0x1b99   :  { %v13054_v23 = vand.u32 4294901760, %v13053_v21 }
0x1b9b   :  { %15956 = vmatmul.mubr.f32.vlgmr.msra.gmra.mrb[70].mxu0 %v13054_v23 }
0x1b9c   :  { %16885 = vmatpush3.bf16.msra.mxu0 %v16884_v35  ;;  %15966 = vmatprep.mubr.msk.f32.mxu0 %vm17156_vm2, %v17157_v46 }
0x1b9d   :  { %16886 = vmatprep.subr.bf16.mxu0 %v17155_v8 }
0x1ba0   :  { %16888 = vmatpush3.bf16.msra.mxu0 %v16887_v48 }
0x1ba1   :  { %16889 = vmatprep.subr.bf16.mxu0 %v17155_v8 }
0x1ba3   :  { %15967 = vmatmul.mubr.f32.vlgmr.msra.gmra.mrb[70].mxu0 %v13050_v51 }
0x1ba4   :  { %16891 = vmatpush3.bf16.msra.mxu0 %v16890_v22  ;;  %15977 = vmatprep.mubr.msk.f32.mxu0 %vm17156_vm2, %v17157_v46 }
0x1ba5   :  { %16892 = vmatprep.subr.bf16.mxu0 %v17155_v8 }
0x1ba8   :  { %16894 = vmatpush3.bf16.msra.mxu0 %v16893_v53 }
0x1ba9   :  { %16895 = vmatprep.subr.bf16.mxu0 %v17155_v8 }
0x1bab   :  { %15978 = vmatmul.mubr.f32.vlgmr.msra.gmra.mrb[70].mxu0 %v13051_v19 }
0x1bac   :  { %16897 = vmatpush3.bf16.msra.mxu0 %v18809_v63  ;;  %15988 = vmatprep.mubr.msk.f32.mxu0 %vm17156_vm2, %v17157_v46 }
0x1bad   :  { %16898 = vmatprep.subr.bf16.mxu0 %v17155_v8 }
0x1bb0   :  { %16900 = vmatpush3.bf16.msra.mxu0 %v16881_v49 }
0x1bb1   :  { %16901 = vmatprep.subr.bf16.mxu0 %v17155_v8 }
0x1bb3   :  { %15989 = vmatmul.mubr.f32.vlgmr.msra.gmra.mrb[70].mxu0 %v13052_v37 }
0x1bb4   :  { %16903 = vmatpush3.bf16.msra.mxu0 %v16902_v14  ;;  %15999 = vmatprep.mubr.msk.f32.mxu0 %vm17156_vm2, %v17157_v46 }
0x1bb5   :  { %16904 = vmatprep.subr.bf16.mxu0 %v17155_v8 }
0x1bb8   :  { %16906 = vmatpush3.bf16.msra.mxu0 %v16905_v59 }
0x1bb9   :  { %16907 = vmatprep.subr.bf16.mxu0 %v17155_v8 }
0x1bbb   :  { %16000 = vmatmul.mubr.f32.vlgmr.msra.gmra.mrb[70].mxu0 %v13050_v51 }
0x1bbc   :  { %16909 = vmatpush3.bf16.msra.mxu0 %v18809_v63  ;;  %16010 = vmatprep.mubr.msk.f32.mxu0 %vm17156_vm2, %v17157_v46 }
0x1bbd   :  { %16910 = vmatprep.subr.bf16.mxu0 %v17155_v8 }
0x1bc0   :  { %16912 = vmatpush3.bf16.msra.mxu0 %v16881_v49 }
0x1bc3   :  { %16011 = vmatmul.mubr.f32.vlgmr.msra.gmra.mrb[70].mxu0 %v13050_v51 }
0x1c96   :  { %v13462_v50 = vpop.f32.mrb[70].mxu0 }
0x1c97   :  { %v16931_v15 = vadd.f32 %v13474_v9, %v13462_v50  ;;  %v16012_v54 = vpop.f32.mrb[71].mxu0 }
0x1c99   :  { %13466 = vst [vmem:[%s18852_s9] sm:$0xff] %v16931_v15 }
0x1c9a   :  { %13471 = vsyncpa [#allocation3], 1 }

</bundles_post_ra>
